<compile_context>
chip_gen: v7x
topology: tpu7x:2x2x1
jax: 0.10.0
libtpu: 0.0.40
codegen_flags: <defaults>
</compile_context>

<pallas_src>
import numpy as np
import jax
import jax.numpy as jnp
from jax import lax
from jax.experimental import pallas as pl
from jax.experimental.pallas import tpu as pltpu

ALPHA = 1.0          # ELU alpha
BN_EPS = 1e-5
KSIZE = 10           # conv kernel width
POOL = 3             # maxpool width
HIDDEN = 10          # LSTM hidden size
CONV_SPECS = [(22, 25), (25, 50), (50, 100), (100, 200)]


# ----------------------------- Pallas kernel ------------------------------ #

def _conv_block(hp, w_ref, b_ref, sc_ref, sh_ref, sel_ref):
    """Conv(k=10,'same') + ELU + MaxPool(3) + BN(eval) for the whole batch.

    hp: (B*Wp, Cin) f32, padded-stride layout (see module docstring).
    Returns sel_ref @ (BN(pool(ELU(conv(hp))))): either the next block's padded
    layout or, for the last block, the (B, Cout) flattened features.
    """
    n_rows = hp.shape[0]
    r = n_rows - (KSIZE - 1)                  # number of valid window starts

    # im2col: stack the K shifted windows along lanes -> one MXU matmul with a
    # K*Cin contraction dim (fills the 128/256-wide systolic array).
    windows = jnp.concatenate([hp[k:k + r, :] for k in range(KSIZE)], axis=1)
    acc = jnp.dot(windows.astype(jnp.bfloat16), w_ref[...],
                  preferred_element_type=jnp.float32) + b_ref[...]

    # ELU (VPU/EUP math stays f32; clamp before exp so the unselected branch
    # cannot overflow even with large activations).
    acc = jnp.where(acc > 0.0, acc,
                    ALPHA * (jnp.exp(jnp.minimum(acc, 0.0)) - 1.0))

    # MaxPool2d((1,3)): vectorized running max of 3 consecutive rows; the rows
    # actually needed (every 3rd, per sample) are picked by sel_ref below.
    m = jnp.maximum(jnp.maximum(acc[:r - 2, :], acc[1:r - 1, :]), acc[2:, :])

    # BatchNorm (eval, folded to per-channel scale/shift), then pool-row
    # selection + zero re-padding for the next block in one 0/1 matmul
    # (all-zero selector rows yield exact zeros, so padding stays exact).
    return jnp.dot(sel_ref[...], m * sc_ref[...] + sh_ref[...],
                   preferred_element_type=jnp.float32)


def cnn_lstm_kernel(x_ref, s0_ref,
                    w1, b1, sc1, sh1, p1,
                    w2, b2, sc2, sh2, p2,
                    w3, b3, sc3, sh3, p3,
                    w4, b4, sc4, sh4, p4,
                    fcw, fcb, f2w, f2b,
                    out_ref):
    # Build the block-1 padded layout for the whole batch with one selection
    # matmul (replaces per-sample zero-pad concatenates and the batch loop).
    hp = jnp.dot(s0_ref[...], x_ref[...], preferred_element_type=jnp.float32)

    hp = _conv_block(hp, w1, b1, sc1, sh1, p1)
    hp = _conv_block(hp, w2, b2, sc2, sh2, p2)
    hp = _conv_block(hp, w3, b3, sc3, sh3, p3)
    x_flat = _conv_block(hp, w4, b4, sc4, sh4, p4)        # (B, 200)

    # fc1 (Flatten + LazyLinear(100)) folded into the LSTM input projection:
    #   gates = (x @ fc1_w.T + fc1_b) @ W_ih.T + b_ih + b_hh
    #         = x @ (fc1_w.T @ W_ih.T) + (fc1_b @ W_ih.T + b_ih + b_hh)
    gates = jnp.dot(x_flat, fcw[...],
                    preferred_element_type=jnp.float32) + fcb[...]   # (B, 40)

    # LSTM(100 -> 10), 1 layer, seq_len = 1, h0 = c0 = 0:
    # forget gate multiplies c0 == 0 and drops out of the math.
    i_g = jax.nn.sigmoid(gates[:, 0 * HIDDEN:1 * HIDDEN])
    g_g = jnp.tanh(gates[:, 2 * HIDDEN:3 * HIDDEN])
    o_g = jax.nn.sigmoid(gates[:, 3 * HIDDEN:4 * HIDDEN])
    h_t = o_g * jnp.tanh(i_g * g_g)                                   # (B, 10)

    # fc2 (Flatten + Linear(10, 4))
    out_ref[...] = (jnp.dot(h_t, f2w[...], preferred_element_type=jnp.float32)
                    + f2b[...])


# ----------------------- selection-matrix construction --------------------- #

def _build_selection_matrices(B, W0):
    """Host-side 0/1 matrices (trace-time constants):
       sels[0]: compact (B*W0, C) input  -> block-1 padded layout (B*(W0+9), C)
       sels[i]: block-i 3-max rows       -> block-(i+1) padded layout
       sels[4]: block-4 3-max rows       -> final (B, 200) flattened features
    """
    Ws = [W0]
    for _ in range(4):
        Ws.append(Ws[-1] // POOL)
    assert Ws[-1] == 1, "choose W0 so the final spatial width is 1 (e.g. 81)"
    Wps = [w + KSIZE - 1 for w in Ws[:4]]     # padded per-sample widths

    sels = []
    s0 = np.zeros((B * Wps[0], B * Ws[0]), np.float32)
    for b in range(B):
        for w in range(Ws[0]):
            s0[b * Wps[0] + 4 + w, b * Ws[0] + w] = 1.0
    sels.append(s0)

    for i in range(4):
        rm = B * Wps[i] - (KSIZE - 1) - (POOL - 1)   # rows of the 3-max array
        w_next = Ws[i + 1]
        if i < 3:
            wp_next = Wps[i + 1]
            s = np.zeros((B * wp_next, rm), np.float32)
            for b in range(B):
                for j in range(w_next):
                    s[b * wp_next + 4 + j, b * Wps[i] + POOL * j] = 1.0
        else:                                        # last block -> (B, feat)
            s = np.zeros((B, rm), np.float32)
            for b in range(B):
                s[b, b * Wps[i]] = 1.0
        sels.append(s)
    return [jnp.asarray(s) for s in sels]


# ------------------------------- wrapper ----------------------------------- #

def cnn_lstm_forward(x_nchw, params):
    B, Cin, H, W0 = x_nchw.shape
    assert Cin == 22 and H == 1
    sels = _build_selection_matrices(B, W0)

    # NCHW -> (B*W, C) channels-last 2-D layout.  A single tiny (~14 KB) fused
    # XLA transpose; under jit it fuses with the producer.
    x2d = jnp.transpose(x_nchw[:, :, 0, :], (0, 2, 1)).reshape(B * W0, Cin)
    x2d = x2d.astype(jnp.float32)

    args = [x2d, sels[0]]
    for (w, b, sc, sh), sel in zip(params["conv"], sels[1:]):
        args += [w, b, sc, sh, sel]
    args += [params["fc_comb"][0], params["fc_comb"][1],
             params["fc2"][0], params["fc2"][1]]

    # Everything (weights ~0.6 MB + activations <0.5 MB) fits in VMEM, so a
    # single ungridded invocation with whole-array VMEM blocks is used.
    # On v7x one could add grid=(B,) + dimension_semantics=("parallel",) to
    # shard samples across the 2 TensorCores; kept single-shot for v5e/v6e.
    return pl.pallas_call(
        cnn_lstm_kernel,
        out_shape=jax.ShapeDtypeStruct((B, 4), jnp.float32),
        in_specs=[pl.BlockSpec(memory_space=pltpu.MemorySpace.VMEM)] * len(args),
        out_specs=pl.BlockSpec(memory_space=pltpu.MemorySpace.VMEM),
    )(*args)


# --------------------------- parameter setup ------------------------------- #

def init_params(key, w0):
    """Deterministic PyTorch-style init.  Returns (kernel params dict,
    torch-layout params for the plain-JAX reference)."""
    w_final = w0
    for _ in range(4):
        w_final //= POOL
    assert w_final == 1, "pick W0 so the final spatial width is 1 (e.g. 81)"
    flat_dim = 200 * w_final

    keys = iter(jax.random.split(key, 40))
    conv_args = []
    torch_params = {}

    for li, (cin, cout) in enumerate(CONV_SPECS):
        bound = 1.0 / np.sqrt(cin * KSIZE)
        w = jax.random.uniform(next(keys), (cout, cin, 1, KSIZE),
                               jnp.float32, -bound, bound)             # OIHW
        b = jax.random.uniform(next(keys), (cout,), jnp.float32, -bound, bound)
        gamma = jax.random.uniform(next(keys), (cout,), jnp.float32, 0.5, 1.5)
        beta = jax.random.uniform(next(keys), (cout,), jnp.float32, -0.1, 0.1)
        r_mean = jax.random.uniform(next(keys), (cout,), jnp.float32, -0.1, 0.1)
        r_var = jax.random.uniform(next(keys), (cout,), jnp.float32, 0.5, 1.5)
        scale = gamma / jnp.sqrt(r_var + BN_EPS)
        shift = beta - r_mean * scale
        # (Cout, Cin, 1, K) -> (K, Cin, Cout) -> (K*Cin, Cout); bf16 MXU operand
        # (accumulation stays f32 via preferred_element_type).
        w_im2col = jnp.transpose(w[:, :, 0, :], (2, 1, 0)).reshape(KSIZE * cin, cout)
        conv_args.append((w_im2col.astype(jnp.bfloat16),
                          b[None, :], scale[None, :], shift[None, :]))
        torch_params[f"conv{li}"] = (w, b, scale, shift)

    # fc1: LazyLinear(100) with inferred in_features = flat_dim
    bnd = 1.0 / np.sqrt(flat_dim)
    fc1_w = jax.random.uniform(next(keys), (100, flat_dim), jnp.float32, -bnd, bnd)
    fc1_b = jax.random.uniform(next(keys), (100,), jnp.float32, -bnd, bnd)

    # LSTM(100, 10): weight_ih (40,100), biases (40,). weight_hh is inert for
    # seq_len==1 with zero initial state, so it is not needed by the kernel.
    bnd = 1.0 / np.sqrt(HIDDEN)
    w_ih = jax.random.uniform(next(keys), (4 * HIDDEN, 100), jnp.float32, -bnd, bnd)
    b_ih = jax.random.uniform(next(keys), (4 * HIDDEN,), jnp.float32, -bnd, bnd)
    b_hh = jax.random.uniform(next(keys), (4 * HIDDEN,), jnp.float32, -bnd, bnd)

    # fc2: Linear(10, 4)
    bnd = 1.0 / np.sqrt(HIDDEN)
    fc2_w = jax.random.uniform(next(keys), (4, HIDDEN), jnp.float32, -bnd, bnd)
    fc2_b = jax.random.uniform(next(keys), (4,), jnp.float32, -bnd, bnd)

    # Fold fc1 into the LSTM input projection (exact, no nonlinearity between).
    w_comb = fc1_w.T @ w_ih.T                     # (flat_dim, 40)
    b_comb = fc1_b @ w_ih.T + b_ih + b_hh         # (40,)

    params = {
        "conv": conv_args,
        "fc_comb": (w_comb, b_comb[None, :]),
        "fc2": (fc2_w.T, fc2_b[None, :]),
    }
    torch_params["fc1"] = (fc1_w, fc1_b)
    torch_params["lstm"] = (w_ih, b_ih, b_hh)
    torch_params["fc2"] = (fc2_w, fc2_b)
    return params, torch_params


# ----------------------- plain-JAX reference (NCHW) ------------------------ #

def reference_forward(x, tp):
    h = x.astype(jnp.float32)
    for li in range(4):
        w, b, scale, shift = tp[f"conv{li}"]
        h = lax.conv_general_dilated(
            h, w, window_strides=(1, 1), padding=((0, 0), (4, 5)),
            dimension_numbers=("NCHW", "OIHW", "NCHW"))
        h = h + b[None, :, None, None]
        h = jnp.where(h > 0, h, ALPHA * (jnp.exp(h) - 1.0))
        B_, C_, H_, W_ = h.shape
        h = h[:, :, :, :(W_ // POOL) * POOL].reshape(
            B_, C_, H_, W_ // POOL, POOL).max(axis=-1)
        h = h * scale[None, :, None, None] + shift[None, :, None, None]
    flat = h.reshape(h.shape[0], -1)
    fc1_w, fc1_b = tp["fc1"]
    f1 = flat @ fc1_w.T + fc1_b
    w_ih, b_ih, b_hh = tp["lstm"]
    gates = f1 @ w_ih.T + b_ih + b_hh
    i_g = jax.nn.sigmoid(gates[:, 0:HIDDEN])
    g_g = jnp.tanh(gates[:, 2 * HIDDEN:3 * HIDDEN])
    o_g = jax.nn.sigmoid(gates[:, 3 * HIDDEN:4 * HIDDEN])
    h_t = o_g * jnp.tanh(i_g * g_g)
    fc2_w, fc2_b = tp["fc2"]
    return h_t @ fc2_w.T + fc2_b


# ---------------------------------- main ----------------------------------- #

if __name__ == "__main__":
    key = jax.random.PRNGKey(0)
    k_x, k_p = jax.random.split(key)

    B, W0 = 2, 81                                  # 81 -> 27 -> 9 -> 3 -> 1
    x = jax.random.normal(k_x, (B, 22, 1, W0), jnp.float32)

    params, torch_params = init_params(k_p, W0)

    out = jax.jit(cnn_lstm_forward)(x, params)
    out = jax.block_until_ready(out)

    ref = reference_forward(x, torch_params)
    assert out.shape == (B, 4)
    # Kernel uses bf16 MXU operands for the conv matmuls (f32 accumulation);
    # tolerance is set with margin for that vs the all-f32 reference.
    assert jnp.allclose(out, ref, rtol=2e-2, atol=5e-2), (out, ref)

    print("KERNEL_OK")
</pallas_src>

<mosaic_0001>
module attributes {stable_mosaic.version = 11 : i64} {
  func.func @cnn_lstm_kernel(%arg0: memref<162x22xf32, #tpu.memory_space<vmem>>, %arg1: memref<180x162xf32, #tpu.memory_space<vmem>>, %arg2: memref<220x25xbf16, #tpu.memory_space<vmem>>, %arg3: memref<1x25xf32, #tpu.memory_space<vmem>>, %arg4: memref<1x25xf32, #tpu.memory_space<vmem>>, %arg5: memref<1x25xf32, #tpu.memory_space<vmem>>, %arg6: memref<72x169xf32, #tpu.memory_space<vmem>>, %arg7: memref<250x50xbf16, #tpu.memory_space<vmem>>, %arg8: memref<1x50xf32, #tpu.memory_space<vmem>>, %arg9: memref<1x50xf32, #tpu.memory_space<vmem>>, %arg10: memref<1x50xf32, #tpu.memory_space<vmem>>, %arg11: memref<36x61xf32, #tpu.memory_space<vmem>>, %arg12: memref<500x100xbf16, #tpu.memory_space<vmem>>, %arg13: memref<1x100xf32, #tpu.memory_space<vmem>>, %arg14: memref<1x100xf32, #tpu.memory_space<vmem>>, %arg15: memref<1x100xf32, #tpu.memory_space<vmem>>, %arg16: memref<24x25xf32, #tpu.memory_space<vmem>>, %arg17: memref<1000x200xbf16, #tpu.memory_space<vmem>>, %arg18: memref<1x200xf32, #tpu.memory_space<vmem>>, %arg19: memref<1x200xf32, #tpu.memory_space<vmem>>, %arg20: memref<1x200xf32, #tpu.memory_space<vmem>>, %arg21: memref<2x13xf32, #tpu.memory_space<vmem>>, %arg22: memref<200x40xf32, #tpu.memory_space<vmem>>, %arg23: memref<1x40xf32, #tpu.memory_space<vmem>>, %arg24: memref<10x4xf32, #tpu.memory_space<vmem>>, %arg25: memref<1x4xf32, #tpu.memory_space<vmem>>, %arg26: memref<2x4xf32, #tpu.memory_space<vmem>>) attributes {dimension_semantics = [], scalar_prefetch = 0 : i64, scratch_operands = 0 : i64, tpu.core_type = #tpu.core_type<tc>} {
    %c0 = arith.constant 0 : index
    %c0_0 = arith.constant 0 : index
    %0 = vector.load %arg1[%c0, %c0_0] : memref<180x162xf32, #tpu.memory_space<vmem>>, vector<180x162xf32>
    %c0_1 = arith.constant 0 : index
    %c0_2 = arith.constant 0 : index
    %1 = vector.load %arg0[%c0_1, %c0_2] : memref<162x22xf32, #tpu.memory_space<vmem>>, vector<162x22xf32>
    %cst = arith.constant dense<0.000000e+00> : vector<180x22xf32>
    %2 = tpu.matmul %0, %1, %cst {dimension_numbers = #tpu.dot_dimension_numbers<[1], [0], [0], [1], [0, 0, 1, 1], [], []>} : vector<180x162xf32>, vector<162x22xf32>, vector<180x22xf32> -> vector<180x22xf32>
    %3 = vector.extract_strided_slice %2 {offsets = [0, 0], sizes = [171, 22], strides = [1, 1]} : vector<180x22xf32> to vector<171x22xf32>
    %4 = vector.extract_strided_slice %2 {offsets = [1, 0], sizes = [171, 22], strides = [1, 1]} : vector<180x22xf32> to vector<171x22xf32>
    %5 = vector.extract_strided_slice %2 {offsets = [2, 0], sizes = [171, 22], strides = [1, 1]} : vector<180x22xf32> to vector<171x22xf32>
    %6 = vector.extract_strided_slice %2 {offsets = [3, 0], sizes = [171, 22], strides = [1, 1]} : vector<180x22xf32> to vector<171x22xf32>
    %7 = vector.extract_strided_slice %2 {offsets = [4, 0], sizes = [171, 22], strides = [1, 1]} : vector<180x22xf32> to vector<171x22xf32>
    %8 = vector.extract_strided_slice %2 {offsets = [5, 0], sizes = [171, 22], strides = [1, 1]} : vector<180x22xf32> to vector<171x22xf32>
    %9 = vector.extract_strided_slice %2 {offsets = [6, 0], sizes = [171, 22], strides = [1, 1]} : vector<180x22xf32> to vector<171x22xf32>
    %10 = vector.extract_strided_slice %2 {offsets = [7, 0], sizes = [171, 22], strides = [1, 1]} : vector<180x22xf32> to vector<171x22xf32>
    %11 = vector.extract_strided_slice %2 {offsets = [8, 0], sizes = [171, 22], strides = [1, 1]} : vector<180x22xf32> to vector<171x22xf32>
    %12 = vector.extract_strided_slice %2 {offsets = [9, 0], sizes = [171, 22], strides = [1, 1]} : vector<180x22xf32> to vector<171x22xf32>
    %13 = tpu.concatenate %3, %4, %5, %6, %7, %8, %9, %10, %11, %12 in 1 : vector<171x22xf32>, vector<171x22xf32>, vector<171x22xf32>, vector<171x22xf32>, vector<171x22xf32>, vector<171x22xf32>, vector<171x22xf32>, vector<171x22xf32>, vector<171x22xf32>, vector<171x22xf32> -> vector<171x220xf32>
    %14 = arith.truncf %13 : vector<171x220xf32> to vector<171x220xbf16>
    %c0_3 = arith.constant 0 : index
    %c0_4 = arith.constant 0 : index
    %15 = vector.load %arg2[%c0_3, %c0_4] : memref<220x25xbf16, #tpu.memory_space<vmem>>, vector<220x25xbf16>
    %cst_5 = arith.constant dense<0.000000e+00> : vector<171x25xf32>
    %16 = tpu.matmul %14, %15, %cst_5 {dimension_numbers = #tpu.dot_dimension_numbers<[1], [0], [0], [1], [0, 0, 1, 1], [], []>} : vector<171x220xbf16>, vector<220x25xbf16>, vector<171x25xf32> -> vector<171x25xf32>
    %c0_6 = arith.constant 0 : index
    %c0_7 = arith.constant 0 : index
    %17 = vector.load %arg3[%c0_6, %c0_7] : memref<1x25xf32, #tpu.memory_space<vmem>>, vector<1x25xf32>
    %18 = vector.broadcast %17 : vector<1x25xf32> to vector<171x25xf32>
    %19 = arith.addf %16, %18 : vector<171x25xf32>
    %cst_8 = arith.constant 0.000000e+00 : f32
    %20 = vector.broadcast %cst_8 : f32 to vector<171x25xf32>
    %21 = arith.cmpf ogt, %19, %20 : vector<171x25xf32>
    %cst_9 = arith.constant 0.000000e+00 : f32
    %22 = vector.broadcast %cst_9 : f32 to vector<171x25xf32>
    %23 = arith.minimumf %19, %22 : vector<171x25xf32>
    %24 = math.exp %23 : vector<171x25xf32>
    %cst_10 = arith.constant 1.000000e+00 : f32
    %25 = vector.broadcast %cst_10 : f32 to vector<171x25xf32>
    %26 = arith.subf %24, %25 : vector<171x25xf32>
    %cst_11 = arith.constant 1.000000e+00 : f32
    %27 = vector.broadcast %cst_11 : f32 to vector<171x25xf32>
    %28 = arith.mulf %27, %26 : vector<171x25xf32>
    %29 = arith.select %21, %19, %28 : vector<171x25xi1>, vector<171x25xf32>
    %30 = vector.extract_strided_slice %29 {offsets = [0, 0], sizes = [169, 25], strides = [1, 1]} : vector<171x25xf32> to vector<169x25xf32>
    %31 = vector.extract_strided_slice %29 {offsets = [1, 0], sizes = [169, 25], strides = [1, 1]} : vector<171x25xf32> to vector<169x25xf32>
    %32 = arith.maximumf %30, %31 : vector<169x25xf32>
    %33 = vector.extract_strided_slice %29 {offsets = [2, 0], sizes = [169, 25], strides = [1, 1]} : vector<171x25xf32> to vector<169x25xf32>
    %34 = arith.maximumf %32, %33 : vector<169x25xf32>
    %c0_12 = arith.constant 0 : index
    %c0_13 = arith.constant 0 : index
    %35 = vector.load %arg6[%c0_12, %c0_13] : memref<72x169xf32, #tpu.memory_space<vmem>>, vector<72x169xf32>
    %c0_14 = arith.constant 0 : index
    %c0_15 = arith.constant 0 : index
    %36 = vector.load %arg4[%c0_14, %c0_15] : memref<1x25xf32, #tpu.memory_space<vmem>>, vector<1x25xf32>
    %37 = vector.broadcast %36 : vector<1x25xf32> to vector<169x25xf32>
    %38 = arith.mulf %34, %37 : vector<169x25xf32>
    %c0_16 = arith.constant 0 : index
    %c0_17 = arith.constant 0 : index
    %39 = vector.load %arg5[%c0_16, %c0_17] : memref<1x25xf32, #tpu.memory_space<vmem>>, vector<1x25xf32>
    %40 = vector.broadcast %39 : vector<1x25xf32> to vector<169x25xf32>
    %41 = arith.addf %38, %40 : vector<169x25xf32>
    %cst_18 = arith.constant dense<0.000000e+00> : vector<72x25xf32>
    %42 = tpu.matmul %35, %41, %cst_18 {dimension_numbers = #tpu.dot_dimension_numbers<[1], [0], [0], [1], [0, 0, 1, 1], [], []>} : vector<72x169xf32>, vector<169x25xf32>, vector<72x25xf32> -> vector<72x25xf32>
    %43 = vector.extract_strided_slice %42 {offsets = [0, 0], sizes = [63, 25], strides = [1, 1]} : vector<72x25xf32> to vector<63x25xf32>
    %44 = vector.extract_strided_slice %42 {offsets = [1, 0], sizes = [63, 25], strides = [1, 1]} : vector<72x25xf32> to vector<63x25xf32>
    %45 = vector.extract_strided_slice %42 {offsets = [2, 0], sizes = [63, 25], strides = [1, 1]} : vector<72x25xf32> to vector<63x25xf32>
    %46 = vector.extract_strided_slice %42 {offsets = [3, 0], sizes = [63, 25], strides = [1, 1]} : vector<72x25xf32> to vector<63x25xf32>
    %47 = vector.extract_strided_slice %42 {offsets = [4, 0], sizes = [63, 25], strides = [1, 1]} : vector<72x25xf32> to vector<63x25xf32>
    %48 = vector.extract_strided_slice %42 {offsets = [5, 0], sizes = [63, 25], strides = [1, 1]} : vector<72x25xf32> to vector<63x25xf32>
    %49 = vector.extract_strided_slice %42 {offsets = [6, 0], sizes = [63, 25], strides = [1, 1]} : vector<72x25xf32> to vector<63x25xf32>
    %50 = vector.extract_strided_slice %42 {offsets = [7, 0], sizes = [63, 25], strides = [1, 1]} : vector<72x25xf32> to vector<63x25xf32>
    %51 = vector.extract_strided_slice %42 {offsets = [8, 0], sizes = [63, 25], strides = [1, 1]} : vector<72x25xf32> to vector<63x25xf32>
    %52 = vector.extract_strided_slice %42 {offsets = [9, 0], sizes = [63, 25], strides = [1, 1]} : vector<72x25xf32> to vector<63x25xf32>
    %53 = tpu.concatenate %43, %44, %45, %46, %47, %48, %49, %50, %51, %52 in 1 : vector<63x25xf32>, vector<63x25xf32>, vector<63x25xf32>, vector<63x25xf32>, vector<63x25xf32>, vector<63x25xf32>, vector<63x25xf32>, vector<63x25xf32>, vector<63x25xf32>, vector<63x25xf32> -> vector<63x250xf32>
    %54 = arith.truncf %53 : vector<63x250xf32> to vector<63x250xbf16>
    %c0_19 = arith.constant 0 : index
    %c0_20 = arith.constant 0 : index
    %55 = vector.load %arg7[%c0_19, %c0_20] : memref<250x50xbf16, #tpu.memory_space<vmem>>, vector<250x50xbf16>
    %cst_21 = arith.constant dense<0.000000e+00> : vector<63x50xf32>
    %56 = tpu.matmul %54, %55, %cst_21 {dimension_numbers = #tpu.dot_dimension_numbers<[1], [0], [0], [1], [0, 0, 1, 1], [], []>} : vector<63x250xbf16>, vector<250x50xbf16>, vector<63x50xf32> -> vector<63x50xf32>
    %c0_22 = arith.constant 0 : index
    %c0_23 = arith.constant 0 : index
    %57 = vector.load %arg8[%c0_22, %c0_23] : memref<1x50xf32, #tpu.memory_space<vmem>>, vector<1x50xf32>
    %58 = vector.broadcast %57 : vector<1x50xf32> to vector<63x50xf32>
    %59 = arith.addf %56, %58 : vector<63x50xf32>
    %cst_24 = arith.constant 0.000000e+00 : f32
    %60 = vector.broadcast %cst_24 : f32 to vector<63x50xf32>
    %61 = arith.cmpf ogt, %59, %60 : vector<63x50xf32>
    %cst_25 = arith.constant 0.000000e+00 : f32
    %62 = vector.broadcast %cst_25 : f32 to vector<63x50xf32>
    %63 = arith.minimumf %59, %62 : vector<63x50xf32>
    %64 = math.exp %63 : vector<63x50xf32>
    %cst_26 = arith.constant 1.000000e+00 : f32
    %65 = vector.broadcast %cst_26 : f32 to vector<63x50xf32>
    %66 = arith.subf %64, %65 : vector<63x50xf32>
    %cst_27 = arith.constant 1.000000e+00 : f32
    %67 = vector.broadcast %cst_27 : f32 to vector<63x50xf32>
    %68 = arith.mulf %67, %66 : vector<63x50xf32>
    %69 = arith.select %61, %59, %68 : vector<63x50xi1>, vector<63x50xf32>
    %70 = vector.extract_strided_slice %69 {offsets = [0, 0], sizes = [61, 50], strides = [1, 1]} : vector<63x50xf32> to vector<61x50xf32>
    %71 = vector.extract_strided_slice %69 {offsets = [1, 0], sizes = [61, 50], strides = [1, 1]} : vector<63x50xf32> to vector<61x50xf32>
    %72 = arith.maximumf %70, %71 : vector<61x50xf32>
    %73 = vector.extract_strided_slice %69 {offsets = [2, 0], sizes = [61, 50], strides = [1, 1]} : vector<63x50xf32> to vector<61x50xf32>
    %74 = arith.maximumf %72, %73 : vector<61x50xf32>
    %c0_28 = arith.constant 0 : index
    %c0_29 = arith.constant 0 : index
    %75 = vector.load %arg11[%c0_28, %c0_29] : memref<36x61xf32, #tpu.memory_space<vmem>>, vector<36x61xf32>
    %c0_30 = arith.constant 0 : index
    %c0_31 = arith.constant 0 : index
    %76 = vector.load %arg9[%c0_30, %c0_31] : memref<1x50xf32, #tpu.memory_space<vmem>>, vector<1x50xf32>
    %77 = vector.broadcast %76 : vector<1x50xf32> to vector<61x50xf32>
    %78 = arith.mulf %74, %77 : vector<61x50xf32>
    %c0_32 = arith.constant 0 : index
    %c0_33 = arith.constant 0 : index
    %79 = vector.load %arg10[%c0_32, %c0_33] : memref<1x50xf32, #tpu.memory_space<vmem>>, vector<1x50xf32>
    %80 = vector.broadcast %79 : vector<1x50xf32> to vector<61x50xf32>
    %81 = arith.addf %78, %80 : vector<61x50xf32>
    %cst_34 = arith.constant dense<0.000000e+00> : vector<36x50xf32>
    %82 = tpu.matmul %75, %81, %cst_34 {dimension_numbers = #tpu.dot_dimension_numbers<[1], [0], [0], [1], [0, 0, 1, 1], [], []>} : vector<36x61xf32>, vector<61x50xf32>, vector<36x50xf32> -> vector<36x50xf32>
    %83 = vector.extract_strided_slice %82 {offsets = [0, 0], sizes = [27, 50], strides = [1, 1]} : vector<36x50xf32> to vector<27x50xf32>
    %84 = vector.extract_strided_slice %82 {offsets = [1, 0], sizes = [27, 50], strides = [1, 1]} : vector<36x50xf32> to vector<27x50xf32>
    %85 = vector.extract_strided_slice %82 {offsets = [2, 0], sizes = [27, 50], strides = [1, 1]} : vector<36x50xf32> to vector<27x50xf32>
    %86 = vector.extract_strided_slice %82 {offsets = [3, 0], sizes = [27, 50], strides = [1, 1]} : vector<36x50xf32> to vector<27x50xf32>
    %87 = vector.extract_strided_slice %82 {offsets = [4, 0], sizes = [27, 50], strides = [1, 1]} : vector<36x50xf32> to vector<27x50xf32>
    %88 = vector.extract_strided_slice %82 {offsets = [5, 0], sizes = [27, 50], strides = [1, 1]} : vector<36x50xf32> to vector<27x50xf32>
    %89 = vector.extract_strided_slice %82 {offsets = [6, 0], sizes = [27, 50], strides = [1, 1]} : vector<36x50xf32> to vector<27x50xf32>
    %90 = vector.extract_strided_slice %82 {offsets = [7, 0], sizes = [27, 50], strides = [1, 1]} : vector<36x50xf32> to vector<27x50xf32>
    %91 = vector.extract_strided_slice %82 {offsets = [8, 0], sizes = [27, 50], strides = [1, 1]} : vector<36x50xf32> to vector<27x50xf32>
    %92 = vector.extract_strided_slice %82 {offsets = [9, 0], sizes = [27, 50], strides = [1, 1]} : vector<36x50xf32> to vector<27x50xf32>
    %93 = tpu.concatenate %83, %84, %85, %86, %87, %88, %89, %90, %91, %92 in 1 : vector<27x50xf32>, vector<27x50xf32>, vector<27x50xf32>, vector<27x50xf32>, vector<27x50xf32>, vector<27x50xf32>, vector<27x50xf32>, vector<27x50xf32>, vector<27x50xf32>, vector<27x50xf32> -> vector<27x500xf32>
    %94 = arith.truncf %93 : vector<27x500xf32> to vector<27x500xbf16>
    %c0_35 = arith.constant 0 : index
    %c0_36 = arith.constant 0 : index
    %95 = vector.load %arg12[%c0_35, %c0_36] : memref<500x100xbf16, #tpu.memory_space<vmem>>, vector<500x100xbf16>
    %cst_37 = arith.constant dense<0.000000e+00> : vector<27x100xf32>
    %96 = tpu.matmul %94, %95, %cst_37 {dimension_numbers = #tpu.dot_dimension_numbers<[1], [0], [0], [1], [0, 0, 1, 1], [], []>} : vector<27x500xbf16>, vector<500x100xbf16>, vector<27x100xf32> -> vector<27x100xf32>
    %c0_38 = arith.constant 0 : index
    %c0_39 = arith.constant 0 : index
    %97 = vector.load %arg13[%c0_38, %c0_39] : memref<1x100xf32, #tpu.memory_space<vmem>>, vector<1x100xf32>
    %98 = vector.broadcast %97 : vector<1x100xf32> to vector<27x100xf32>
    %99 = arith.addf %96, %98 : vector<27x100xf32>
    %cst_40 = arith.constant 0.000000e+00 : f32
    %100 = vector.broadcast %cst_40 : f32 to vector<27x100xf32>
    %101 = arith.cmpf ogt, %99, %100 : vector<27x100xf32>
    %cst_41 = arith.constant 0.000000e+00 : f32
    %102 = vector.broadcast %cst_41 : f32 to vector<27x100xf32>
    %103 = arith.minimumf %99, %102 : vector<27x100xf32>
    %104 = math.exp %103 : vector<27x100xf32>
    %cst_42 = arith.constant 1.000000e+00 : f32
    %105 = vector.broadcast %cst_42 : f32 to vector<27x100xf32>
    %106 = arith.subf %104, %105 : vector<27x100xf32>
    %cst_43 = arith.constant 1.000000e+00 : f32
    %107 = vector.broadcast %cst_43 : f32 to vector<27x100xf32>
    %108 = arith.mulf %107, %106 : vector<27x100xf32>
    %109 = arith.select %101, %99, %108 : vector<27x100xi1>, vector<27x100xf32>
    %110 = vector.extract_strided_slice %109 {offsets = [0, 0], sizes = [25, 100], strides = [1, 1]} : vector<27x100xf32> to vector<25x100xf32>
    %111 = vector.extract_strided_slice %109 {offsets = [1, 0], sizes = [25, 100], strides = [1, 1]} : vector<27x100xf32> to vector<25x100xf32>
    %112 = arith.maximumf %110, %111 : vector<25x100xf32>
    %113 = vector.extract_strided_slice %109 {offsets = [2, 0], sizes = [25, 100], strides = [1, 1]} : vector<27x100xf32> to vector<25x100xf32>
    %114 = arith.maximumf %112, %113 : vector<25x100xf32>
    %c0_44 = arith.constant 0 : index
    %c0_45 = arith.constant 0 : index
    %115 = vector.load %arg16[%c0_44, %c0_45] : memref<24x25xf32, #tpu.memory_space<vmem>>, vector<24x25xf32>
    %c0_46 = arith.constant 0 : index
    %c0_47 = arith.constant 0 : index
    %116 = vector.load %arg14[%c0_46, %c0_47] : memref<1x100xf32, #tpu.memory_space<vmem>>, vector<1x100xf32>
    %117 = vector.broadcast %116 : vector<1x100xf32> to vector<25x100xf32>
    %118 = arith.mulf %114, %117 : vector<25x100xf32>
    %c0_48 = arith.constant 0 : index
    %c0_49 = arith.constant 0 : index
    %119 = vector.load %arg15[%c0_48, %c0_49] : memref<1x100xf32, #tpu.memory_space<vmem>>, vector<1x100xf32>
    %120 = vector.broadcast %119 : vector<1x100xf32> to vector<25x100xf32>
    %121 = arith.addf %118, %120 : vector<25x100xf32>
    %cst_50 = arith.constant dense<0.000000e+00> : vector<24x100xf32>
    %122 = tpu.matmul %115, %121, %cst_50 {dimension_numbers = #tpu.dot_dimension_numbers<[1], [0], [0], [1], [0, 0, 1, 1], [], []>} : vector<24x25xf32>, vector<25x100xf32>, vector<24x100xf32> -> vector<24x100xf32>
    %123 = vector.extract_strided_slice %122 {offsets = [0, 0], sizes = [15, 100], strides = [1, 1]} : vector<24x100xf32> to vector<15x100xf32>
    %124 = vector.extract_strided_slice %122 {offsets = [1, 0], sizes = [15, 100], strides = [1, 1]} : vector<24x100xf32> to vector<15x100xf32>
    %125 = vector.extract_strided_slice %122 {offsets = [2, 0], sizes = [15, 100], strides = [1, 1]} : vector<24x100xf32> to vector<15x100xf32>
    %126 = vector.extract_strided_slice %122 {offsets = [3, 0], sizes = [15, 100], strides = [1, 1]} : vector<24x100xf32> to vector<15x100xf32>
    %127 = vector.extract_strided_slice %122 {offsets = [4, 0], sizes = [15, 100], strides = [1, 1]} : vector<24x100xf32> to vector<15x100xf32>
    %128 = vector.extract_strided_slice %122 {offsets = [5, 0], sizes = [15, 100], strides = [1, 1]} : vector<24x100xf32> to vector<15x100xf32>
    %129 = vector.extract_strided_slice %122 {offsets = [6, 0], sizes = [15, 100], strides = [1, 1]} : vector<24x100xf32> to vector<15x100xf32>
    %130 = vector.extract_strided_slice %122 {offsets = [7, 0], sizes = [15, 100], strides = [1, 1]} : vector<24x100xf32> to vector<15x100xf32>
    %131 = vector.extract_strided_slice %122 {offsets = [8, 0], sizes = [15, 100], strides = [1, 1]} : vector<24x100xf32> to vector<15x100xf32>
    %132 = vector.extract_strided_slice %122 {offsets = [9, 0], sizes = [15, 100], strides = [1, 1]} : vector<24x100xf32> to vector<15x100xf32>
    %133 = tpu.concatenate %123, %124, %125, %126, %127, %128, %129, %130, %131, %132 in 1 : vector<15x100xf32>, vector<15x100xf32>, vector<15x100xf32>, vector<15x100xf32>, vector<15x100xf32>, vector<15x100xf32>, vector<15x100xf32>, vector<15x100xf32>, vector<15x100xf32>, vector<15x100xf32> -> vector<15x1000xf32>
    %134 = arith.truncf %133 : vector<15x1000xf32> to vector<15x1000xbf16>
    %c0_51 = arith.constant 0 : index
    %c0_52 = arith.constant 0 : index
    %135 = vector.load %arg17[%c0_51, %c0_52] : memref<1000x200xbf16, #tpu.memory_space<vmem>>, vector<1000x200xbf16>
    %cst_53 = arith.constant dense<0.000000e+00> : vector<15x200xf32>
    %136 = tpu.matmul %134, %135, %cst_53 {dimension_numbers = #tpu.dot_dimension_numbers<[1], [0], [0], [1], [0, 0, 1, 1], [], []>} : vector<15x1000xbf16>, vector<1000x200xbf16>, vector<15x200xf32> -> vector<15x200xf32>
    %c0_54 = arith.constant 0 : index
    %c0_55 = arith.constant 0 : index
    %137 = vector.load %arg18[%c0_54, %c0_55] : memref<1x200xf32, #tpu.memory_space<vmem>>, vector<1x200xf32>
    %138 = vector.broadcast %137 : vector<1x200xf32> to vector<15x200xf32>
    %139 = arith.addf %136, %138 : vector<15x200xf32>
    %cst_56 = arith.constant 0.000000e+00 : f32
    %140 = vector.broadcast %cst_56 : f32 to vector<15x200xf32>
    %141 = arith.cmpf ogt, %139, %140 : vector<15x200xf32>
    %cst_57 = arith.constant 0.000000e+00 : f32
    %142 = vector.broadcast %cst_57 : f32 to vector<15x200xf32>
    %143 = arith.minimumf %139, %142 : vector<15x200xf32>
    %144 = math.exp %143 : vector<15x200xf32>
    %cst_58 = arith.constant 1.000000e+00 : f32
    %145 = vector.broadcast %cst_58 : f32 to vector<15x200xf32>
    %146 = arith.subf %144, %145 : vector<15x200xf32>
    %cst_59 = arith.constant 1.000000e+00 : f32
    %147 = vector.broadcast %cst_59 : f32 to vector<15x200xf32>
    %148 = arith.mulf %147, %146 : vector<15x200xf32>
    %149 = arith.select %141, %139, %148 : vector<15x200xi1>, vector<15x200xf32>
    %150 = vector.extract_strided_slice %149 {offsets = [0, 0], sizes = [13, 200], strides = [1, 1]} : vector<15x200xf32> to vector<13x200xf32>
    %151 = vector.extract_strided_slice %149 {offsets = [1, 0], sizes = [13, 200], strides = [1, 1]} : vector<15x200xf32> to vector<13x200xf32>
    %152 = arith.maximumf %150, %151 : vector<13x200xf32>
    %153 = vector.extract_strided_slice %149 {offsets = [2, 0], sizes = [13, 200], strides = [1, 1]} : vector<15x200xf32> to vector<13x200xf32>
    %154 = arith.maximumf %152, %153 : vector<13x200xf32>
    %c0_60 = arith.constant 0 : index
    %c0_61 = arith.constant 0 : index
    %155 = vector.load %arg21[%c0_60, %c0_61] : memref<2x13xf32, #tpu.memory_space<vmem>>, vector<2x13xf32>
    %c0_62 = arith.constant 0 : index
    %c0_63 = arith.constant 0 : index
    %156 = vector.load %arg19[%c0_62, %c0_63] : memref<1x200xf32, #tpu.memory_space<vmem>>, vector<1x200xf32>
    %157 = vector.broadcast %156 : vector<1x200xf32> to vector<13x200xf32>
    %158 = arith.mulf %154, %157 : vector<13x200xf32>
    %c0_64 = arith.constant 0 : index
    %c0_65 = arith.constant 0 : index
    %159 = vector.load %arg20[%c0_64, %c0_65] : memref<1x200xf32, #tpu.memory_space<vmem>>, vector<1x200xf32>
    %160 = vector.broadcast %159 : vector<1x200xf32> to vector<13x200xf32>
    %161 = arith.addf %158, %160 : vector<13x200xf32>
    %cst_66 = arith.constant dense<0.000000e+00> : vector<2x200xf32>
    %162 = tpu.matmul %155, %161, %cst_66 {dimension_numbers = #tpu.dot_dimension_numbers<[1], [0], [0], [1], [0, 0, 1, 1], [], []>} : vector<2x13xf32>, vector<13x200xf32>, vector<2x200xf32> -> vector<2x200xf32>
    %c0_67 = arith.constant 0 : index
    %c0_68 = arith.constant 0 : index
    %163 = vector.load %arg22[%c0_67, %c0_68] : memref<200x40xf32, #tpu.memory_space<vmem>>, vector<200x40xf32>
    %cst_69 = arith.constant dense<0.000000e+00> : vector<2x40xf32>
    %164 = tpu.matmul %162, %163, %cst_69 {dimension_numbers = #tpu.dot_dimension_numbers<[1], [0], [0], [1], [0, 0, 1, 1], [], []>} : vector<2x200xf32>, vector<200x40xf32>, vector<2x40xf32> -> vector<2x40xf32>
    %c0_70 = arith.constant 0 : index
    %c0_71 = arith.constant 0 : index
    %165 = vector.load %arg23[%c0_70, %c0_71] : memref<1x40xf32, #tpu.memory_space<vmem>>, vector<1x40xf32>
    %166 = vector.broadcast %165 : vector<1x40xf32> to vector<2x40xf32>
    %167 = arith.addf %164, %166 : vector<2x40xf32>
    %168 = vector.extract_strided_slice %167 {offsets = [0, 0], sizes = [2, 10], strides = [1, 1]} : vector<2x40xf32> to vector<2x10xf32>
    %169 = arith.negf %168 : vector<2x10xf32>
    %170 = math.exp %169 : vector<2x10xf32>
    %cst_72 = arith.constant 1.000000e+00 : f32
    %171 = vector.broadcast %cst_72 : f32 to vector<2x10xf32>
    %172 = arith.addf %171, %170 : vector<2x10xf32>
    %173 = arith.divf %171, %172 : vector<2x10xf32>
    %174 = vector.extract_strided_slice %167 {offsets = [0, 20], sizes = [2, 10], strides = [1, 1]} : vector<2x40xf32> to vector<2x10xf32>
    %175 = math.tanh %174 : vector<2x10xf32>
    %176 = vector.extract_strided_slice %167 {offsets = [0, 30], sizes = [2, 10], strides = [1, 1]} : vector<2x40xf32> to vector<2x10xf32>
    %177 = arith.negf %176 : vector<2x10xf32>
    %178 = math.exp %177 : vector<2x10xf32>
    %cst_73 = arith.constant 1.000000e+00 : f32
    %179 = vector.broadcast %cst_73 : f32 to vector<2x10xf32>
    %180 = arith.addf %179, %178 : vector<2x10xf32>
    %181 = arith.divf %179, %180 : vector<2x10xf32>
    %182 = arith.mulf %173, %175 : vector<2x10xf32>
    %183 = math.tanh %182 : vector<2x10xf32>
    %184 = arith.mulf %181, %183 : vector<2x10xf32>
    %c0_74 = arith.constant 0 : index
    %c0_75 = arith.constant 0 : index
    %185 = vector.load %arg24[%c0_74, %c0_75] : memref<10x4xf32, #tpu.memory_space<vmem>>, vector<10x4xf32>
    %cst_76 = arith.constant dense<0.000000e+00> : vector<2x4xf32>
    %186 = tpu.matmul %184, %185, %cst_76 {dimension_numbers = #tpu.dot_dimension_numbers<[1], [0], [0], [1], [0, 0, 1, 1], [], []>} : vector<2x10xf32>, vector<10x4xf32>, vector<2x4xf32> -> vector<2x4xf32>
    %c0_77 = arith.constant 0 : index
    %c0_78 = arith.constant 0 : index
    %187 = vector.load %arg25[%c0_77, %c0_78] : memref<1x4xf32, #tpu.memory_space<vmem>>, vector<1x4xf32>
    %188 = vector.broadcast %187 : vector<1x4xf32> to vector<2x4xf32>
    %189 = arith.addf %186, %188 : vector<2x4xf32>
    %c0_79 = arith.constant 0 : index
    %c0_80 = arith.constant 0 : index
    %190 = vector.load %arg26[%c0_79, %c0_80] : memref<2x4xf32, #tpu.memory_space<vmem>>, vector<2x4xf32>
    tpu.vector_store %arg26[%c0_79, %c0_80], %189 {strides = array<i32>} : memref<2x4xf32, #tpu.memory_space<vmem>>, vector<2x4xf32>,
    return
  }
}

</mosaic_0001>

<bundles_post_ra>
// kernel: cnn_lstm_forward.1
= control target key start
LH: loop header
LB: loop body
LE: loop exit
PB: predicated region body
PF: predicated region fallthrough
CT: control target
= control target key end

     0   :  { %s10908_s0 = inlined_call_operand.vmem [shape: f32[162,22], index: 0, kind: input, shape index: {}]   ;;  %s10909_s1 = inlined_call_operand.vmem [shape: f32[180,162], index: 1, kind: input, shape index: {}]   ;;  %s10910_s2 = inlined_call_operand.vmem [shape: bf16[220,25], index: 2, kind: input, shape index: {}]   ;;  %s10911_s3 = inlined_call_operand.vmem [shape: f32[1,25], index: 3, kind: input, shape index: {}]   ;;  %s10912_s4 = inlined_call_operand.vmem [shape: f32[1,25], index: 4, kind: input, shape index: {}]   ;;  %s10913_s5 = inlined_call_operand.vmem [shape: f32[1,25], index: 5, kind: input, shape index: {}]   ;;  %s10914_s6 = inlined_call_operand.vmem [shape: f32[72,169], index: 6, kind: input, shape index: {}]   ;;  %s10915_s7 = inlined_call_operand.vmem [shape: bf16[250,50], index: 7, kind: input, shape index: {}]   ;;  %s10916_s8 = inlined_call_operand.vmem [shape: f32[1,50], index: 8, kind: input, shape index: {}]   ;;  %s10917_s9 = inlined_call_operand.vmem [shape: f32[1,50], index: 9, kind: input, shape index: {}]   ;;  %s10918_s10 = inlined_call_operand.vmem [shape: f32[1,50], index: 10, kind: input, shape index: {}]   ;;  %s10919_s11 = inlined_call_operand.vmem [shape: f32[36,61], index: 11, kind: input, shape index: {}]   ;;  %s10920_s12 = inlined_call_operand.vmem [shape: bf16[500,100], index: 12, kind: input, shape index: {}]   ;;  %s10921_s13 = inlined_call_operand.vmem [shape: f32[1,100], index: 13, kind: input, shape index: {}]   ;;  %s10922_s14 = inlined_call_operand.vmem [shape: f32[1,100], index: 14, kind: input, shape index: {}]   ;;  %s10923_s15 = inlined_call_operand.vmem [shape: f32[1,100], index: 15, kind: input, shape index: {}]   ;;  %s10924_s16 = inlined_call_operand.vmem [shape: f32[24,25], index: 16, kind: input, shape index: {}]   ;;  %s10925_s17 = inlined_call_operand.vmem [shape: bf16[1000,200], index: 17, kind: input, shape index: {}]   ;;  %s10926_s18 = inlined_call_operand.vmem [shape: f32[1,200], index: 18, kind: input, shape index: {}]   ;;  %s10927_s19 = inlined_call_operand.vmem [shape: f32[1,200], index: 19, kind: input, shape index: {}]   ;;  %s10928_s20 = inlined_call_operand.vmem [shape: f32[1,200], index: 20, kind: input, shape index: {}]   ;;  %s10929_s21 = inlined_call_operand.vmem [shape: f32[2,13], index: 21, kind: input, shape index: {}]   ;;  %s10930_s22 = inlined_call_operand.vmem [shape: f32[200,40], index: 22, kind: input, shape index: {}]   ;;  %s10931_s23 = inlined_call_operand.vmem [shape: f32[1,40], index: 23, kind: input, shape index: {}]   ;;  %s10932_s24 = inlined_call_operand.vmem [shape: f32[10,4], index: 24, kind: input, shape index: {}]   ;;  %s10933_s25 = inlined_call_operand.vmem [shape: f32[1,4], index: 25, kind: input, shape index: {}]   ;;  %s10934_s26 = inlined_call_operand.hbm [shape: f32[2,4], index: 26, kind: output, shape index: {}]  }
   0x1   :  { %11019 = sst [smem:[#allocation59_spill]] %s10908_s0 }
   0x2   :  { %11020 = sst [smem:[#allocation60_spill]] %s10909_s1 }
   0x3   :  { %11021 = sst [smem:[#allocation61_spill]] %s10910_s2 }
   0x4   :  { %11022 = sst [smem:[#allocation62_spill]] %s10911_s3 }
   0x5   :  { %11023 = sst [smem:[#allocation63_spill]] %s10912_s4 }
   0x6   :  { %11024 = sst [smem:[#allocation64_spill]] %s10913_s5 }
   0x7   :  { %11025 = sst [smem:[#allocation65_spill]] %s10914_s6 }
   0x8   :  { %11026 = sst [smem:[#allocation66_spill]] %s10915_s7 }
   0x9   :  { %11027 = sst [smem:[#allocation67_spill]] %s10916_s8 }
   0xa   :  { %11028 = sst [smem:[#allocation68_spill]] %s10917_s9 }
   0xb   :  { %11029 = sst [smem:[#allocation69_spill]] %s10918_s10 }
   0xc   :  { %s11030_s7 = sld [smem:[#allocation59_spill]]  ;;  %v10942_v3 = vmov 0.0|0.0   ;;  %vm152_vm0 = vcmask 277504   ;;  %s11031_s27 = sld [smem:[#allocation60_spill]]  ;;  %vm11008_vm1 = vcmask 1041408   ;;  %v10940_v34 = vmov 0.0  }
   0xd   :  { %5993 = vmatprep.subr.bf16.mxu0 %v10942_v3 }
  0x12   :  { %v131_v0 = vld [vmem:[%s11030_s7] sm:$0xff]  ;;  %v132_v1 = vld [vmem:[%s11030_s7 + $0x8] sm:$0xff]  ;;  %v133_v2 = vld [vmem:[%s11030_s7 + $0x10] sm:$0xff] }
  0x13   :  { %v5994_v4 = vpack.c.bf16 %v132_v1, %v131_v0  ;;  %v134_v5 = vld [vmem:[%s11030_s7 + $0x18] sm:$0xff]  ;;  %v135_v7 = vld [vmem:[%s11030_s7 + $0x20] sm:$0xff]  ;;  %v136_v8 = vld [vmem:[%s11030_s7 + $0x28] sm:$0xff] }
  0x14   :  { %v5997_v6 = vpack.c.bf16 %v134_v5, %v133_v2  ;;  %v6000_v9 = vpack.c.bf16 %v136_v8, %v135_v7  ;;  %v86_v10 = vld [vmem:[%s11031_s27 + $0x8] sm:$0xff]  ;;  %v137_v11 = vld [vmem:[%s11030_s7 + $0x30] sm:$0xff]  ;;  %v138_v12 = vld [vmem:[%s11030_s7 + $0x38] sm:$0xff] }
  0x15   :  { %5995 = vmatpush1.bf16.msra.mxu0 %v5994_v4  ;;  %5513 = vmatprep.mubr.msk.f32.mxu0 %vm152_vm0, %v86_v10  ;;  %v6003_v13 = vpack.c.bf16 %v138_v12, %v137_v11  ;;  %v139_v14 = vld [vmem:[%s11030_s7 + $0x40] sm:$0xff]  ;;  %v140_v15 = vld [vmem:[%s11030_s7 + $0x48] sm:$0xff]  ;;  %v141_v17 = vld [vmem:[%s11030_s7 + $0x50] sm:$0xff] }
  0x16   :  { %5996 = vmatprep.subr.bf16.mxu0 %v10942_v3  ;;  %v6006_v16 = vpack.c.bf16 %v140_v15, %v139_v14  ;;  %v142_v18 = vld [vmem:[%s11030_s7 + $0x58] sm:$0xff]  ;;  %v143_v20 = vld [vmem:[%s11030_s7 + $0x60] sm:$0xff]  ;;  %v144_v21 = vld [vmem:[%s11030_s7 + $0x68] sm:$0xff] }
  0x17   :  { %v6009_v19 = vpack.c.bf16 %v142_v18, %v141_v17  ;;  %v145_v22 = vld [vmem:[%s11030_s7 + $0x70] sm:$0xff]  ;;  %v146_v23 = vld [vmem:[%s11030_s7 + $0x78] sm:$0xff]  ;;  %v6012_v24 = vpack.c.bf16 %v144_v21, %v143_v20  ;;  %v147_v25 = vld [vmem:[%s11030_s7 + $0x80] sm:$0xff] }
  0x18   :  { %v148_v26 = vld [vmem:[%s11030_s7 + $0x88] sm:$0xff]  ;;  %v6015_v27 = vpack.c.bf16 %v146_v23, %v145_v22  ;;  %v149_v28 = vld [vmem:[%s11030_s7 + $0x90] sm:$0xff]  ;;  %v150_v29 = vld [vmem:[%s11030_s7 + $0x98] sm:$0xff] }
  0x19   :  { %5998 = vmatpush1.bf16.msra.mxu0 %v5997_v6  ;;  %v6018_v30 = vpack.c.bf16 %v148_v26, %v147_v25  ;;  %v6021_v31 = vpack.c.bf16 %v150_v29, %v149_v28  ;;  %v151_v32 = vld [vmem:[%s11030_s7 + $0xa0] sm:$0x3]  ;;  %v88_v35 = vld [vmem:[%s11031_s27 + $0x18] sm:$0xff]  ;;  %v87_v36 = vld [vmem:[%s11031_s27 + $0x10] sm:$0xff] }
  0x1a   :  { %5999 = vmatprep.subr.bf16.mxu0 %v10942_v3  ;;  %v85_v33 = vld [vmem:[%s11031_s27] sm:$0xff]  ;;  %v90_v37 = vld [vmem:[%s11031_s27 + $0x28] sm:$0xff]  ;;  %v92_v39 = vld [vmem:[%s11031_s27 + $0x38] sm:$0xff] }
  0x1b   :  { %v89_v38 = vld [vmem:[%s11031_s27 + $0x20] sm:$0xff]  ;;  %v91_v40 = vld [vmem:[%s11031_s27 + $0x30] sm:$0xff]  ;;  %v94_v41 = vld [vmem:[%s11031_s27 + $0x48] sm:$0xff] }
  0x1c   :  { %v93_v42 = vld [vmem:[%s11031_s27 + $0x40] sm:$0xff]  ;;  %v96_v43 = vld [vmem:[%s11031_s27 + $0x58] sm:$0xff]  ;;  %v95_v44 = vld [vmem:[%s11031_s27 + $0x50] sm:$0xff] }
  0x1d   :  { %6001 = vmatpush1.bf16.msra.mxu0 %v6000_v9  ;;  %v98_v45 = vld [vmem:[%s11031_s27 + $0x68] sm:$0xff]  ;;  %v97_v46 = vld [vmem:[%s11031_s27 + $0x60] sm:$0xff]  ;;  %v100_v47 = vld [vmem:[%s11031_s27 + $0x78] sm:$0xff] }
  0x1e   :  { %6002 = vmatprep.subr.bf16.mxu0 %v10942_v3  ;;  %v99_v48 = vld [vmem:[%s11031_s27 + $0x70] sm:$0xff]  ;;  %v102_v49 = vld [vmem:[%s11031_s27 + $0x88] sm:$0xff]  ;;  %v101_v50 = vld [vmem:[%s11031_s27 + $0x80] sm:$0xff] }
  0x1f   :  { %v104_v51 = vld [vmem:[%s11031_s27 + $0x98] sm:$0xff]  ;;  %v103_v52 = vld [vmem:[%s11031_s27 + $0x90] sm:$0xff]  ;;  %v106_v53 = vld [vmem:[%s11031_s27 + $0xa8] sm:$0xff] }
  0x20   :  { %v105_v54 = vld [vmem:[%s11031_s27 + $0xa0] sm:$0xff]  ;;  %v108_v55 = vld [vmem:[%s11031_s27 + $0xb8] sm:$0xff]  ;;  %v107_v56 = vld [vmem:[%s11031_s27 + $0xb0] sm:$0xff] }
  0x21   :  { %6004 = vmatpush1.bf16.msra.mxu0 %v6003_v13  ;;  %v110_v57 = vld [vmem:[%s11031_s27 + $0xc8] sm:$0xff]  ;;  %v109_v58 = vld [vmem:[%s11031_s27 + $0xc0] sm:$0xff]  ;;  %v112_v59 = vld [vmem:[%s11031_s27 + $0xd8] sm:$0xff] }
  0x22   :  { %6005 = vmatprep.subr.bf16.mxu0 %v10942_v3  ;;  %v111_v60 = vld [vmem:[%s11031_s27 + $0xd0] sm:$0xff]  ;;  %v114_v61 = vld [vmem:[%s11031_s27 + $0xe8] sm:$0xff]  ;;  %v113_v62 = vld [vmem:[%s11031_s27 + $0xe0] sm:$0xff] }
  0x23   :  { %v116_v63 = vld [vmem:[%s11031_s27 + $0xf8] sm:$0xff]  ;;  %v115_v0 = vld [vmem:[%s11031_s27 + $0xf0] sm:$0xff]  ;;  %v118_v1 = vld [vmem:[%s11031_s27 + $0x108] sm:$0xff] }
  0x25   :  { %6007 = vmatpush1.bf16.msra.mxu0 %v6006_v16 }
  0x26   :  { %6008 = vmatprep.subr.bf16.mxu0 %v10942_v3 }
  0x29   :  { %6010 = vmatpush1.bf16.msra.mxu0 %v6009_v19 }
  0x2a   :  { %6011 = vmatprep.subr.bf16.mxu0 %v10942_v3 }
  0x2d   :  { %6013 = vmatpush1.bf16.msra.mxu0 %v6012_v24 }
  0x2e   :  { %6014 = vmatprep.subr.bf16.mxu0 %v10942_v3 }
  0x31   :  { %6016 = vmatpush1.bf16.msra.mxu0 %v6015_v27 }
  0x32   :  { %6017 = vmatprep.subr.bf16.mxu0 %v10942_v3 }
  0x35   :  { %6019 = vmatpush1.bf16.msra.mxu0 %v6018_v30 }
  0x36   :  { %6020 = vmatprep.subr.bf16.mxu0 %v10942_v3 }
  0x39   :  { %6022 = vmatpush1.bf16.msra.mxu0 %v6021_v31 }
  0x3a   :  { %266 = vmatprep.subr.mxu0 %v10940_v34 }
  0x3d   :  { %5512 = vmatpush1.msk.msra.mxu0 %vm11008_vm1, %v151_v32 }
  0x3e   :  { %291 = vmatmul.mubr.f32.vlgmr.msra.gmra.mrb[0].mxu0 %v85_v33 }
  0x3f   :  { %5514 = vmatprep.mubr.msk.f32.mxu0 %vm152_vm0, %v88_v35 }
  0x42   :  { %296 = vmatmul.mubr.f32.gmra.mrb[2].mxu0 %v87_v36 }
  0x43   :  { %5515 = vmatprep.mubr.msk.f32.mxu0 %vm152_vm0, %v90_v37 }
  0x46   :  { %301 = vmatmul.mubr.f32.gmra.mrb[4].mxu0 %v89_v38 }
  0x47   :  { %5516 = vmatprep.mubr.msk.f32.mxu0 %vm152_vm0, %v92_v39 }
  0x4a   :  { %306 = vmatmul.mubr.f32.gmra.mrb[6].mxu0 %v91_v40 }
  0x4b   :  { %5517 = vmatprep.mubr.msk.f32.mxu0 %vm152_vm0, %v94_v41 }
  0x4e   :  { %311 = vmatmul.mubr.f32.gmra.mrb[8].mxu0 %v93_v42 }
  0x4f   :  { %5518 = vmatprep.mubr.msk.f32.mxu0 %vm152_vm0, %v96_v43 }
  0x52   :  { %316 = vmatmul.mubr.f32.gmra.mrb[10].mxu0 %v95_v44 }
  0x53   :  { %5519 = vmatprep.mubr.msk.f32.mxu0 %vm152_vm0, %v98_v45 }
  0x56   :  { %321 = vmatmul.mubr.f32.gmra.mrb[12].mxu0 %v97_v46 }
  0x57   :  { %5520 = vmatprep.mubr.msk.f32.mxu0 %vm152_vm0, %v100_v47 }
  0x5a   :  { %326 = vmatmul.mubr.f32.gmra.mrb[14].mxu0 %v99_v48 }
  0x5b   :  { %5521 = vmatprep.mubr.msk.f32.mxu0 %vm152_vm0, %v102_v49 }
  0x5e   :  { %331 = vmatmul.mubr.f32.gmra.mrb[16].mxu0 %v101_v50 }
  0x5f   :  { %5522 = vmatprep.mubr.msk.f32.mxu0 %vm152_vm0, %v104_v51 }
  0x62   :  { %336 = vmatmul.mubr.f32.gmra.mrb[18].mxu0 %v103_v52 }
  0x63   :  { %5523 = vmatprep.mubr.msk.f32.mxu0 %vm152_vm0, %v106_v53 }
  0x66   :  { %341 = vmatmul.mubr.f32.gmra.mrb[20].mxu0 %v105_v54 }
  0x67   :  { %5524 = vmatprep.mubr.msk.f32.mxu0 %vm152_vm0, %v108_v55 }
  0x6a   :  { %346 = vmatmul.mubr.f32.gmra.mrb[22].mxu0 %v107_v56 }
  0x6b   :  { %5525 = vmatprep.mubr.msk.f32.mxu0 %vm152_vm0, %v110_v57 }
  0x6e   :  { %351 = vmatmul.mubr.f32.gmra.mrb[24].mxu0 %v109_v58 }
  0x6f   :  { %5526 = vmatprep.mubr.msk.f32.mxu0 %vm152_vm0, %v112_v59 }
  0x72   :  { %356 = vmatmul.mubr.f32.gmra.mrb[26].mxu0 %v111_v60 }
  0x73   :  { %5527 = vmatprep.mubr.msk.f32.mxu0 %vm152_vm0, %v114_v61 }
  0x76   :  { %361 = vmatmul.mubr.f32.gmra.mrb[28].mxu0 %v113_v62 }
  0x77   :  { %5528 = vmatprep.mubr.msk.f32.mxu0 %vm152_vm0, %v116_v63 }
  0x7a   :  { %366 = vmatmul.mubr.f32.gmra.mrb[30].mxu0 %v115_v0 }
  0x7b   :  { %31 = vsyncpa [#allocation3], 0  ;;  %5529 = vmatprep.mubr.msk.f32.mxu0 %vm152_vm0, %v118_v1  ;;  %v117_v2 = vld [vmem:[%s11031_s27 + $0x100] sm:$0xff]  ;;  %v120_v4 = vld [vmem:[%s11031_s27 + $0x118] sm:$0xff]  ;;  %s11032_s6 = sld [smem:[#allocation61_spill]]  ;;  %v7343_v17 = vmov 0  }
  0x7c   :  { %v119_v5 = vld [vmem:[%s11031_s27 + $0x110] sm:$0xff]  ;;  %v122_v6 = vld [vmem:[%s11031_s27 + $0x128] sm:$0xff]  ;;  %v121_v7 = vld [vmem:[%s11031_s27 + $0x120] sm:$0xff]  ;;  %1720 = vmatprep.subr.bf16.mxu0 %v7343_v17  ;;  %vm428_vm2 = vcmask 1046528   ;;  %vm11018_vm3 = vcmask 1045504   ;;  %vm11009_vm4 = vcmask 1042432  }
  0x7d   :  { %v124_v8 = vld [vmem:[%s11031_s27 + $0x138] sm:$0xff]  ;;  %v123_v9 = vld [vmem:[%s11031_s27 + $0x130] sm:$0xff]  ;;  %v126_v10 = vld [vmem:[%s11031_s27 + $0x148] sm:$0xff]  ;;  %vm11016_vm5 = vcmask 1044480   ;;  %vm11015_vm6 = vcmask 1040384   ;;  %vm10997_vm7 = vcmask 1043456  }
  0x7e   :  { %371 = vmatmul.mubr.f32.gmra.mrb[32].mxu0 %v117_v2  ;;  %v125_v11 = vld [vmem:[%s11031_s27 + $0x140] sm:$0xff]  ;;  %v128_v12 = vld [vmem:[%s11031_s27 + $0x158] sm:$0xff]  ;;  %v127_v13 = vld [vmem:[%s11031_s27 + $0x150] sm:$0xff]  ;;  %s7344_s29 = smov 48   ;;  %s11002_s30 = smov 4   ;;  %vm1336_vm8 = vcmask 179200  }
  0x7f   :  { %5530 = vmatprep.mubr.msk.f32.mxu0 %vm152_vm0, %v120_v4  ;;  %v130_v14 = vld [vmem:[%s11031_s27 + $0x168] sm:$0xf]  ;;  %v129_v15 = vld [vmem:[%s11031_s27 + $0x160] sm:$0xf]  ;;  %s7346_s2 = smov 22   ;;  %s11012_s10 = smov 44  }
  0x80   :  { %s7348_s1 = smov 110   ;;  %s11010_s3 = smov 66   ;;  %vm11007_vm9 = vcmask 359424   ;;  %vm11004_vm10 = vcmask 31744   ;;  %vm11006_vm11 = vcmask 539648   ;;  %vm1474_vm12 = vcmask 211968  }
  0x81   :  { %v6983_v16 = vld [vmem:[%s11032_s6] sm:$0xff]   ;;  %v6984_v18 = vld [vmem:[%s11032_s6 + $0x8] sm:$0xff]   ;;  %v6985_v19 = vld [vmem:[%s11032_s6 + $0x10] sm:$0xff]   ;;  %s7350_s28 = smov 26   ;;  %s11003_s27 = smov 88   ;;  %vm11005_vm13 = vcmask 719872  }
  0x82   :  { %376 = vmatmul.mubr.f32.gmra.mrb[34].mxu0 %v119_v5  ;;  %v6986_v20 = vld [vmem:[%s11032_s6 + $0x18] sm:$0xff]   ;;  %v6987_v21 = vld [vmem:[%s11032_s6 + $0x20] sm:$0xff]   ;;  %v6988_v22 = vld [vmem:[%s11032_s6 + $0x28] sm:$0xff]   ;;  %s7352_s8 = smov 70   ;;  %vm1428_vm14 = vcmask 900096   ;;  %vm1497_vm15 = vcmask 392192  }
  0x83   :  { %5531 = vmatprep.mubr.msk.f32.mxu0 %vm152_vm0, %v122_v6  ;;  %1721 = vmatpush1.bf16.msra.mxu0 %v6983_v16  ;;  %v6989_v23 = vld [vmem:[%s11032_s6 + $0x30] sm:$0xff]   ;;  %v6990_v24 = vld [vmem:[%s11032_s6 + $0x38] sm:$0xff]   ;;  %v6991_v25 = vld [vmem:[%s11032_s6 + $0x40] sm:$0xff]   ;;  %s11227_s9 = sld [smem:[#allocation62_spill]]  ;;  %s11229_s4 = sld [smem:[#allocation64_spill]] }
  0x84   :  { %1722 = vmatprep.subr.bf16.mxu0 %v7343_v17  ;;  %v6992_v28 = vld [vmem:[%s11032_s6 + $0x48] sm:$0xff]   ;;  %v6993_v50 = vld [vmem:[%s11032_s6 + $0x50] sm:$0xff]   ;;  %v6994_v4 = vld [vmem:[%s11032_s6 + $0x58] sm:$0xff]   ;;  %s7354_s0 = smov 72   ;;  %s7355_s7 = smov 125  }
  0x85   :  { %s7359_s5 = smov 47  }
  0x86   :  { %381 = vmatmul.mubr.f32.gmra.mrb[36].mxu0 %v121_v7 }
  0x87   :  { %5532 = vmatprep.mubr.msk.f32.mxu0 %vm152_vm0, %v124_v8  ;;  %1723 = vmatpush1.bf16.msra.mxu0 %v6984_v18 }
  0x88   :  { %1724 = vmatprep.subr.bf16.mxu0 %v7343_v17 }
  0x8a   :  { %386 = vmatmul.mubr.f32.gmra.mrb[38].mxu0 %v123_v9 }
  0x8b   :  { %5533 = vmatprep.mubr.msk.f32.mxu0 %vm152_vm0, %v126_v10  ;;  %1725 = vmatpush1.bf16.msra.mxu0 %v6985_v19 }
  0x8c   :  { %1726 = vmatprep.subr.bf16.mxu0 %v7343_v17 }
  0x8e   :  { %391 = vmatmul.mubr.f32.gmra.mrb[40].mxu0 %v125_v11 }
  0x8f   :  { %5534 = vmatprep.mubr.msk.f32.mxu0 %vm152_vm0, %v128_v12  ;;  %1727 = vmatpush1.bf16.msra.mxu0 %v6986_v20 }
  0x90   :  { %1728 = vmatprep.subr.bf16.mxu0 %v7343_v17 }
  0x92   :  { %396 = vmatmul.mubr.f32.gmra.mrb[42].mxu0 %v127_v13 }
  0x93   :  { %5535 = vmatprep.mubr.msk.f32.mxu0 %vm152_vm0, %v130_v14  ;;  %1729 = vmatpush1.bf16.msra.mxu0 %v6987_v21  ;;  %vm1520_vm0 = vcmask 572416  }
  0x94   :  { %1730 = vmatprep.subr.bf16.mxu0 %v7343_v17 }
  0x96   :  { %401 = vmatmul.mubr.f32.gmra.mrb[44].mxu0 %v129_v15 }
  0x97   :  { %1731 = vmatpush1.bf16.msra.mxu0 %v6988_v22 }
  0x98   :  { %1732 = vmatprep.subr.bf16.mxu0 %v7343_v17 }
  0x9b   :  { %1733 = vmatpush1.bf16.msra.mxu0 %v6989_v23 }
  0x9c   :  { %1734 = vmatprep.subr.bf16.mxu0 %v7343_v17 }
  0x9f   :  { %1735 = vmatpush1.bf16.msra.mxu0 %v6990_v24 }
  0xa0   :  { %1736 = vmatprep.subr.bf16.mxu0 %v7343_v17 }
  0xa3   :  { %1737 = vmatpush1.bf16.msra.mxu0 %v6991_v25 }
  0xa4   :  { %1738 = vmatprep.subr.bf16.mxu0 %v7343_v17 }
  0xa7   :  { %1739 = vmatpush1.bf16.msra.mxu0 %v6992_v28 }
  0xa8   :  { %1740 = vmatprep.subr.bf16.mxu0 %v7343_v17 }
  0xab   :  { %1741 = vmatpush1.bf16.msra.mxu0 %v6993_v50 }
  0xac   :  { %1742 = vmatprep.subr.bf16.mxu0 %v7343_v17 }
  0xaf   :  { %1743 = vmatpush1.bf16.msra.mxu0 %v6994_v4 }
  0xb0   :  { %1744 = vmatprep.subr.bf16.mxu0 %v7343_v17 }
 0x111   :  { %v7781_v26 = vpop.f32.mrb[0].mxu0 }
 0x112   :  { %11033 = vst [vmem:[#allocation5_spill] sm:$0xff] %v7781_v26  ;;  %v294_v27 = vpop.f32.mrb[1].mxu0  ;;  %v979_v29 = vrot.slane %v7781_v26, 6  ;;  %v429_v30 = vrot.slane %v7781_v26, 1  ;;  %v539_v32 = vrot.slane %v7781_v26, 2  ;;  %v869_v33 = vrot.slane %v7781_v26, 5 }
 0x113   :  { %v649_v35 = vrot.slane %v7781_v26, 3  ;;  %v1091_v36 = vrot.slane %v7781_v26, 7  ;;  %v759_v44 = vrot.slane %v7781_v26, 4 }
 0x115   :  { %v7788_v31 = vpop.f32.mrb[2].mxu0 }
 0x116   :  { %11034 = vst [vmem:[#allocation6_spill] sm:$0xff] %v7788_v31  ;;  %v299_v37 = vpop.f32.mrb[3].mxu0  ;;  %v980_v38 = vrot.slane %v7788_v31, 6  ;;  %v430_v39 = vrot.slane %v7788_v31, 1  ;;  %v540_v40 = vrot.slane %v7788_v31, 2  ;;  %v870_v41 = vrot.slane %v7788_v31, 5 }
 0x117   :  { %v650_v42 = vrot.slane %v7788_v31, 3  ;;  %v1092_v43 = vrot.slane %v7788_v31, 7  ;;  %v760_v45 = vrot.slane %v7788_v31, 4 }
 0x118   :  { %v981_v46 = vsel %vm11008_vm1, %v979_v29, %v980_v38  ;;  %v431_v47 = vsel %vm428_vm2, %v429_v30, %v430_v39  ;;  %v541_v48 = vsel %vm11018_vm3, %v539_v32, %v540_v40  ;;  %v7807_v49 = vsel %vm11009_vm4, %v869_v33, %v870_v41 }
 0x119   :  { %v7812_v51 = vpop.f32.mrb[4].mxu0  ;;  %v7815_v52 = vsel %vm11016_vm5, %v649_v35, %v650_v42  ;;  %v7818_v53 = vsel %vm11015_vm6, %v1091_v36, %v1092_v43  ;;  %v7821_v54 = vsel %vm10997_vm7, %v759_v44, %v760_v45  ;;  %v6995_v36 = vld [vmem:[%s11032_s6 + $0x60] sm:$0xff]  }
 0x11a   :  { %11035 = vst [vmem:[#allocation7_spill] sm:$0xff] %v7812_v51  ;;  %v304_v55 = vpop.f32.mrb[5].mxu0  ;;  %v6173_v56 = vpack.i.bf16 %v7812_v51, %v7788_v31  ;;  %v982_v57 = vrot.slane %v7812_v51, 6  ;;  %v432_v58 = vrot.slane %v7812_v51, 1  ;;  %v542_v59 = vrot.slane %v7812_v51, 2  ;;  %1745 = vmatpush1.bf16.msra.mxu0 %v6995_v36 }
 0x11b   :  { %v872_v60 = vrot.slane %v7812_v51, 5  ;;  %v652_v61 = vrot.slane %v7812_v51, 3  ;;  %v1094_v62 = vrot.slane %v7812_v51, 7  ;;  %v762_v63 = vrot.slane %v7812_v51, 4  ;;  %1746 = vmatprep.subr.bf16.mxu0 %v7343_v17 }
 0x11c   :  { %6174 = vrot.lane.b32.xlu0 %v6173_v56, %s7344_s29  ;;  %v983_v0 = vsel %vm11008_vm1, %v980_v38, %v982_v57  ;;  %v7836_v1 = vsel %vm428_vm2, %v430_v39, %v432_v58  ;;  %v543_v2 = vsel %vm11018_vm3, %v540_v40, %v542_v59 }
 0x11d   :  { %v7842_v5 = vpop.f32.mrb[6].mxu0  ;;  %v6188_v6 = vpack.i.bf16 %v983_v0, %v981_v46  ;;  %v6178_v7 = vpack.i.bf16 %v7836_v1, %v431_v47  ;;  %v6193_v8 = vpack.i.bf16 %v543_v2, %v541_v48  ;;  %v873_v9 = vsel %vm11009_vm4, %v870_v41, %v872_v60 }
 0x11e   :  { %11036 = vst [vmem:[#allocation8_spill] sm:$0xff] %v7842_v5  ;;  %v309_v10 = vpop.f32.mrb[7].mxu0  ;;  %v6183_v11 = vpack.i.bf16 %v873_v9, %v7807_v49  ;;  %v653_v12 = vsel %vm11016_vm5, %v650_v42, %v652_v61  ;;  %v1095_v13 = vsel %vm11015_vm6, %v1092_v43, %v1094_v62  ;;  %v7852_v14 = vsel %vm10997_vm7, %v760_v45, %v762_v63 }
 0x11f   :  { %6189 = vrot.lane.b32.xlu1 %v6188_v6, %s11002_s30  ;;  %v6203_v15 = vpack.i.bf16 %v653_v12, %v7815_v52  ;;  %v6198_v16 = vpack.i.bf16 %v1095_v13, %v7818_v53  ;;  %v6208_v18 = vpack.i.bf16 %v7852_v14, %v7821_v54  ;;  %v434_v19 = vrot.slane %v7842_v5, 1 }
 0x120   :  { %6179 = vrot.lane.b32.xlu0 %v6178_v7, %s7346_s2  ;;  %v874_v20 = vrot.slane %v7842_v5, 5  ;;  %v544_v21 = vrot.slane %v7842_v5, 2  ;;  %v984_v22 = vrot.slane %v7842_v5, 6  ;;  %v654_v23 = vrot.slane %v7842_v5, 3 }
 0x121   :  { %v7866_v24 = vpop.f32.mrb[8].mxu0  ;;  %v7869_v25 = vsel %vm428_vm2, %v432_v58, %v434_v19  ;;  %v1096_v27 = vrot.slane %v7842_v5, 7  ;;  %v764_v28 = vrot.slane %v7842_v5, 4 }
 0x122   :  { %11037 = vst [vmem:[#allocation9_spill] sm:$0xff] %v7866_v24  ;;  %v314_v29 = vpop.f32.mrb[9].mxu0  ;;  %v6213_v30 = vpack.i.bf16 %v7869_v25, %v7836_v1  ;;  %v6218_v32 = vpack.i.bf16 %v7866_v24, %v7842_v5  ;;  %v7878_v33 = vsel %vm11009_vm4, %v872_v60, %v874_v20  ;;  %v876_v35 = vrot.slane %v7866_v24, 5 }
 0x123   :  { %6194 = vrot.lane.b32.xlu1 %v6193_v8, %s11012_s10  ;;  %v436_v37 = vrot.slane %v7866_v24, 1  ;;  %v7887_v38 = vsel %vm11018_vm3, %v542_v59, %v544_v21  ;;  %v546_v39 = vrot.slane %v7866_v24, 2  ;;  %v7891_v40 = vsel %vm11008_vm1, %v982_v57, %v984_v22 }
 0x124   :  { %6184 = vrot.lane.b32.xlu0 %v6183_v11, %s7348_s1  ;;  %v7895_v41 = vsel %vm11009_vm4, %v874_v20, %v876_v35  ;;  %v986_v42 = vrot.slane %v7866_v24, 6  ;;  %v7899_v43 = vsel %vm11016_vm5, %v652_v61, %v654_v23  ;;  %v656_v44 = vrot.slane %v7866_v24, 3 }
 0x125   :  { %v7902_v45 = vpop.f32.mrb[10].mxu0  ;;  %v6228_v46 = vpack.i.bf16 %v7895_v41, %v7878_v33  ;;  %v7907_v47 = vsel %vm428_vm2, %v434_v19, %v436_v37  ;;  %v7910_v48 = vsel %vm11018_vm3, %v544_v21, %v546_v39  ;;  %v7913_v49 = vsel %vm11015_vm6, %v1094_v62, %v1096_v27 }
 0x126   :  { %11038 = vst [vmem:[#allocation10_spill] sm:$0xff] %v7902_v45  ;;  %v319_v50 = vpop.f32.mrb[11].mxu0  ;;  %v6223_v52 = vpack.i.bf16 %v7907_v47, %v7869_v25  ;;  %v6238_v53 = vpack.i.bf16 %v7910_v48, %v7887_v38  ;;  %v7921_v55 = vsel %vm11008_vm1, %v984_v22, %v986_v42  ;;  %v7924_v56 = vsel %vm11016_vm5, %v654_v23, %v656_v44 }
 0x127   :  { %6204 = vrot.lane.b32.xlu1 %v6203_v15, %s11010_s3  ;;  %v6233_v57 = vpack.i.bf16 %v7921_v55, %v7891_v40  ;;  %v6248_v17 = vpack.i.bf16 %v7924_v56, %v7899_v43  ;;  %v1098_v58 = vrot.slane %v7866_v24, 7  ;;  %v7935_v59 = vsel %vm10997_vm7, %v762_v63, %v764_v28 }
 0x128   :  { %6199 = vrot.lane.b32.xlu0 %v6198_v16, %s7350_s28  ;;  %v766_v60 = vrot.slane %v7866_v24, 4  ;;  %v438_v61 = vrot.slane %v7902_v45, 1  ;;  %v878_v62 = vrot.slane %v7902_v45, 5  ;;  %v548_v0 = vrot.slane %v7902_v45, 2 }
 0x129   :  { %v7942_v1 = vpop.f32.mrb[12].mxu0  ;;  %v7945_v2 = vsel %vm11015_vm6, %v1096_v27, %v1098_v58  ;;  %v988_v4 = vrot.slane %v7902_v45, 6  ;;  %v658_v63 = vrot.slane %v7902_v45, 3  ;;  %v1100_v6 = vrot.slane %v7902_v45, 7 }
 0x12a   :  { %11039 = vst [vmem:[#allocation11_spill] sm:$0xff] %v7942_v1  ;;  %v324_v7 = vpop.f32.mrb[13].mxu0  ;;  %v6243_v8 = vpack.i.bf16 %v7945_v2, %v7913_v49  ;;  %v7953_v9 = vsel %vm10997_vm7, %v764_v28, %v766_v60  ;;  %v7956_v10 = vsel %vm428_vm2, %v436_v37, %v438_v61  ;;  %v6263_v11 = vpack.i.bf16 %v7942_v1, %v7902_v45 }
 0x12b   :  { %6209 = vrot.lane.b32.xlu1 %v6208_v18, %s11003_s27  ;;  %v6253_v12 = vpack.i.bf16 %v7953_v9, %v7935_v59  ;;  %v6258_v13 = vpack.i.bf16 %v7956_v10, %v7907_v47  ;;  %v7969_v15 = vsel %vm11009_vm4, %v876_v35, %v878_v62  ;;  %v880_v16 = vrot.slane %v7942_v1, 5 }
 0x12c   :  { %6214 = vrot.lane.b32.xlu0 %v6213_v30, %s7352_s8  ;;  %v440_v19 = vrot.slane %v7942_v1, 1  ;;  %v7975_v20 = vsel %vm11018_vm3, %v546_v39, %v548_v0  ;;  %v550_v54 = vrot.slane %v7942_v1, 2  ;;  %v7979_v14 = vsel %vm11008_vm1, %v986_v42, %v988_v4 }
 0x12d   :  { %v7981_v18 = vpop.f32.mrb[14].mxu0  ;;  %v7984_v21 = vsel %vm11009_vm4, %v878_v62, %v880_v16  ;;  %v990_v22 = vrot.slane %v7942_v1, 6  ;;  %v7988_v23 = vsel %vm11016_vm5, %v656_v44, %v658_v63  ;;  %v660_v27 = vrot.slane %v7942_v1, 3 }
 0x12e   :  { %11040 = vst [vmem:[#allocation12_spill] sm:$0xff] %v7981_v18  ;;  %v329_v28 = vpop.f32.mrb[15].mxu0  ;;  %v7994_v30 = vsel %vm428_vm2, %v438_v61, %v440_v19  ;;  %v7997_v33 = vsel %vm11018_vm3, %v548_v0, %v550_v54  ;;  %v8000_v35 = vsel %vm11015_vm6, %v1098_v58, %v1100_v6  ;;  %v1102_v44 = vrot.slane %v7942_v1, 7 }
 0x12f   :  { %6219 = vrot.lane.b32.xlu1 %v6218_v32, %s7344_s29  ;;  %v8011_v39 = vsel %vm11008_vm1, %v988_v4, %v990_v22  ;;  %v8014_v41 = vsel %vm11016_vm5, %v658_v63, %v660_v27  ;;  %v768_v50 = vrot.slane %v7902_v45, 4  ;;  %v770_v61 = vrot.slane %v7942_v1, 4 }
 0x130   :  { %6229 = vrot.lane.b32.xlu0 %v6228_v46, %s7348_s1  ;;  %v442_v62 = vrot.slane %v7981_v18, 1  ;;  %v882_v0 = vrot.slane %v7981_v18, 5  ;;  %v552_v46 = vrot.slane %v7981_v18, 2  ;;  %v8030_v63 = vsel %vm11015_vm6, %v1100_v6, %v1102_v44 }
 0x131   :  { %v8023_v58 = vpop.f32.mrb[16].mxu0  ;;  %v8033_v7 = vsel %vm10997_vm7, %v766_v60, %v768_v50  ;;  %v992_v48 = vrot.slane %v7981_v18, 6  ;;  %v662_v25 = vrot.slane %v7981_v18, 3 }
 0x132   :  { %11041 = vst [vmem:[#allocation13_spill] sm:$0xff] %v8023_v58  ;;  %v334_v4 = vpop.f32.mrb[17].mxu0  ;;  %v884_v34 = vrot.slane %v8023_v58, 5  ;;  %v8048_v6 = vsel %vm428_vm2, %v440_v19, %v442_v62  ;;  %v8051_v60 = vsel %vm11009_vm4, %v880_v16, %v882_v0  ;;  %v444_v19 = vrot.slane %v8023_v58, 1 }
 0x133   :  { %6224 = vrot.lane.b32.xlu1 %v6223_v52, %s7346_s2  ;;  %v8045_v4 = vsel %vm10997_vm7, %v768_v50, %v770_v61  ;;  %v8070_v3 = vsel %vm11018_vm3, %v550_v54, %v552_v46  ;;  %v554_v38 = vrot.slane %v8023_v58, 2  ;;  %v664_v32 = vrot.slane %v8023_v58, 3 }
 0x134   :  { %6239 = vrot.lane.b32.xlu0 %v6238_v53, %s11012_s10  ;;  %v8062_v50 = vsel %vm11009_vm4, %v882_v0, %v884_v34  ;;  %v8075_v52 = vsel %vm428_vm2, %v442_v62, %v444_v19  ;;  %v994_v0 = vrot.slane %v8023_v58, 6  ;;  %v8090_v62 = vsel %vm11008_vm1, %v990_v22, %v992_v48 }
 0x135   :  { %v8065_v28 = vpop.f32.mrb[18].mxu0  ;;  %v8087_v16 = vsel %vm11018_vm3, %v552_v46, %v554_v38  ;;  %v8106_v46 = vsel %vm11016_vm5, %v662_v25, %v664_v32  ;;  %v774_v40 = vrot.slane %v8023_v58, 4 }
 0x136   :  { %11042 = vst [vmem:[#allocation14_spill] sm:$0xff] %v8065_v28  ;;  %v339_v53 = vpop.f32.mrb[19].mxu0  ;;  %v8100_v55 = vsel %vm11008_vm1, %v992_v48, %v994_v0  ;;  %v886_v43 = vrot.slane %v8065_v28, 5  ;;  %v556_v42 = vrot.slane %v8065_v28, 2 }
 0x137   :  { %6234 = vrot.lane.b32.xlu1 %v6233_v57, %s11002_s30  ;;  %v1104_v53 = vrot.slane %v7981_v18, 7  ;;  %v8103_v57 = vsel %vm11016_vm5, %v660_v27, %v662_v25  ;;  %v772_v27 = vrot.slane %v7981_v18, 4  ;;  %v446_v25 = vrot.slane %v8065_v28, 1 }
 0x138   :  { %6249 = vrot.lane.b32.xlu0 %v6248_v17, %s11010_s3  ;;  %v1106_v17 = vrot.slane %v8023_v58, 7  ;;  %v8155_v9 = vsel %vm11009_vm4, %v884_v34, %v886_v43  ;;  %v1108_v34 = vrot.slane %v8065_v28, 7 }
 0x139   :  { %v8108_v22 = vpop.f32.mrb[20].mxu0  ;;  %v8115_v56 = vsel %vm11015_vm6, %v1102_v44, %v1104_v53  ;;  %v8140_v49 = vsel %vm10997_vm7, %v770_v61, %v772_v27  ;;  %v8143_v2 = vsel %vm10997_vm7, %v772_v27, %v774_v40  ;;  %v666_v27 = vrot.slane %v8065_v28, 3 }
 0x13a   :  { %11043 = vst [vmem:[#allocation15_spill] sm:$0xff] %v8108_v22  ;;  %v344_v48 = vpop.f32.mrb[21].mxu0  ;;  %v8128_v44 = vsel %vm11015_vm6, %v1104_v53, %v1106_v17  ;;  %v448_v54 = vrot.slane %v8108_v22, 1  ;;  %v558_v37 = vrot.slane %v8108_v22, 2  ;;  %v8207_v45 = vsel %vm11015_vm6, %v1106_v17, %v1108_v34 }
 0x13b   :  { %6244 = vrot.lane.b32.xlu1 %v6243_v8, %s7350_s28  ;;  %v888_v48 = vrot.slane %v8108_v22, 5  ;;  %v8146_v8 = vsel %vm428_vm2, %v444_v19, %v446_v25  ;;  %v1110_v36 = vrot.slane %v8108_v22, 7  ;;  %v11047_v17 = vpack.i.bf16 %v7994_v30, %v7956_v10 }
 0x13c   :  { %6254 = vrot.lane.b32.xlu0 %v6253_v12, %s11003_s27  ;;  %v8163_v19 = vsel %vm428_vm2, %v446_v25, %v448_v54  ;;  %v8181_v25 = vsel %vm11018_vm3, %v554_v38, %v556_v42  ;;  %v8184_v47 = vsel %vm11018_vm3, %v556_v42, %v558_v37  ;;  %v8199_v38 = vsel %vm11016_vm5, %v664_v32, %v666_v27 }
 0x13d   :  { %v8148_v53 = vpop.f32.mrb[22].mxu0  ;;  %v8158_v12 = vsel %vm11009_vm4, %v886_v43, %v888_v48  ;;  %v996_v43 = vrot.slane %v8065_v28, 6  ;;  %v8224_v42 = vsel %vm11015_vm6, %v1108_v34, %v1110_v36 }
 0x13e   :  { %11044 = vst [vmem:[#allocation16_spill] sm:$0xff] %v8148_v53  ;;  %v349_v61 = vpop.f32.mrb[23].mxu0 }
 0x13f   :  { %6259 = vrot.lane.b32.xlu1 %v6258_v13, %s7352_s8  ;;  %v998_v61 = vrot.slane %v8108_v22, 6  ;;  %v668_v13 = vrot.slane %v8108_v22, 3  ;;  %v8193_v29 = vsel %vm11008_vm1, %v994_v0, %v996_v43  ;;  %v11046_v0 = vpack.i.bf16 %v7984_v21, %v7969_v15 }
 0x140   :  { %6264 = vrot.lane.b32.xlu0 %v6263_v11, %s7344_s29  ;;  %v890_v21 = vrot.slane %v8148_v53, 5 }
 0x141   :  { %v8188_v59 = vpop.f32.mrb[24].mxu0  ;;  %v8196_v11 = vsel %vm11008_vm1, %v996_v43, %v998_v61  ;;  %v8204_v24 = vsel %vm11016_vm5, %v666_v27, %v668_v13  ;;  %v776_v43 = vrot.slane %v8065_v28, 4  ;;  %v450_v27 = vrot.slane %v8148_v53, 1 }
 0x142   :  { %11045 = vst [vmem:[#allocation17_spill] sm:$0xff] %v8188_v59  ;;  %v354_v1 = vpop.f32.mrb[25].mxu0  ;;  %v8248_v31 = vsel %vm11009_vm4, %v888_v48, %v890_v21  ;;  %v562_v26 = vrot.slane %v8188_v59, 2  ;;  %v11054_v48 = vpack.i.bf16 %v8011_v39, %v7979_v14  ;;  %v1002_v15 = vrot.slane %v8188_v59, 6 }
 0x143   :  { %6274 = vrot.lane.b32.xlu1 %v11046_v0, %s7348_s1  ;;  %v778_v1 = vrot.slane %v8108_v22, 4  ;;  %v892_v0 = vrot.slane %v8188_v59, 5  ;;  %v8235_v5 = vsel %vm10997_vm7, %v774_v40, %v776_v43  ;;  %v8241_v34 = vsel %vm428_vm2, %v448_v54, %v450_v27  ;;  %11051 = vst [vmem:[#allocation21_spill] sm:$0xff] %v8248_v31 }
 0x144   :  { %6269 = vrot.lane.b32.xlu0 %v11047_v17, %s7346_s2  ;;  %11049 = vst [vmem:[#allocation19_spill] sm:$0xff] %v8235_v5  ;;  %v11053_v40 = vpack.i.bf16 %v7997_v33, %v7975_v20  ;;  %v670_v20 = vrot.slane %v8148_v53, 3  ;;  %v672_v33 = vrot.slane %v8188_v59, 3  ;;  %v1112_v14 = vrot.slane %v8148_v53, 7 }
 0x145   :  { %v8230_v32 = vpop.f32.mrb[26].mxu0  ;;  %v8238_v10 = vsel %vm10997_vm7, %v776_v43, %v778_v1  ;;  %v8251_v51 = vsel %vm11009_vm4, %v890_v21, %v892_v0  ;;  %v452_v43 = vrot.slane %v8188_v59, 1  ;;  %v1000_v21 = vrot.slane %v8148_v53, 6 }
 0x146   :  { %11048 = vst [vmem:[#allocation18_spill] sm:$0xff] %v8230_v32  ;;  %11050 = vst [vmem:[#allocation20_spill] sm:$0xff] %v8238_v10  ;;  %v359_v17 = vpop.f32.mrb[27].mxu0  ;;  %v8299_v39 = vsel %vm11016_vm5, %v668_v13, %v670_v20  ;;  %v782_v13 = vrot.slane %v8188_v59, 4 }
 0x147   :  { %11052 = vst [vmem:[#allocation22_spill] sm:$0xff] %v8251_v51  ;;  %6284 = vrot.lane.b32.xlu1 %v11053_v40, %s11012_s10  ;;  %v560_v17 = vrot.slane %v8148_v53, 2  ;;  %v8273_v54 = vsel %vm428_vm2, %v450_v27, %v452_v43  ;;  %v8287_v5 = vsel %vm11008_vm1, %v998_v61, %v1000_v21  ;;  %v8290_v27 = vsel %vm11008_vm1, %v1000_v21, %v1002_v15 }
 0x148   :  { %6279 = vrot.lane.b32.xlu0 %v11054_v48, %s11002_s30  ;;  %11056 = vst [vmem:[#allocation24_spill] sm:$0xff] %v8287_v5  ;;  %11058 = vst [vmem:[#allocation25_spill] sm:$0xff] %v8299_v39  ;;  %v8302_v48 = vsel %vm11016_vm5, %v670_v20, %v672_v33  ;;  %v8305_v61 = vsel %vm11015_vm6, %v1110_v36, %v1112_v14  ;;  %v780_v21 = vrot.slane %v8148_v53, 4  ;;  %v454_v20 = vrot.slane %v8230_v32, 1 }
 0x149   :  { %v8270_v40 = vpop.f32.mrb[28].mxu0  ;;  %v8276_v31 = vsel %vm11018_vm3, %v558_v37, %v560_v17  ;;  %v8279_v51 = vsel %vm11018_vm3, %v560_v17, %v562_v26  ;;  %v11057_v37 = vpack.i.bf16 %v8014_v41, %v7988_v23  ;;  %11059 = vst [vmem:[#allocation26_spill] sm:$0xff] %v8302_v48  ;;  %v1114_v41 = vrot.slane %v8188_v59, 7 }
 0x14a   :  { %11055 = vst [vmem:[#allocation23_spill] sm:$0xff] %v8270_v40  ;;  %v364_v10 = vpop.f32.mrb[29].mxu0  ;;  %v894_v17 = vrot.slane %v8230_v32, 5  ;;  %v8330_v23 = vsel %vm10997_vm7, %v780_v21, %v782_v13  ;;  %v456_v48 = vrot.slane %v8270_v40, 1  ;;  %v11064_v36 = vpack.i.bf16 %v8045_v4, %v8033_v7 }
 0x14b   :  { %6294 = vrot.lane.b32.xlu1 %v11057_v37, %s11010_s3  ;;  %v11060_v10 = vpack.i.bf16 %v8030_v63, %v8000_v35  ;;  %v896_v35 = vrot.slane %v8270_v40, 5  ;;  %v8324_v63 = vsel %vm11015_vm6, %v1112_v14, %v1114_v41  ;;  %11063 = vst [vmem:[#allocation29_spill] sm:$0xff] %v8330_v23  ;;  %v1004_v7 = vrot.slane %v8230_v32, 6 }
 0x14c   :  { %v676_v23 = vrot.slane %v8270_v40, 3 }
 0x14d   :  { %6289 = vrot.lane.b32.xlu0 %v11060_v10, %s7350_s28  ;;  %v8316_v37 = vpop.f32.mrb[30].mxu0  ;;  %v8327_v10 = vsel %vm10997_vm7, %v778_v1, %v780_v21  ;;  %v8342_v1 = vsel %vm428_vm2, %v452_v43, %v454_v20  ;;  %v8345_v21 = vsel %vm11009_vm4, %v892_v0, %v894_v17  ;;  %v8354_v4 = vsel %vm11009_vm4, %v894_v17, %v896_v35 }
 0x14e   :  { %11061 = vst [vmem:[#allocation27_spill] sm:$0xff] %v8316_v37  ;;  %11062 = vst [vmem:[#allocation28_spill] sm:$0xff] %v8327_v10  ;;  %v369_v39 = vpop.f32.mrb[31].mxu0  ;;  %v564_v43 = vrot.slane %v8230_v32, 2  ;;  %v674_v10 = vrot.slane %v8230_v32, 3  ;;  %v11070_v0 = vpack.i.bf16 %v8023_v58, %v7981_v18  ;;  %v458_v18 = vrot.slane %v8316_v37, 1 }
 0x14f   :  { %6299 = vrot.lane.b32.xlu1 %v11064_v36, %s11003_s27  ;;  %11065 = vst [vmem:[#allocation30_spill] sm:$0xff] %v8342_v1  ;;  %11066 = vst [vmem:[#allocation31_spill] sm:$0xff] %v8345_v21  ;;  %v11067_v39 = vpack.i.bf16 %v8048_v6, %v7994_v30  ;;  %v8357_v36 = vsel %vm428_vm2, %v454_v20, %v456_v48  ;;  %v1006_v20 = vrot.slane %v8270_v40, 6  ;;  %v784_v1 = vrot.slane %v8230_v32, 4 }
 0x150   :  { %11068 = vst [vmem:[#allocation32_spill] sm:$0xff] %v8354_v4  ;;  %v8369_v17 = vsel %vm11018_vm3, %v562_v26, %v564_v43  ;;  %v8382_v21 = vsel %vm11008_vm1, %v1002_v15, %v1004_v7  ;;  %v1116_v26 = vrot.slane %v8230_v32, 7  ;;  %v8399_v15 = vsel %vm11016_vm5, %v674_v10, %v676_v23 }
 0x151   :  { %6304 = vrot.lane.b32.xlu0 %v11067_v39, %s7352_s8  ;;  %v8360_v14 = vpop.f32.mrb[32].mxu0  ;;  %v566_v39 = vrot.slane %v8270_v40, 2  ;;  %v786_v4 = vrot.slane %v8270_v40, 4 }
 0x152   :  { %11069 = vst [vmem:[#allocation33_spill] sm:$0xff] %v8360_v14  ;;  %v374_v5 = vpop.f32.mrb[33].mxu0 }
 0x153   :  { %6309 = vrot.lane.b32.xlu1 %v11070_v0, %s7344_s29  ;;  %v8379_v30 = vsel %vm11018_vm3, %v564_v43, %v566_v39  ;;  %v11071_v5 = vpack.i.bf16 %v8062_v50, %v8051_v60  ;;  %v8393_v0 = vsel %vm11008_vm1, %v1004_v7, %v1006_v20  ;;  %v8396_v43 = vsel %vm11016_vm5, %v672_v33, %v674_v10 }
 0x154   :  { %11072 = vst [vmem:[#allocation34_spill] sm:$0xff] %v8396_v43  ;;  %v8408_v50 = vsel %vm11015_vm6, %v1114_v41, %v1116_v26  ;;  %v11074_v7 = vrot.slane %v8270_v40, 7  ;;  %v11076_v41 = vpack.i.bf16 %v8075_v52, %v8048_v6  ;;  %v11077_v33 = vpack.i.bf16 %v8087_v16, %v8070_v3 }
 0x155   :  { %6319 = vrot.lane.b32.xlu0 %v11071_v5, %s7348_s1  ;;  %v8403_v58 = vpop.f32.mrb[34].mxu0  ;;  %11073 = vst [vmem:[#allocation35_spill] sm:$0xff] %v8408_v50  ;;  %v8436_v50 = vsel %vm10997_vm7, %v782_v13, %v784_v1  ;;  %v8439_v6 = vsel %vm10997_vm7, %v784_v1, %v786_v4  ;;  %v570_v43 = vrot.slane %v8360_v14, 2  ;;  %v11081_v13 = vpack.i.bf16 %v8106_v46, %v8103_v57 }
 0x156   :  { %v8413_v5 = vsel %vm11015_vm6, %v1116_v26, %v11074_v7  ;;  %v379_v10 = vpop.f32.mrb[35].mxu0  ;;  %v898_v26 = vrot.slane %v8316_v37, 5  ;;  %v900_v7 = vrot.slane %v8360_v14, 5 }
 0x157   :  { %11075 = vst [vmem:[#allocation36_spill] sm:$0xff] %v8413_v5  ;;  %6314 = vrot.lane.b32.xlu1 %v11076_v41, %s7346_s2  ;;  %v6996_v10 = vld [vmem:[%s11032_s6 + $0x68] sm:$0x3f]   ;;  %v8442_v41 = vsel %vm428_vm2, %v456_v48, %v458_v18  ;;  %v460_v48 = vrot.slane %v8360_v14, 1  ;;  %v568_v5 = vrot.slane %v8316_v37, 2  ;;  %s7357_s6 = smov 50  }
 0x158   :  { %v8451_v3 = vsel %vm11009_vm4, %v896_v35, %v898_v26  ;;  %v8454_v16 = vsel %vm11009_vm4, %v898_v26, %v900_v7  ;;  %v1718_v35 = vsel %vm11018_vm3, %v6996_v10, 0  ;;  %v1008_v26 = vrot.slane %v8316_v37, 6 }
 0x159   :  { %6329 = vrot.lane.b32.xlu0 %v11077_v33, %s11012_s10  ;;  %v8444_v60 = vpop.f32.mrb[36].mxu0  ;;  %11078 = vst [vmem:[#allocation37_spill] sm:$0xff] %v8451_v3  ;;  %11079 = vst [vmem:[#allocation38_spill] sm:$0xff] %v8454_v16  ;;  %v11080_v33 = vpack.i.bf16 %v8100_v55, %v8090_v62  ;;  %1747 = vmatpush1.bf16.msra.mxu0 %v1718_v35  ;;  %v1010_v62 = vrot.slane %v8360_v14, 6  ;;  %v678_v55 = vrot.slane %v8316_v37, 3  ;;  %v1120_v16 = vrot.slane %v8316_v37, 7 }
 0x15a   :  { %v384_v1 = vpop.f32.mrb[37].mxu0  ;;  %v8479_v10 = vsel %vm11018_vm3, %v566_v39, %v568_v5  ;;  %v8482_v3 = vsel %vm11018_vm3, %v568_v5, %v570_v43  ;;  %v8485_v57 = vsel %vm11008_vm1, %v1006_v20, %v1008_v26  ;;  %v680_v39 = vrot.slane %v8360_v14, 3 }
 0x15b   :  { %6324 = vrot.lane.b32.xlu1 %v11080_v33, %s11002_s30  ;;  %v8472_v1 = vsel %vm428_vm2, %v458_v18, %v460_v48  ;;  %11082 = vst [vmem:[#allocation39_spill] sm:$0xff] %v8479_v10  ;;  %11083 = vst [vmem:[#allocation40_spill] sm:$0xff] %v8485_v57  ;;  %v11084_v18 = vmov 0.0|0.0   ;;  %v8493_v35 = vsel %vm11008_vm1, %v1008_v26, %v1010_v62  ;;  %v8496_v33 = vsel %vm11016_vm5, %v676_v23, %v678_v55 }
 0x15c   :  { %6023 = vmatprep.subr.bf16.mxu0 %v11084_v18  ;;  %11085 = vst [vmem:[#allocation41_spill] sm:$0xff] %v8493_v35  ;;  %11086 = vst [vmem:[#allocation42_spill] sm:$0xff] %v8496_v33  ;;  %v11087_v20 = vpack.i.bf16 %v8128_v44, %v8115_v56  ;;  %v788_v26 = vrot.slane %v8316_v37, 4  ;;  %v11088_v23 = vpack.i.bf16 %v8143_v2, %v8140_v49  ;;  %v790_v56 = vrot.slane %v8360_v14, 4 }
 0x15d   :  { %6339 = vrot.lane.b32.xlu0 %v11081_v13, %s11010_s3  ;;  %v8487_v46 = vpop.f32.mrb[38].mxu0  ;;  %v1122_v13 = vrot.slane %v8360_v14, 7  ;;  %v462_v44 = vrot.slane %v8403_v58, 1  ;;  %v11090_v57 = vrot.slane %v8270_v40, 7 }
 0x15e   :  { %v389_v5 = vpop.f32.mrb[39].mxu0  ;;  %v8530_v2 = vsel %vm10997_vm7, %v786_v4, %v788_v26  ;;  %v1012_v4 = vrot.slane %v8403_v58, 6  ;;  %v466_v10 = vrot.slane %v8487_v46, 1 }
 0x15f   :  { %6334 = vrot.lane.b32.xlu1 %v11087_v20, %s7350_s28  ;;  %v8513_v5 = vsel %vm11016_vm5, %v678_v55, %v680_v39  ;;  %v8524_v35 = vsel %vm11015_vm6, %v11090_v57, %v1120_v16  ;;  %v8527_v49 = vsel %vm11015_vm6, %v1120_v16, %v1122_v13  ;;  %11093 = vst [vmem:[#allocation46_spill] sm:$0xff] %v8530_v2  ;;  %v902_v57 = vrot.slane %v8403_v58, 5 }
 0x160   :  { %11089 = vst [vmem:[#allocation43_spill] sm:$0xff] %v8513_v5  ;;  %11091 = vst [vmem:[#allocation44_spill] sm:$0xff] %v8524_v35  ;;  %v8537_v20 = vsel %vm10997_vm7, %v788_v26, %v790_v56  ;;  %v8540_v18 = vsel %vm428_vm2, %v460_v48, %v462_v44  ;;  %v11095_v16 = vpack.i.bf16 %v8146_v8, %v8075_v52  ;;  %v904_v26 = vrot.slane %v8444_v60, 5 }
 0x161   :  { %6344 = vrot.lane.b32.xlu0 %v11088_v23, %s11003_s27  ;;  %11092 = vst [vmem:[#allocation45_spill] sm:$0xff] %v8527_v49  ;;  %v8532_v55 = vpop.f32.mrb[40].mxu0  ;;  %11094 = vst [vmem:[#allocation47_spill] sm:$0xff] %v8537_v20  ;;  %v464_v35 = vrot.slane %v8444_v60, 1  ;;  %v11096_v48 = vpack.i.bf16 %v8108_v22, %v8065_v28  ;;  %v572_v52 = vrot.slane %v8403_v58, 2  ;;  %v1014_v20 = vrot.slane %v8444_v60, 6 }
 0x162   :  { %v394_v33 = vpop.f32.mrb[41].mxu0  ;;  %v8564_v23 = vsel %vm11009_vm4, %v902_v57, %v904_v26  ;;  %v11100_v5 = vpack.i.bf16 %v8158_v12, %v8155_v9  ;;  %v684_v12 = vrot.slane %v8444_v60, 3 }
 0x163   :  { %6349 = vrot.lane.b32.xlu1 %v11095_v16, %s7352_s8  ;;  %v8558_v33 = vsel %vm11009_vm4, %v900_v7, %v902_v57  ;;  %v574_v16 = vrot.slane %v8444_v60, 2  ;;  %v8567_v2 = vsel %vm428_vm2, %v462_v44, %v464_v35  ;;  %v8578_v28 = vsel %vm11018_vm3, %v570_v43, %v572_v52 }
 0x164   :  { %11097 = vst [vmem:[#allocation48_spill] sm:$0xff] %v8558_v33  ;;  %11098 = vst [vmem:[#allocation49_spill] sm:$0xff] %v8578_v28  ;;  %v8590_v7 = vsel %vm11008_vm1, %v1010_v62, %v1012_v4  ;;  %v8593_v22 = vsel %vm11008_vm1, %v1012_v4, %v1014_v20  ;;  %v1126_v62 = vrot.slane %v8444_v60, 7  ;;  %v792_v4 = vrot.slane %v8403_v58, 4 }
 0x165   :  { %6354 = vrot.lane.b32.xlu0 %v11096_v48, %s7344_s29  ;;  %v8570_v49 = vpop.f32.mrb[42].mxu0  ;;  %v682_v48 = vrot.slane %v8403_v58, 3  ;;  %v8581_v57 = vsel %vm11018_vm3, %v572_v52, %v574_v16  ;;  %11101 = vst [vmem:[#allocation51_spill] sm:$0xff] %v8590_v7  ;;  %11102 = vst [vmem:[#allocation52_spill] sm:$0xff] %v8593_v22  ;;  %v11103_v52 = vpack.i.bf16 %v8163_v19, %v8146_v8  ;;  %v686_v33 = vrot.slane %v8487_v46, 3 }
 0x166   :  { %11099 = vst [vmem:[#allocation50_spill] sm:$0xff] %v8581_v57  ;;  %v399_v44 = vpop.f32.mrb[43].mxu0  ;;  %v11104_v57 = vpack.i.bf16 %v8184_v47, %v8181_v25  ;;  %v8645_v47 = vsel %vm428_vm2, %v464_v35, %v466_v10  ;;  %v578_v35 = vrot.slane %v8532_v55, 2  ;;  %v11109_v22 = vpack.i.bf16 %v8224_v42, %v8207_v45 }
 0x167   :  { %6364 = vrot.lane.b32.xlu1 %v11100_v5, %s7348_s1  ;;  %v8596_v43 = vsel %vm11016_vm5, %v680_v39, %v682_v48  ;;  %v1124_v5 = vrot.slane %v8403_v58, 7  ;;  %v794_v39 = vrot.slane %v8444_v60, 4  ;;  %v910_v42 = vrot.slane %v8570_v49, 5 }
 0x169   :  { %6359 = vrot.lane.b32.xlu0 %v11103_v52, %s7346_s2  ;;  %v8607_v44 = vpop.f32.mrb[44].mxu0  ;;  %v8615_v52 = vsel %vm11016_vm5, %v682_v48, %v684_v12  ;;  %v8618_v9 = vsel %vm11015_vm6, %v1122_v13, %v1124_v5  ;;  %v8621_v7 = vsel %vm11015_vm6, %v1124_v5, %v1126_v62  ;;  %v11105_v5 = vpack.i.bf16 %v8196_v11, %v8193_v29 }
 0x16a   :  { %v404_v28 = vpop.f32.mrb[45].mxu0  ;;  %v8642_v25 = vsel %vm10997_vm7, %v792_v4, %v794_v39  ;;  %v908_v29 = vrot.slane %v8532_v55, 5  ;;  %v468_v11 = vrot.slane %v8532_v55, 1  ;;  %v11108_v48 = vpack.i.bf16 %v8204_v24, %v8199_v38 }
 0x16b   :  { %6374 = vrot.lane.b32.xlu1 %v11104_v57, %s11012_s10  ;;  %v8639_v28 = vsel %vm10997_vm7, %v790_v56, %v792_v4  ;;  %v906_v57 = vrot.slane %v8487_v46, 5  ;;  %v576_v4 = vrot.slane %v8487_v46, 2  ;;  %v1130_v24 = vrot.slane %v8532_v55, 7 }
 0x16c   :  { %11106 = vst [vmem:[#allocation53_spill] sm:$0xff] %v8639_v28  ;;  %v8668_v13 = vsel %vm428_vm2, %v466_v10, %v468_v11  ;;  %v11115_v28 = vld [vmem:[#allocation19_spill] sm:$0xff] }
 0x16d   :  { %6369 = vrot.lane.b32.xlu0 %v11105_v5, %s11002_s30  ;;  %v8655_v56 = vsel %vm11009_vm4, %v904_v26, %v906_v57  ;;  %v1016_v5 = vrot.slane %v8487_v46, 6  ;;  %v8665_v8 = vsel %vm11009_vm4, %v906_v57, %v908_v29  ;;  %v1018_v26 = vrot.slane %v8532_v55, 6 }
 0x16e   :  { %11107 = vst [vmem:[#allocation54_spill] sm:$0xff] %v8655_v56  ;;  %v8681_v38 = vsel %vm11018_vm3, %v574_v16, %v576_v4  ;;  %v8684_v10 = vsel %vm11018_vm3, %v576_v4, %v578_v35  ;;  %v688_v16 = vrot.slane %v8532_v55, 3  ;;  %v1128_v4 = vrot.slane %v8487_v46, 7 }
 0x16f   :  { %6384 = vrot.lane.b32.xlu1 %v11108_v48, %s11010_s3  ;;  %11110 = vst [vmem:[#allocation55_spill] sm:$0xff] %v8681_v38  ;;  %11111 = vst [vmem:[#allocation56_spill] sm:$0xff] %v8684_v10  ;;  %v8689_v57 = vsel %vm11008_vm1, %v1014_v20, %v1016_v5  ;;  %v8692_v45 = vsel %vm11008_vm1, %v1016_v5, %v1018_v26  ;;  %v11114_v48 = vld [vmem:[#allocation20_spill] sm:$0xff]  ;;  %v796_v5 = vrot.slane %v8487_v46, 4  ;;  %v798_v38 = vrot.slane %v8532_v55, 4  ;;  %v11121_v10 = vld [vmem:[#allocation22_spill] sm:$0xff] }
 0x170   :  { %11112 = vst [vmem:[#allocation57_spill] sm:$0xff] %v8689_v57  ;;  %11113 = vst [vmem:[#allocation58_spill] sm:$0xff] %v8692_v45  ;;  %v11116_v20 = vpack.i.bf16 %v11114_v48, %v11115_v28  ;;  %v11117_v57 = vpack.i.bf16 %v8241_v34, %v8163_v19  ;;  %v8717_v45 = vsel %vm11016_vm5, %v686_v33, %v688_v16 }
 0x171   :  { %6379 = vrot.lane.b32.xlu0 %v11109_v22, %s7350_s28  ;;  %v8695_v22 = vsel %vm11016_vm5, %v684_v12, %v686_v33  ;;  %v8709_v12 = vrot.slane %v8570_v49, 1  ;;  %v8720_v28 = vsel %vm11015_vm6, %v1126_v62, %v1128_v4  ;;  %v8723_v48 = vsel %vm11015_vm6, %v1128_v4, %v1130_v24 }
 0x172   :  { %v8732_v19 = vsel %vm10997_vm7, %v794_v39, %v796_v5  ;;  %v8735_v33 = vsel %vm10997_vm7, %v796_v5, %v798_v38  ;;  %v911_v4 = vsel %vm11009_vm4, %v908_v29, %v910_v42  ;;  %v11120_v56 = vpack.i.bf16 %v8188_v59, %v8148_v53  ;;  %v11122_v29 = vld [vmem:[#allocation21_spill] sm:$0xff] }
 0x173   :  { %6389 = vrot.lane.b32.xlu1 %v11116_v20, %s11003_s27  ;;  %11118 = vst [vmem:[#allocation20_spill] sm:$0xff] %v8732_v19  ;;  %11119 = vst [vmem:[#allocation19_spill] sm:$0xff] %v8735_v33  ;;  %v580_v20 = vrot.slane %v8570_v49, 2  ;;  %v8753_v62 = vpack.i.bf16 %v910_v42, %v911_v4  ;;  %v11123_v19 = vpack.i.bf16 %v11121_v10, %v11122_v29  ;;  %v690_v59 = vrot.slane %v8570_v49, 3 }
 0x174   :  { %v800_v39 = vrot.slane %v8570_v49, 4  ;;  %v11124_v4 = vrot.slane %v8607_v44, 6  ;;  %v11125_v10 = vrot.slane %v8607_v44, 1 }
 0x175   :  { %6394 = vrot.lane.b32.xlu0 %v11117_v57, %s7352_s8  ;;  %v8741_v57 = vsel %vm428_vm2, %v468_v11, %v8709_v12  ;;  %v1020_v11 = vrot.slane %v8570_v49, 6  ;;  %v581_v33 = vsel %vm11018_vm3, %v578_v35, %v580_v20  ;;  %v691_v29 = vsel %vm11016_vm5, %v688_v16, %v690_v59 }
 0x176   :  { %v8764_v53 = vpack.i.bf16 %v580_v20, %v581_v33  ;;  %v1269_v35 = vsel %vm428_vm2, %v8709_v12, %v11125_v10  ;;  %v801_v16 = vsel %vm10997_vm7, %v798_v38, %v800_v39  ;;  %vm1683_vm7 = vcmask 752640  }
 0x177   :  { %6399 = vrot.lane.b32.xlu1 %v11120_v56, %s7344_s29  ;;  %v1132_v56 = vrot.slane %v8570_v49, 7  ;;  %v8767_v42 = vsel %vm11008_vm1, %v1018_v26, %v1020_v11  ;;  %v8772_v5 = vsel %vm11008_vm1, %v1020_v11, %v11124_v4  ;;  %v11126_v26 = vrot.slane %v8607_v44, 7 }
 0x178   :  { %v11127_v11 = vpack.i.bf16 %v8273_v54, %v8241_v34  ;;  %v8793_v4 = vpack.i.bf16 %v690_v59, %v691_v29  ;;  %v11130_v59 = vld [vmem:[#allocation24_spill] sm:$0xff]  ;;  %v11132_v29 = vld [vmem:[#allocation26_spill] sm:$0xff] }
 0x179   :  { %6409 = vrot.lane.b32.xlu0 %v11123_v19, %s7348_s1  ;;  %v8782_v20 = vsel %vm11015_vm6, %v1130_v24, %v1132_v56  ;;  %v8787_v33 = vsel %vm11015_vm6, %v1132_v56, %v11126_v26  ;;  %v11128_v24 = vmov %v11125_v10  ;;  %v11129_v56 = vpack.i.bf16 %v8279_v51, %v8276_v31  ;;  %v11136_v31 = vld [vmem:[#allocation29_spill] sm:$0xff]  ;;  %v11137_v51 = vld [vmem:[#allocation28_spill] sm:$0xff] }
 0x17a   :  { %v8800_v19 = vpack.i.bf16 %v11128_v24, %v1269_v35  ;;  %v8806_v26 = vpack.i.bf16 %v800_v39, %v801_v16  ;;  %v11131_v34 = vpack.i.bf16 %v8290_v27, %v11130_v59  ;;  %v11135_v35 = vpack.i.bf16 %v8324_v63, %v8305_v61  ;;  %v11139_v16 = vld [vmem:[#allocation30_spill] sm:$0xff]  ;;  %v11143_v59 = vld [vmem:[#allocation31_spill] sm:$0xff] }
 0x17b   :  { %6404 = vrot.lane.b32.xlu1 %v11127_v11, %s7346_s2  ;;  %v11133_v11 = vld [vmem:[#allocation25_spill] sm:$0xff]  ;;  %v11138_v39 = vpack.i.bf16 %v11136_v31, %v11137_v51  ;;  %v11140_v27 = vpack.i.bf16 %v11139_v16, %v8273_v54  ;;  %v11141_v24 = vpack.i.bf16 %v8270_v40, %v8230_v32  ;;  %v11145_v63 = vpack.i.bf16 %v8357_v36, %v11139_v16  ;;  %v11150_v51 = vld [vmem:[#allocation36_spill] sm:$0xff] }
 0x17c   :  { %v11134_v38 = vpack.i.bf16 %v11132_v29, %v11133_v11  ;;  %v11146_v54 = vpack.i.bf16 %v8379_v30, %v8369_v17  ;;  %v11147_v29 = vpack.i.bf16 %v8393_v0, %v8382_v21  ;;  %v11153_v21 = vpack.i.bf16 %v8439_v6, %v8436_v50 }
 0x17d   :  { %6419 = vrot.lane.b32.xlu0 %v11129_v56, %s11012_s10  ;;  %v11142_v56 = vld [vmem:[#allocation32_spill] sm:$0xff] }
 0x17e   :  { %v11144_v61 = vpack.i.bf16 %v11142_v56, %v11143_v59 }
 0x17f   :  { %6414 = vrot.lane.b32.xlu1 %v11131_v34, %s11002_s30 }
 0x181   :  { %6429 = vrot.lane.b32.xlu0 %v11134_v38, %s11010_s3 }
 0x183   :  { %6424 = vrot.lane.b32.xlu1 %v11135_v35, %s7350_s28  ;;  %v11148_v35 = vld [vmem:[#allocation34_spill] sm:$0xff] }
 0x184   :  { %v11149_v31 = vpack.i.bf16 %v8399_v15, %v11148_v35  ;;  %v11154_v15 = vpack.i.bf16 %v8442_v41, %v8357_v36  ;;  %v11155_v36 = vpack.i.bf16 %v8360_v14, %v8316_v37 }
 0x185   :  { %6434 = vrot.lane.b32.xlu0 %v11138_v39, %s11003_s27  ;;  %v11151_v39 = vld [vmem:[#allocation35_spill] sm:$0xff] }
 0x186   :  { %v11152_v16 = vpack.i.bf16 %v11150_v51, %v11151_v39 }
 0x187   :  { %6439 = vrot.lane.b32.xlu1 %v11140_v27, %s7352_s8 }
 0x189   :  { %6444 = vrot.lane.b32.xlu0 %v11141_v24, %s7344_s29 }
 0x18b   :  { %6454 = vrot.lane.b32.xlu1 %v11144_v61, %s7348_s1 }
 0x18d   :  { %6449 = vrot.lane.b32.xlu0 %v11145_v63, %s7346_s2 }
 0x18e   :  { %v6175_v34 = vpop.permute.xlu0 %6174 }
 0x18f   :  { %6464 = vrot.lane.b32.xlu1 %v11146_v54, %s11012_s10  ;;  %v6177_v39 = vunpack.i.h.bf16 %v6175_v34 }
 0x191   :  { %6459 = vrot.lane.b32.xlu0 %v11147_v29, %s11002_s30  ;;  %v6190_v11 = vpop.permute.xlu1 %6189 }
 0x192   :  { %v6180_v38 = vpop.permute.xlu0 %6179  ;;  %v6192_v61 = vunpack.i.h.bf16 %v6190_v11  ;;  %v6191_v50 = vunpack.i.l.bf16 %v6190_v11  ;;  %v11156_v11 = vld [vmem:[#allocation38_spill] sm:$0xff] }
 0x193   :  { %6474 = vrot.lane.b32.xlu1 %v11149_v31, %s11010_s3  ;;  %v6182_v24 = vunpack.i.h.bf16 %v6180_v38  ;;  %v6181_v56 = vunpack.i.l.bf16 %v6180_v38 }
 0x195   :  { %6469 = vrot.lane.b32.xlu0 %v11152_v16, %s7350_s28  ;;  %v6195_v27 = vpop.permute.xlu1 %6194  ;;  %v6176_v16 = vunpack.i.l.bf16 %v6175_v34 }
 0x196   :  { %v6185_v30 = vpop.permute.xlu0 %6184  ;;  %v6197_v6 = vunpack.i.h.bf16 %v6195_v27  ;;  %v6196_v63 = vunpack.i.l.bf16 %v6195_v27 }
 0x197   :  { %6479 = vrot.lane.b32.xlu1 %v11153_v21, %s11003_s27  ;;  %v6187_v17 = vunpack.i.h.bf16 %v6185_v30  ;;  %v6186_v0 = vunpack.i.l.bf16 %v6185_v30  ;;  %v11157_v21 = vld [vmem:[#allocation37_spill] sm:$0xff] }
 0x198   :  { %v11158_v27 = vpack.i.bf16 %v11156_v11, %v11157_v21 }
 0x199   :  { %6484 = vrot.lane.b32.xlu0 %v11154_v15, %s7352_s8  ;;  %v6205_v59 = vpop.permute.xlu1 %6204  ;;  %v1453_v38 = vsel %vm11004_vm10, %v6187_v17, %v6192_v61  ;;  %v1452_v30 = vsel %vm11004_vm10, %v6186_v0, %v6191_v50  ;;  %v11159_v15 = vld [vmem:[#allocation6_spill] sm:$0xff] }
 0x19a   :  { %v6200_v54 = vpop.permute.xlu0 %6199  ;;  %v6207_v29 = vunpack.i.h.bf16 %v6205_v59  ;;  %v6206_v35 = vunpack.i.l.bf16 %v6205_v59  ;;  %v1338_v59 = vsel %vm1336_vm8, %v11159_v15, %v6182_v24 }
 0x19b   :  { %v6202_v31 = vunpack.i.h.bf16 %v6200_v54  ;;  %v6201_v51 = vunpack.i.l.bf16 %v6200_v54  ;;  %6489 = vrot.lane.b32.xlu1 %v11155_v36, %s7344_s29  ;;  %v11160_v54 = vld [vmem:[#allocation5_spill] sm:$0xff]  ;;  %v1361_v50 = vsel %vm11007_vm9, %v1338_v59, %v6197_v6 }
 0x19c   :  { %v1337_v10 = vsel %vm1336_vm8, %v11160_v54, %v6181_v56  ;;  %v1384_v21 = vsel %vm11006_vm11, %v1361_v50, %v6207_v29  ;;  %v11161_v56 = vpack.i.bf16 %v8472_v1, %v8442_v41  ;;  %v11171_v50 = vld [vmem:[#allocation44_spill] sm:$0xff] }
 0x19d   :  { %6499 = vrot.lane.b32.xlu0 %v11158_v27, %s7348_s1  ;;  %v1475_v14 = vsel %vm1474_vm12, %v1452_v30, %v6201_v51  ;;  %v1476_v36 = vsel %vm1474_vm12, %v1453_v38, %v6202_v31  ;;  %v6210_v34 = vpop.permute.xlu1 %6209  ;;  %v1360_v61 = vsel %vm11007_vm9, %v1337_v10, %v6196_v63 }
 0x19e   :  { %v6212_v40 = vunpack.i.h.bf16 %v6210_v34  ;;  %v6211_v37 = vunpack.i.l.bf16 %v6210_v34  ;;  %v6215_v32 = vpop.permute.xlu0 %6214  ;;  %v1383_v11 = vsel %vm11006_vm11, %v1360_v61, %v6206_v35  ;;  %v1498_v6 = vsel %vm1497_vm15, %v1475_v14, %v6176_v16  ;;  %v11162_v35 = vld [vmem:[#allocation39_spill] sm:$0xff]  ;;  %v11164_v14 = vld [vmem:[#allocation41_spill] sm:$0xff] }
 0x19f   :  { %v6217_v24 = vunpack.i.h.bf16 %v6215_v32  ;;  %v6216_v27 = vunpack.i.l.bf16 %v6215_v32  ;;  %6494 = vrot.lane.b32.xlu1 %v11161_v56, %s7346_s2  ;;  %v1499_v63 = vsel %vm1497_vm15, %v1476_v36, %v6177_v39  ;;  %v11163_v51 = vpack.i.bf16 %v8482_v3, %v11162_v35  ;;  %v11165_v39 = vld [vmem:[#allocation40_spill] sm:$0xff]  ;;  %v11167_v3 = vld [vmem:[#allocation43_spill] sm:$0xff]  ;;  %v11170_v61 = vld [vmem:[#allocation45_spill] sm:$0xff] }
 0x1a0   :  { %v1406_v31 = vsel %vm11005_vm13, %v1383_v11, %v6211_v37  ;;  %v1407_v10 = vsel %vm11005_vm13, %v1384_v21, %v6212_v40  ;;  %v11166_v16 = vpack.i.bf16 %v11164_v14, %v11165_v39  ;;  %v11172_v11 = vpack.i.bf16 %v11170_v61, %v11171_v50  ;;  %v11173_v21 = vld [vmem:[#allocation47_spill] sm:$0xff] }
 0x1a1   :  { %6509 = vrot.lane.b32.xlu0 %v11163_v51, %s11012_s10  ;;  %v1429_v32 = vsel %vm1428_vm14, %v1406_v31, %v6186_v0  ;;  %v1430_v29 = vsel %vm1428_vm14, %v1407_v10, %v6187_v17  ;;  %v1522_v41 = vsel %vm1520_vm0, %v1499_v63, %v6217_v24  ;;  %v1521_v38 = vsel %vm1520_vm0, %v1498_v6, %v6216_v27  ;;  %v6220_v37 = vpop.permute.xlu1 %6219  ;;  %v11168_v0 = vld [vmem:[#allocation42_spill] sm:$0xff]  ;;  %v11176_v63 = vld [vmem:[#allocation8_spill] sm:$0xff]  ;;  %v11177_v51 = vld [vmem:[#allocation7_spill] sm:$0xff] }
 0x1a2   :  { %v1543_v30 = vpack.c.bf16 %v1430_v29, %v1429_v32  ;;  %v6230_v40 = vpop.permute.xlu0 %6229  ;;  %v1544_v15 = vpack.c.bf16 %v1522_v41, %v1521_v38  ;;  %v11169_v59 = vpack.i.bf16 %v11167_v3, %v11168_v0  ;;  %v11174_v24 = vld [vmem:[#allocation46_spill] sm:$0xff]  ;;  %v11178_v38 = vpack.i.bf16 %v8540_v18, %v8472_v1 }
 0x1a3   :  { %6504 = vrot.lane.b32.xlu1 %v11166_v16, %s11002_s30  ;;  %v11175_v27 = vpack.i.bf16 %v11173_v21, %v11174_v24  ;;  %v11179_v14 = vpack.i.bf16 %v8444_v60, %v8403_v58  ;;  %v6232_v39 = vunpack.i.h.bf16 %v6230_v40  ;;  %v6231_v16 = vunpack.i.l.bf16 %v6230_v40 }
 0x1a4   :  { %5551 = vmatprep.mubr.msk.bf16.mxu0 %vm1683_vm7, %v1544_v15 }
 0x1a5   :  { %6519 = vrot.lane.b32.xlu0 %v11169_v59, %s11010_s3  ;;  %1753 = vmatmul.mubr.bf16.vlgmr.msra.gmra.mrb[48].mxu0 %v1543_v30  ;;  %v6225_v17 = vpop.permute.xlu1 %6224 }
 0x1a6   :  { %v6240_v54 = vpop.permute.xlu0 %6239  ;;  %v6227_v36 = vunpack.i.h.bf16 %v6225_v17  ;;  %v6226_v34 = vunpack.i.l.bf16 %v6225_v17 }
 0x1a7   :  { %6514 = vrot.lane.b32.xlu1 %v11172_v11, %s7350_s28  ;;  %v6242_v31 = vunpack.i.h.bf16 %v6240_v54  ;;  %v6241_v10 = vunpack.i.l.bf16 %v6240_v54  ;;  %v11180_v11 = vld [vmem:[#allocation48_spill] sm:$0xff] }
 0x1a8   :  { %v1340_v35 = vsel %vm1336_vm8, %v11176_v63, %v6227_v36  ;;  %v1339_v32 = vsel %vm1336_vm8, %v11177_v51, %v6226_v34  ;;  %v11181_v21 = vpack.i.bf16 %v8564_v23, %v11180_v11 }
 0x1a9   :  { %6524 = vrot.lane.b32.xlu0 %v11175_v27, %s11003_s27  ;;  %v6235_v56 = vpop.permute.xlu1 %6234  ;;  %v1362_v0 = vsel %vm11007_vm9, %v1339_v32, %v6241_v10  ;;  %v1363_v59 = vsel %vm11007_vm9, %v1340_v35, %v6242_v31  ;;  %v11182_v31 = vpack.i.bf16 %v8567_v2, %v8540_v18  ;;  %v6222_v10 = vunpack.i.h.bf16 %v6220_v37  ;;  %v11183_v18 = vld [vmem:[#allocation50_spill] sm:$0xff] }
 0x1aa   :  { %v6250_v6 = vpop.permute.xlu0 %6249  ;;  %v6237_v29 = vunpack.i.h.bf16 %v6235_v56  ;;  %v6236_v41 = vunpack.i.l.bf16 %v6235_v56 }
 0x1ab   :  { %6529 = vrot.lane.b32.xlu1 %v11178_v38, %s7352_s8  ;;  %v6252_v30 = vunpack.i.h.bf16 %v6250_v6  ;;  %v6251_v15 = vunpack.i.l.bf16 %v6250_v6  ;;  %v6221_v6 = vunpack.i.l.bf16 %v6220_v37 }
 0x1ac   :  { %v1455_v1 = vsel %vm11004_vm10, %v6232_v39, %v6237_v29  ;;  %v1454_v34 = vsel %vm11004_vm10, %v6231_v16, %v6236_v41 }
 0x1ad   :  { %6534 = vrot.lane.b32.xlu0 %v11179_v14, %s7344_s29  ;;  %v6245_v3 = vpop.permute.xlu1 %6244  ;;  %v1385_v40 = vsel %vm11006_vm11, %v1362_v0, %v6251_v15  ;;  %v1386_v24 = vsel %vm11006_vm11, %v1363_v59, %v6252_v30  ;;  %v11184_v14 = vld [vmem:[#allocation49_spill] sm:$0xff] }
 0x1ae   :  { %v6247_v17 = vunpack.i.h.bf16 %v6245_v3  ;;  %v6246_v54 = vunpack.i.l.bf16 %v6245_v3  ;;  %v6255_v36 = vpop.permute.xlu0 %6254  ;;  %v11185_v37 = vpack.i.bf16 %v11183_v18, %v11184_v14  ;;  %v11197_v14 = vld [vmem:[#allocation10_spill] sm:$0xff] }
 0x1af   :  { %v6257_v61 = vunpack.i.h.bf16 %v6255_v36  ;;  %v6256_v50 = vunpack.i.l.bf16 %v6255_v36  ;;  %6544 = vrot.lane.b32.xlu1 %v11181_v21, %s7348_s1  ;;  %v11191_v21 = vld [vmem:[#allocation53_spill] sm:$0xff] }
 0x1b0   :  { %v1477_v27 = vsel %vm1474_vm12, %v1454_v34, %v6246_v54  ;;  %v1478_v56 = vsel %vm1474_vm12, %v1455_v1, %v6247_v17  ;;  %v11186_v17 = vld [vmem:[#allocation52_spill] sm:$0xff]  ;;  %v11187_v54 = vld [vmem:[#allocation51_spill] sm:$0xff]  ;;  %v11189_v34 = vpack.i.bf16 %v8615_v52, %v8596_v43  ;;  %v11193_v43 = vpack.i.bf16 %v8645_v47, %v8567_v2 }
 0x1b1   :  { %6539 = vrot.lane.b32.xlu0 %v11182_v31, %s7346_s2  ;;  %v6260_v63 = vpop.permute.xlu1 %6259  ;;  %v1408_v35 = vsel %vm11005_vm13, %v1385_v40, %v6256_v50  ;;  %v1409_v23 = vsel %vm11005_vm13, %v1386_v24, %v6257_v61  ;;  %v1500_v30 = vsel %vm1497_vm15, %v1477_v27, %v6221_v6  ;;  %v1501_v15 = vsel %vm1497_vm15, %v1478_v56, %v6222_v10 }
 0x1b2   :  { %v6262_v51 = vunpack.i.h.bf16 %v6260_v63  ;;  %v6261_v32 = vunpack.i.l.bf16 %v6260_v63  ;;  %v6265_v29 = vpop.permute.xlu0 %6264  ;;  %v1431_v41 = vsel %vm1428_vm14, %v1408_v35, %v6231_v16  ;;  %v1432_v38 = vsel %vm1428_vm14, %v1409_v23, %v6232_v39 }
 0x1b3   :  { %6554 = vrot.lane.b32.xlu1 %v11185_v37, %s11012_s10  ;;  %v1545_v3 = vpack.c.bf16 %v1432_v38, %v1431_v41  ;;  %v11188_v16 = vpack.i.bf16 %v11186_v17, %v11187_v54  ;;  %v11190_v61 = vpack.i.bf16 %v8621_v7, %v8618_v9  ;;  %v11192_v40 = vpack.i.bf16 %v8642_v25, %v11191_v21 }
 0x1b4   :  { %v1524_v0 = vsel %vm1520_vm0, %v1501_v15, %v6262_v51  ;;  %v1523_v59 = vsel %vm1520_vm0, %v1500_v30, %v6261_v32  ;;  %v11194_v32 = vpack.i.bf16 %v8532_v55, %v8487_v46  ;;  %v6267_v41 = vunpack.i.h.bf16 %v6265_v29  ;;  %v11195_v15 = vld [vmem:[#allocation54_spill] sm:$0xff] }
 0x1b5   :  { %6549 = vrot.lane.b32.xlu0 %v11188_v16, %s11002_s30  ;;  %v6275_v39 = vpop.permute.xlu1 %6274  ;;  %v1546_v36 = vpack.c.bf16 %v1524_v0, %v1523_v59  ;;  %v6266_v2 = vunpack.i.l.bf16 %v6265_v29  ;;  %v11196_v18 = vpack.i.bf16 %v8665_v8, %v11195_v15  ;;  %v11207_v15 = vpack.i.bf16 %v8723_v48, %v8720_v28 }
 0x1b6   :  { %v6270_v1 = vpop.permute.xlu0 %6269  ;;  %v6277_v10 = vunpack.i.h.bf16 %v6275_v39  ;;  %v6276_v7 = vunpack.i.l.bf16 %v6275_v39  ;;  %v11213_v28 = vpack.i.bf16 %v8741_v57, %v8668_v13 }
 0x1b7   :  { %5552 = vmatprep.mubr.msk.bf16.mxu0 %vm1683_vm7, %v1546_v36  ;;  %6564 = vrot.lane.b32.xlu1 %v11189_v34, %s11010_s3  ;;  %v6272_v52 = vunpack.i.h.bf16 %v6270_v1  ;;  %v6271_v56 = vunpack.i.l.bf16 %v6270_v1 }
 0x1b8   :  { %1761 = vmatmul.mubr.bf16.gmra.mrb[52].mxu0 %v1545_v3  ;;  %v11198_v3 = vld [vmem:[#allocation9_spill] sm:$0xff] }
 0x1b9   :  { %6559 = vrot.lane.b32.xlu0 %v11190_v61, %s7350_s28  ;;  %v6285_v50 = vpop.permute.xlu1 %6284  ;;  %v1342_v37 = vsel %vm1336_vm8, %v11197_v14, %v6272_v52  ;;  %v1341_v0 = vsel %vm1336_vm8, %v11198_v3, %v6271_v56  ;;  %v11209_v14 = vld [vmem:[#allocation20_spill] sm:$0xff] }
 0x1ba   :  { %v6280_v11 = vpop.permute.xlu0 %6279  ;;  %v6287_v9 = vunpack.i.h.bf16 %v6285_v50  ;;  %v6286_v6 = vunpack.i.l.bf16 %v6285_v50 }
 0x1bb   :  { %6569 = vrot.lane.b32.xlu1 %v11192_v40, %s11003_s27  ;;  %v6282_v24 = vunpack.i.h.bf16 %v6280_v11  ;;  %v6281_v27 = vunpack.i.l.bf16 %v6280_v11  ;;  %v11199_v11 = vpack.i.bf16 %v8668_v13, %v8645_v47 }
 0x1bc   :  { %v1364_v54 = vsel %vm11007_vm9, %v1341_v0, %v6286_v6  ;;  %v1365_v16 = vsel %vm11007_vm9, %v1342_v37, %v6287_v9 }
 0x1bd   :  { %6574 = vrot.lane.b32.xlu0 %v11193_v43, %s7352_s8  ;;  %v6295_v31 = vpop.permute.xlu1 %6294  ;;  %v1457_v38 = vsel %vm11004_vm10, %v6277_v10, %v6282_v24  ;;  %v1456_v30 = vsel %vm11004_vm10, %v6276_v7, %v6281_v27  ;;  %v11200_v24 = vld [vmem:[#allocation56_spill] sm:$0xff]  ;;  %v11201_v27 = vld [vmem:[#allocation55_spill] sm:$0xff] }
 0x1be   :  { %v6297_v35 = vunpack.i.h.bf16 %v6295_v31  ;;  %v6296_v23 = vunpack.i.l.bf16 %v6295_v31  ;;  %v11202_v43 = vpack.i.bf16 %v11200_v24, %v11201_v27 }
 0x1bf   :  { %v6290_v63 = vpop.permute.xlu0 %6289  ;;  %6579 = vrot.lane.b32.xlu1 %v11194_v32, %s7344_s29  ;;  %v11204_v32 = vld [vmem:[#allocation57_spill] sm:$0xff] }
 0x1c0   :  { %v6292_v51 = vunpack.i.h.bf16 %v6290_v63  ;;  %v6291_v25 = vunpack.i.l.bf16 %v6290_v63  ;;  %v1387_v8 = vsel %vm11006_vm11, %v1364_v54, %v6296_v23  ;;  %v1388_v34 = vsel %vm11006_vm11, %v1365_v16, %v6297_v35 }
 0x1c1   :  { %6589 = vrot.lane.b32.xlu0 %v11196_v18, %s7348_s1  ;;  %v6300_v29 = vpop.permute.xlu1 %6299  ;;  %v11208_v18 = vld [vmem:[#allocation19_spill] sm:$0xff] }
 0x1c2   :  { %v1479_v59 = vsel %vm1474_vm12, %v1456_v30, %v6291_v25  ;;  %v1480_v17 = vsel %vm1474_vm12, %v1457_v38, %v6292_v51  ;;  %v6302_v39 = vunpack.i.h.bf16 %v6300_v29  ;;  %v6301_v36 = vunpack.i.l.bf16 %v6300_v29  ;;  %v11203_v25 = vld [vmem:[#allocation58_spill] sm:$0xff]  ;;  %v11212_v29 = vld [vmem:[#allocation11_spill] sm:$0xff] }
 0x1c3   :  { %v6305_v1 = vpop.permute.xlu0 %6304  ;;  %6584 = vrot.lane.b32.xlu1 %v11199_v11, %s7346_s2  ;;  %v1502_v21 = vsel %vm1497_vm15, %v1479_v59, %v6266_v2  ;;  %v1503_v40 = vsel %vm1497_vm15, %v1480_v17, %v6267_v41  ;;  %v11205_v41 = vpack.i.bf16 %v11203_v25, %v11204_v32  ;;  %v11206_v2 = vpack.i.bf16 %v8717_v45, %v8695_v22  ;;  %v11211_v22 = vld [vmem:[#allocation12_spill] sm:$0xff] }
 0x1c4   :  { %v6307_v61 = vunpack.i.h.bf16 %v6305_v1  ;;  %v6306_v50 = vunpack.i.l.bf16 %v6305_v1  ;;  %v1410_v52 = vsel %vm11005_vm13, %v1387_v8, %v6301_v36  ;;  %v1411_v56 = vsel %vm11005_vm13, %v1388_v34, %v6302_v39 }
 0x1c5   :  { %6599 = vrot.lane.b32.xlu0 %v11202_v43, %s11012_s10  ;;  %v6310_v6 = vpop.permute.xlu1 %6309  ;;  %v1433_v47 = vsel %vm1428_vm14, %v1410_v52, %v6276_v7  ;;  %v1434_v63 = vsel %vm1428_vm14, %v1411_v56, %v6277_v10  ;;  %v11210_v37 = vpack.i.bf16 %v11208_v18, %v11209_v14  ;;  %v11214_v1 = vpack.i.bf16 %v8709_v12, %v8741_v57 }
 0x1c6   :  { %v1526_v31 = vsel %vm1520_vm0, %v1503_v40, %v6307_v61  ;;  %v1525_v9 = vsel %vm1520_vm0, %v1502_v21, %v6306_v50  ;;  %v1547_v51 = vpack.c.bf16 %v1434_v63, %v1433_v47  ;;  %v6312_v47 = vunpack.i.h.bf16 %v6310_v6 }
 0x1c7   :  { %v6320_v35 = vpop.permute.xlu0 %6319  ;;  %v1548_v23 = vpack.c.bf16 %v1526_v31, %v1525_v9  ;;  %6594 = vrot.lane.b32.xlu1 %v11205_v41, %s11002_s30  ;;  %v11215_v9 = vpack.i.bf16 %v8607_v44, %v8570_v49  ;;  %v6311_v63 = vunpack.i.l.bf16 %v6310_v6 }
 0x1c8   :  { %v6322_v8 = vunpack.i.h.bf16 %v6320_v35  ;;  %v6321_v34 = vunpack.i.l.bf16 %v6320_v35 }
 0x1c9   :  { %5553 = vmatprep.mubr.msk.bf16.mxu0 %vm1683_vm7, %v1548_v23  ;;  %6609 = vrot.lane.b32.xlu0 %v11206_v2, %s11010_s3  ;;  %v6315_v38 = vpop.permute.xlu1 %6314 }
 0x1ca   :  { %1769 = vmatmul.mubr.bf16.gmra.mrb[56].mxu0 %v1547_v51  ;;  %v6317_v30 = vunpack.i.h.bf16 %v6315_v38  ;;  %v6316_v10 = vunpack.i.l.bf16 %v6315_v38 }
 0x1cb   :  { %v6330_v7 = vpop.permute.xlu0 %6329  ;;  %6604 = vrot.lane.b32.xlu1 %v11207_v15, %s7350_s28 }
 0x1cc   :  { %v6332_v0 = vunpack.i.h.bf16 %v6330_v7  ;;  %v6331_v59 = vunpack.i.l.bf16 %v6330_v7  ;;  %v1344_v17 = vsel %vm1336_vm8, %v11211_v22, %v6317_v30  ;;  %v1343_v54 = vsel %vm1336_vm8, %v11212_v29, %v6316_v10 }
 0x1cd   :  { %6614 = vrot.lane.b32.xlu0 %v11210_v37, %s11003_s27  ;;  %v6325_v3 = vpop.permute.xlu1 %6324  ;;  %v11216_v10 = vpack.i.bf16 %v8772_v5, %v8767_v42 }
 0x1ce   :  { %v6327_v16 = vunpack.i.h.bf16 %v6325_v3  ;;  %v6326_v39 = vunpack.i.l.bf16 %v6325_v3  ;;  %v1366_v50 = vsel %vm11007_vm9, %v1343_v54, %v6331_v59  ;;  %v1367_v11 = vsel %vm11007_vm9, %v1344_v17, %v6332_v0 }
 0x1cf   :  { %v6340_v45 = vpop.permute.xlu0 %6339  ;;  %6619 = vrot.lane.b32.xlu1 %v11213_v28, %s7352_s8 }
 0x1d0   :  { %v6342_v48 = vunpack.i.h.bf16 %v6340_v45  ;;  %v6341_v36 = vunpack.i.l.bf16 %v6340_v45  ;;  %v1459_v13 = vsel %vm11004_vm10, %v6322_v8, %v6327_v16  ;;  %v1458_v27 = vsel %vm11004_vm10, %v6321_v34, %v6326_v39 }
 0x1d1   :  { %6624 = vrot.lane.b32.xlu0 %v11214_v1, %s7346_s2  ;;  %v6335_v61 = vpop.permute.xlu1 %6334  ;;  %v11218_v1 = vld [vmem:[#allocation14_spill] sm:$0xff] }
 0x1d2   :  { %v6337_v21 = vunpack.i.h.bf16 %v6335_v61  ;;  %v6336_v40 = vunpack.i.l.bf16 %v6335_v61  ;;  %v1389_v12 = vsel %vm11006_vm11, %v1366_v50, %v6341_v36  ;;  %v1390_v57 = vsel %vm11006_vm11, %v1367_v11, %v6342_v48 }
 0x1d3   :  { %v6345_v24 = vpop.permute.xlu0 %6344  ;;  %6629 = vrot.lane.b32.xlu1 %v8753_v62, %s7348_s1  ;;  %s11228_s1 = sld [smem:[#allocation63_spill]] }
 0x1d4   :  { %v6347_v43 = vunpack.i.h.bf16 %v6345_v24  ;;  %v6346_v52 = vunpack.i.l.bf16 %v6345_v24  ;;  %v1481_v56 = vsel %vm1474_vm12, %v1458_v27, %v6336_v40  ;;  %v1482_v31 = vsel %vm1474_vm12, %v1459_v13, %v6337_v21 }
 0x1d5   :  { %6649 = vrot.lane.b32.xlu0 %v11215_v9, %s7344_s29  ;;  %v6350_v35 = vpop.permute.xlu1 %6349  ;;  %v1504_v38 = vsel %vm1497_vm15, %v1481_v56, %v6311_v63  ;;  %v1505_v7 = vsel %vm1497_vm15, %v1482_v31, %v6312_v47  ;;  %s11231_s29 = sld [smem:[#allocation65_spill]] }
 0x1d6   :  { %v1412_v23 = vsel %vm11005_vm13, %v1389_v12, %v6346_v52  ;;  %v1413_v62 = vsel %vm11005_vm13, %v1390_v57, %v6347_v43  ;;  %v6352_v51 = vunpack.i.h.bf16 %v6350_v35  ;;  %v6351_v25 = vunpack.i.l.bf16 %v6350_v35 }
 0x1d7   :  { %v6355_v32 = vpop.permute.xlu0 %6354  ;;  %v1435_v41 = vsel %vm1428_vm14, %v1412_v23, %v6321_v34  ;;  %v1436_v2 = vsel %vm1428_vm14, %v1413_v62, %v6322_v8  ;;  %6634 = vrot.lane.b32.xlu1 %v8764_v53, %s11012_s10  ;;  %v11217_v53 = vpack.i.bf16 %v8787_v33, %v8782_v20  ;;  %v11219_v8 = vld [vmem:[#allocation13_spill] sm:$0xff]  ;;  %s11285_s10 = smov 4  }
 0x1d8   :  { %v1549_v44 = vpack.c.bf16 %v1436_v2, %v1435_v41  ;;  %v1528_v6 = vsel %vm1520_vm0, %v1505_v7, %v6352_v51  ;;  %v1527_v30 = vsel %vm1520_vm0, %v1504_v38, %v6351_v25  ;;  %v6357_v28 = vunpack.i.h.bf16 %v6355_v32 }
 0x1d9   :  { %6654 = vrot.lane.b32.xlu0 %v11216_v10, %s11002_s30  ;;  %v6365_v15 = vpop.permute.xlu1 %6364  ;;  %v1550_v18 = vpack.c.bf16 %v1528_v6, %v1527_v30  ;;  %v6356_v48 = vunpack.i.l.bf16 %v6355_v32  ;;  %s11284_s30 = smov 88  }
 0x1da   :  { %v6366_v22 = vunpack.i.l.bf16 %v6365_v15 }
 0x1db   :  { %v6360_v14 = vpop.permute.xlu0 %6359  ;;  %5554 = vmatprep.mubr.msk.bf16.mxu0 %vm1683_vm7, %v1550_v18  ;;  %6639 = vrot.lane.b32.xlu1 %v8793_v4, %s11010_s3  ;;  %v6367_v4 = vunpack.i.h.bf16 %v6365_v15  ;;  %v11220_v18 = vld [vmem:[#allocation16_spill] sm:$0xff]  ;;  %s7367_s3 = smov 60  }
 0x1dc   :  { %1777 = vmatmul.mubr.bf16.gmra.mrb[60].mxu0 %v1549_v44  ;;  %v6362_v0 = vunpack.i.h.bf16 %v6360_v14  ;;  %v6361_v59 = vunpack.i.l.bf16 %v6360_v14 }
 0x1dd   :  { %6659 = vrot.lane.b32.xlu0 %v11217_v53, %s7350_s28  ;;  %v6375_v37 = vpop.permute.xlu1 %6374  ;;  %v11221_v53 = vld [vmem:[#allocation15_spill] sm:$0xff]  ;;  %s7360_s28 = smov 100  }
 0x1de   :  { %v6377_v17 = vunpack.i.h.bf16 %v6375_v37  ;;  %v6376_v29 = vunpack.i.l.bf16 %v6375_v37  ;;  %v1345_v34 = vsel %vm1336_vm8, %v11219_v8, %v6361_v59 }
 0x1df   :  { %v6370_v3 = vpop.permute.xlu0 %6369  ;;  %6644 = vrot.lane.b32.xlu1 %v8806_v26, %s11003_s27  ;;  %s11244_s27 = sld [smem:[#allocation68_spill]] }
 0x1e0   :  { %v6372_v5 = vunpack.i.h.bf16 %v6370_v3  ;;  %v6371_v42 = vunpack.i.l.bf16 %v6370_v3  ;;  %v1368_v21 = vsel %vm11007_vm9, %v1345_v34, %v6376_v29 }
 0x1e1   :  { %6664 = vrot.lane.b32.xlu0 %v8800_v19, %s7352_s8  ;;  %v6385_v45 = vpop.permute.xlu1 %6384  ;;  %v1346_v19 = vsel %vm1336_vm8, %v11218_v1, %v6362_v0  ;;  %s11243_s8 = sld [smem:[#allocation67_spill]] }
 0x1e2   :  { %v6387_v20 = vunpack.i.h.bf16 %v6385_v45  ;;  %v6386_v33 = vunpack.i.l.bf16 %v6385_v45  ;;  %v1461_v26 = vsel %vm11004_vm10, %v6367_v4, %v6372_v5  ;;  %v1460_v36 = vsel %vm11004_vm10, %v6366_v22, %v6371_v42 }
 0x1e3   :  { %v6380_v54 = vpop.permute.xlu0 %6379  ;;  %v1369_v40 = vsel %vm11007_vm9, %v1346_v19, %v6377_v17 }
 0x1e4   :  { %v6382_v16 = vunpack.i.h.bf16 %v6380_v54  ;;  %v6381_v39 = vunpack.i.l.bf16 %v6380_v54  ;;  %v1391_v43 = vsel %vm11006_vm11, %v1368_v21, %v6386_v33  ;;  %v1392_v52 = vsel %vm11006_vm11, %v1369_v40, %v6387_v20 }
 0x1e5   :  { %v6390_v11 = vpop.permute.xlu1 %6389 }
 0x1e6   :  { %v1483_v61 = vsel %vm1474_vm12, %v1460_v36, %v6381_v39  ;;  %v1484_v50 = vsel %vm1474_vm12, %v1461_v26, %v6382_v16  ;;  %v6392_v24 = vunpack.i.h.bf16 %v6390_v11  ;;  %v6391_v13 = vunpack.i.l.bf16 %v6390_v11 }
 0x1e7   :  { %v6395_v27 = vpop.permute.xlu0 %6394  ;;  %v1506_v56 = vsel %vm1497_vm15, %v1483_v61, %v6356_v48  ;;  %v1507_v31 = vsel %vm1497_vm15, %v1484_v50, %v6357_v28 }
 0x1e8   :  { %v6397_v12 = vunpack.i.h.bf16 %v6395_v27  ;;  %v6396_v57 = vunpack.i.l.bf16 %v6395_v27  ;;  %v1414_v9 = vsel %vm11005_vm13, %v1391_v43, %v6391_v13  ;;  %v1415_v47 = vsel %vm11005_vm13, %v1392_v52, %v6392_v24 }
 0x1e9   :  { %v6400_v23 = vpop.permute.xlu1 %6399  ;;  %v1437_v62 = vsel %vm1428_vm14, %v1414_v9, %v6366_v22  ;;  %v1438_v51 = vsel %vm1428_vm14, %v1415_v47, %v6367_v4 }
 0x1ea   :  { %v1530_v63 = vsel %vm1520_vm0, %v1507_v31, %v6397_v12  ;;  %v1529_v35 = vsel %vm1520_vm0, %v1506_v56, %v6396_v57  ;;  %v1551_v41 = vpack.c.bf16 %v1438_v51, %v1437_v62  ;;  %v6402_v19 = vunpack.i.h.bf16 %v6400_v23 }
 0x1eb   :  { %v6410_v25 = vpop.permute.xlu0 %6409  ;;  %v1552_v32 = vpack.c.bf16 %v1530_v63, %v1529_v35  ;;  %v6401_v8 = vunpack.i.l.bf16 %v6400_v23 }
 0x1ec   :  { %v6412_v59 = vunpack.i.h.bf16 %v6410_v25  ;;  %v6411_v45 = vunpack.i.l.bf16 %v6410_v25 }
 0x1ed   :  { %5555 = vmatprep.mubr.msk.bf16.mxu0 %vm1683_vm7, %v1552_v32  ;;  %v6405_v2 = vpop.permute.xlu1 %6404 }
 0x1ee   :  { %1785 = vmatmul.mubr.bf16.gmra.mrb[64].mxu0 %v1551_v41  ;;  %v6407_v7 = vunpack.i.h.bf16 %v6405_v2  ;;  %v6406_v44 = vunpack.i.l.bf16 %v6405_v2 }
 0x1ef   :  { %v6420_v38 = vpop.permute.xlu0 %6419 }
 0x1f0   :  { %v6422_v30 = vunpack.i.h.bf16 %v6420_v38  ;;  %v6421_v10 = vunpack.i.l.bf16 %v6420_v38  ;;  %v1348_v14 = vsel %vm1336_vm8, %v11220_v18, %v6407_v7  ;;  %v1347_v37 = vsel %vm1336_vm8, %v11221_v53, %v6406_v44 }
 0x1f1   :  { %v6415_v6 = vpop.permute.xlu1 %6414 }
 0x1f2   :  { %v6417_v3 = vunpack.i.h.bf16 %v6415_v6  ;;  %v6416_v5 = vunpack.i.l.bf16 %v6415_v6  ;;  %v1370_v22 = vsel %vm11007_vm9, %v1347_v37, %v6421_v10  ;;  %v1371_v17 = vsel %vm11007_vm9, %v1348_v14, %v6422_v30  ;;  %v11222_v37 = vld [vmem:[#allocation18_spill] sm:$0xff] }
 0x1f3   :  { %v6430_v15 = vpop.permute.xlu0 %6429 }
 0x1f4   :  { %v6432_v42 = vunpack.i.h.bf16 %v6430_v15  ;;  %v6431_v0 = vunpack.i.l.bf16 %v6430_v15  ;;  %v1463_v33 = vsel %vm11004_vm10, %v6412_v59, %v6417_v3  ;;  %v1462_v16 = vsel %vm11004_vm10, %v6411_v45, %v6416_v5  ;;  %v11223_v5 = vld [vmem:[#allocation17_spill] sm:$0xff] }
 0x1f5   :  { %v6425_v4 = vpop.permute.xlu1 %6424 }
 0x1f6   :  { %v6427_v29 = vunpack.i.h.bf16 %v6425_v4  ;;  %v6426_v54 = vunpack.i.l.bf16 %v6425_v4  ;;  %v1393_v48 = vsel %vm11006_vm11, %v1370_v22, %v6431_v0  ;;  %v1394_v26 = vsel %vm11006_vm11, %v1371_v17, %v6432_v42 }
 0x1f7   :  { %v6435_v20 = vpop.permute.xlu0 %6434 }
 0x1f8   :  { %v6437_v39 = vunpack.i.h.bf16 %v6435_v20  ;;  %v6436_v28 = vunpack.i.l.bf16 %v6435_v20  ;;  %v1485_v36 = vsel %vm1474_vm12, %v1462_v16, %v6426_v54  ;;  %v1486_v1 = vsel %vm1474_vm12, %v1463_v33, %v6427_v29 }
 0x1f9   :  { %v6440_v34 = vpop.permute.xlu1 %6439  ;;  %v1508_v27 = vsel %vm1497_vm15, %v1485_v36, %v6401_v8  ;;  %v1509_v43 = vsel %vm1497_vm15, %v1486_v1, %v6402_v19 }
 0x1fa   :  { %v1416_v61 = vsel %vm11005_vm13, %v1393_v48, %v6436_v28  ;;  %v1417_v50 = vsel %vm11005_vm13, %v1394_v26, %v6437_v39  ;;  %v6442_v11 = vunpack.i.h.bf16 %v6440_v34  ;;  %v6441_v21 = vunpack.i.l.bf16 %v6440_v34 }
 0x1fb   :  { %v6445_v40 = vpop.permute.xlu0 %6444  ;;  %v1439_v24 = vsel %vm1428_vm14, %v1416_v61, %v6411_v45  ;;  %v1440_v13 = vsel %vm1428_vm14, %v1417_v50, %v6412_v59 }
 0x1fc   :  { %v1553_v52 = vpack.c.bf16 %v1440_v13, %v1439_v24  ;;  %v1532_v12 = vsel %vm1520_vm0, %v1509_v43, %v6442_v11  ;;  %v1531_v57 = vsel %vm1520_vm0, %v1508_v27, %v6441_v21  ;;  %v6447_v15 = vunpack.i.h.bf16 %v6445_v40 }
 0x1fd   :  { %v6455_v56 = vpop.permute.xlu1 %6454  ;;  %v1554_v31 = vpack.c.bf16 %v1532_v12, %v1531_v57  ;;  %v6446_v18 = vunpack.i.l.bf16 %v6445_v40 }
 0x1fe   :  { %v6457_v32 = vunpack.i.h.bf16 %v6455_v56  ;;  %v6456_v41 = vunpack.i.l.bf16 %v6455_v56  ;;  %v11224_v56 = vld [vmem:[#allocation27_spill] sm:$0xff] }
 0x1ff   :  { %v6450_v9 = vpop.permute.xlu0 %6449  ;;  %5556 = vmatprep.mubr.msk.bf16.mxu0 %vm1683_vm7, %v1554_v31 }
 0x200   :  { %1793 = vmatmul.mubr.bf16.gmra.mrb[68].mxu0 %v1553_v52  ;;  %v6452_v62 = vunpack.i.h.bf16 %v6450_v9  ;;  %v6451_v51 = vunpack.i.l.bf16 %v6450_v9  ;;  %v11225_v9 = vld [vmem:[#allocation23_spill] sm:$0xff] }
 0x201   :  { %v6465_v47 = vpop.permute.xlu1 %6464 }
 0x202   :  { %v6467_v2 = vunpack.i.h.bf16 %v6465_v47  ;;  %v6466_v38 = vunpack.i.l.bf16 %v6465_v47  ;;  %v1350_v3 = vsel %vm1336_vm8, %v11222_v37, %v6452_v62  ;;  %v1349_v42 = vsel %vm1336_vm8, %v11223_v5, %v6451_v51 }
 0x203   :  { %v6460_v63 = vpop.permute.xlu0 %6459 }
 0x204   :  { %v6462_v35 = vunpack.i.h.bf16 %v6460_v63  ;;  %v6461_v23 = vunpack.i.l.bf16 %v6460_v63  ;;  %v1372_v4 = vsel %vm11007_vm9, %v1349_v42, %v6466_v38  ;;  %v1373_v22 = vsel %vm11007_vm9, %v1350_v3, %v6467_v2 }
 0x205   :  { %v6475_v25 = vpop.permute.xlu1 %6474 }
 0x206   :  { %v6477_v44 = vunpack.i.h.bf16 %v6475_v25  ;;  %v6476_v6 = vunpack.i.l.bf16 %v6475_v25  ;;  %v1465_v14 = vsel %vm11004_vm10, %v6457_v32, %v6462_v35  ;;  %v1464_v53 = vsel %vm11004_vm10, %v6456_v41, %v6461_v23 }
 0x207   :  { %v6470_v7 = vpop.permute.xlu0 %6469 }
 0x208   :  { %v6472_v30 = vunpack.i.h.bf16 %v6470_v7  ;;  %v6471_v10 = vunpack.i.l.bf16 %v6470_v7  ;;  %v1395_v20 = vsel %vm11006_vm11, %v1372_v4, %v6476_v6  ;;  %v1396_v33 = vsel %vm11006_vm11, %v1373_v22, %v6477_v44 }
 0x209   :  { %v6480_v45 = vpop.permute.xlu1 %6479 }
 0x20a   :  { %v1487_v0 = vsel %vm1474_vm12, %v1464_v53, %v6471_v10  ;;  %v1488_v59 = vsel %vm1474_vm12, %v1465_v14, %v6472_v30  ;;  %v6482_v17 = vunpack.i.h.bf16 %v6480_v45  ;;  %v6481_v29 = vunpack.i.l.bf16 %v6480_v45 }
 0x20b   :  { %v6485_v54 = vpop.permute.xlu0 %6484  ;;  %v1510_v28 = vsel %vm1497_vm15, %v1487_v0, %v6446_v18  ;;  %v1511_v48 = vsel %vm1497_vm15, %v1488_v59, %v6447_v15 }
 0x20c   :  { %v6487_v16 = vunpack.i.h.bf16 %v6485_v54  ;;  %v6486_v39 = vunpack.i.l.bf16 %v6485_v54  ;;  %v1418_v26 = vsel %vm11005_vm13, %v1395_v20, %v6481_v29  ;;  %v1419_v36 = vsel %vm11005_vm13, %v1396_v33, %v6482_v17 }
 0x20d   :  { %v6490_v8 = vpop.permute.xlu1 %6489  ;;  %v1441_v34 = vsel %vm1428_vm14, %v1418_v26, %v6456_v41  ;;  %v1442_v61 = vsel %vm1428_vm14, %v1419_v36, %v6457_v32 }
 0x20e   :  { %v1534_v1 = vsel %vm1520_vm0, %v1511_v48, %v6487_v16  ;;  %v1533_v19 = vsel %vm1520_vm0, %v1510_v28, %v6486_v39  ;;  %v1555_v21 = vpack.c.bf16 %v1442_v61, %v1441_v34  ;;  %v6492_v3 = vunpack.i.h.bf16 %v6490_v8 }
 0x20f   :  { %v6500_v50 = vpop.permute.xlu0 %6499  ;;  %v1556_v11 = vpack.c.bf16 %v1534_v1, %v1533_v19  ;;  %v6491_v5 = vunpack.i.l.bf16 %v6490_v8 }
 0x210   :  { %v6502_v51 = vunpack.i.h.bf16 %v6500_v50  ;;  %v6501_v25 = vunpack.i.l.bf16 %v6500_v50 }
 0x211   :  { %5557 = vmatprep.mubr.msk.bf16.mxu0 %vm1683_vm7, %v1556_v11  ;;  %v6495_v40 = vpop.permute.xlu1 %6494 }
 0x212   :  { %1801 = vmatmul.mubr.bf16.gmra.mrb[72].mxu0 %v1555_v21  ;;  %v6497_v13 = vunpack.i.h.bf16 %v6495_v40  ;;  %v6496_v27 = vunpack.i.l.bf16 %v6495_v40 }
 0x213   :  { %v6510_v24 = vpop.permute.xlu0 %6509 }
 0x214   :  { %v6512_v52 = vunpack.i.h.bf16 %v6510_v24  ;;  %v6511_v12 = vunpack.i.l.bf16 %v6510_v24  ;;  %v1352_v31 = vsel %vm1336_vm8, %v11224_v56, %v6497_v13  ;;  %v1351_v47 = vsel %vm1336_vm8, %v11225_v9, %v6496_v27 }
 0x215   :  { %v6505_v43 = vpop.permute.xlu1 %6504 }
 0x216   :  { %v6507_v63 = vunpack.i.h.bf16 %v6505_v43  ;;  %v6506_v35 = vunpack.i.l.bf16 %v6505_v43  ;;  %v1374_v41 = vsel %vm11007_vm9, %v1351_v47, %v6511_v12  ;;  %v1375_v2 = vsel %vm11007_vm9, %v1352_v31, %v6512_v52 }
 0x217   :  { %v6520_v57 = vpop.permute.xlu0 %6519 }
 0x218   :  { %v6522_v23 = vunpack.i.h.bf16 %v6520_v57  ;;  %v6521_v62 = vunpack.i.l.bf16 %v6520_v57  ;;  %v1467_v6 = vsel %vm11004_vm10, %v6502_v51, %v6507_v63  ;;  %v1466_v30 = vsel %vm11004_vm10, %v6501_v25, %v6506_v35  ;;  %v11226_v63 = vld [vmem:[#allocation33_spill] sm:$0xff] }
 0x219   :  { %v6515_v32 = vpop.permute.xlu1 %6514 }
 0x21a   :  { %v6517_v38 = vunpack.i.h.bf16 %v6515_v32  ;;  %v6516_v7 = vunpack.i.l.bf16 %v6515_v32  ;;  %v1397_v18 = vsel %vm11006_vm11, %v1374_v41, %v6521_v62  ;;  %v1398_v14 = vsel %vm11006_vm11, %v1375_v2, %v6522_v23 }
 0x21b   :  { %v6525_v44 = vpop.permute.xlu0 %6524 }
 0x21c   :  { %v6527_v10 = vunpack.i.h.bf16 %v6525_v44  ;;  %v6526_v15 = vunpack.i.l.bf16 %v6525_v44  ;;  %v1489_v53 = vsel %vm1474_vm12, %v1466_v30, %v6516_v7  ;;  %v1490_v37 = vsel %vm1474_vm12, %v1467_v6, %v6517_v38 }
 0x21d   :  { %v6530_v59 = vpop.permute.xlu1 %6529  ;;  %v1512_v54 = vsel %vm1497_vm15, %v1489_v53, %v6491_v5  ;;  %v1513_v20 = vsel %vm1497_vm15, %v1490_v37, %v6492_v3 }
 0x21e   :  { %v1420_v42 = vsel %vm11005_vm13, %v1397_v18, %v6526_v15  ;;  %v1421_v0 = vsel %vm11005_vm13, %v1398_v14, %v6527_v10  ;;  %v6532_v45 = vunpack.i.h.bf16 %v6530_v59  ;;  %v6531_v4 = vunpack.i.l.bf16 %v6530_v59 }
 0x21f   :  { %v6535_v22 = vpop.permute.xlu0 %6534  ;;  %v1443_v17 = vsel %vm1428_vm14, %v1420_v42, %v6501_v25  ;;  %v1444_v29 = vsel %vm1428_vm14, %v1421_v0, %v6502_v51 }
 0x220   :  { %v1557_v33 = vpack.c.bf16 %v1444_v29, %v1443_v17  ;;  %v1536_v16 = vsel %vm1520_vm0, %v1513_v20, %v6532_v45  ;;  %v1535_v39 = vsel %vm1520_vm0, %v1512_v54, %v6531_v4  ;;  %v6537_v57 = vunpack.i.h.bf16 %v6535_v22 }
 0x221   :  { %v1558_v28 = vpack.c.bf16 %v1536_v16, %v1535_v39  ;;  %v6545_v48 = vpop.permute.xlu1 %6544  ;;  %v6536_v56 = vunpack.i.l.bf16 %v6535_v22 }
 0x222   :  { %v6547_v11 = vunpack.i.h.bf16 %v6545_v48  ;;  %v6546_v21 = vunpack.i.l.bf16 %v6545_v48 }
 0x223   :  { %v6540_v26 = vpop.permute.xlu0 %6539  ;;  %5558 = vmatprep.mubr.msk.bf16.mxu0 %vm1683_vm7, %v1558_v28 }
 0x224   :  { %1809 = vmatmul.mubr.bf16.gmra.mrb[76].mxu0 %v1557_v33  ;;  %v6542_v34 = vunpack.i.h.bf16 %v6540_v26  ;;  %v6541_v61 = vunpack.i.l.bf16 %v6540_v26 }
 0x225   :  { %v6555_v36 = vpop.permute.xlu1 %6554 }
 0x226   :  { %v6557_v40 = vunpack.i.h.bf16 %v6555_v36  ;;  %v6556_v24 = vunpack.i.l.bf16 %v6555_v36  ;;  %v1354_v47 = vsel %vm1336_vm8, %v8403_v58, %v6542_v34  ;;  %v1353_v35 = vsel %vm1336_vm8, %v11226_v63, %v6541_v61 }
 0x227   :  { %v6550_v1 = vpop.permute.xlu0 %6549 }
 0x228   :  { %v6552_v19 = vunpack.i.h.bf16 %v6550_v1  ;;  %v6551_v8 = vunpack.i.l.bf16 %v6550_v1  ;;  %v1376_v25 = vsel %vm11007_vm9, %v1353_v35, %v6556_v24  ;;  %v1377_v32 = vsel %vm11007_vm9, %v1354_v47, %v6557_v40 }
 0x229   :  { %v6565_v50 = vpop.permute.xlu1 %6564 }
 0x22a   :  { %v6567_v27 = vunpack.i.h.bf16 %v6565_v50  ;;  %v6566_v43 = vunpack.i.l.bf16 %v6565_v50  ;;  %v1469_v31 = vsel %vm11004_vm10, %v6547_v11, %v6552_v19  ;;  %v1468_v9 = vsel %vm11004_vm10, %v6546_v21, %v6551_v8 }
 0x22b   :  { %v6560_v13 = vpop.permute.xlu0 %6559 }
 0x22c   :  { %v6562_v52 = vunpack.i.h.bf16 %v6560_v13  ;;  %v6561_v12 = vunpack.i.l.bf16 %v6560_v13  ;;  %v1399_v7 = vsel %vm11006_vm11, %v1376_v25, %v6566_v43  ;;  %v1400_v44 = vsel %vm11006_vm11, %v1377_v32, %v6567_v27 }
 0x22d   :  { %v6570_v51 = vpop.permute.xlu1 %6569 }
 0x22e   :  { %v1491_v23 = vsel %vm1474_vm12, %v1468_v9, %v6561_v12  ;;  %v1492_v62 = vsel %vm1474_vm12, %v1469_v31, %v6562_v52  ;;  %v6572_v41 = vunpack.i.h.bf16 %v6570_v51  ;;  %v6571_v2 = vunpack.i.l.bf16 %v6570_v51 }
 0x22f   :  { %v6575_v38 = vpop.permute.xlu0 %6574  ;;  %v1514_v15 = vsel %vm1497_vm15, %v1491_v23, %v6536_v56  ;;  %v1515_v18 = vsel %vm1497_vm15, %v1492_v62, %v6537_v57 }
 0x230   :  { %v6577_v58 = vunpack.i.h.bf16 %v6575_v38  ;;  %v6576_v6 = vunpack.i.l.bf16 %v6575_v38  ;;  %v1422_v30 = vsel %vm11005_vm13, %v1399_v7, %v6571_v2  ;;  %v1423_v10 = vsel %vm11005_vm13, %v1400_v44, %v6572_v41 }
 0x231   :  { %v6580_v37 = vpop.permute.xlu1 %6579  ;;  %v1445_v3 = vsel %vm1428_vm14, %v1422_v30, %v6546_v21  ;;  %v1446_v5 = vsel %vm1428_vm14, %v1423_v10, %v6547_v11 }
 0x232   :  { %v1538_v14 = vsel %vm1520_vm0, %v1515_v18, %v6577_v58  ;;  %v1537_v53 = vsel %vm1520_vm0, %v1514_v15, %v6576_v6  ;;  %v1559_v59 = vpack.c.bf16 %v1446_v5, %v1445_v3  ;;  %v6582_v12 = vunpack.i.h.bf16 %v6580_v37 }
 0x233   :  { %v1560_v42 = vpack.c.bf16 %v1538_v14, %v1537_v53  ;;  %v6590_v0 = vpop.permute.xlu0 %6589  ;;  %v6581_v57 = vunpack.i.l.bf16 %v6580_v37 }
 0x234   :  { %v6592_v1 = vunpack.i.h.bf16 %v6590_v0  ;;  %v6591_v19 = vunpack.i.l.bf16 %v6590_v0 }
 0x235   :  { %5559 = vmatprep.mubr.msk.bf16.mxu0 %vm1683_vm7, %v1560_v42  ;;  %v6585_v45 = vpop.permute.xlu1 %6584 }
 0x236   :  { %1817 = vmatmul.mubr.bf16.gmra.mrb[80].mxu0 %v1559_v59  ;;  %v6587_v22 = vunpack.i.h.bf16 %v6585_v45  ;;  %v6586_v17 = vunpack.i.l.bf16 %v6585_v45 }
 0x237   :  { %v6600_v4 = vpop.permute.xlu0 %6599 }
 0x238   :  { %v6602_v54 = vunpack.i.h.bf16 %v6600_v4  ;;  %v6601_v20 = vunpack.i.l.bf16 %v6600_v4  ;;  %v1356_v16 = vsel %vm1336_vm8, %v8487_v46, %v6587_v22  ;;  %v1355_v39 = vsel %vm1336_vm8, %v8444_v60, %v6586_v17 }
 0x239   :  { %v6595_v29 = vpop.permute.xlu1 %6594 }
 0x23a   :  { %v6597_v28 = vunpack.i.h.bf16 %v6595_v29  ;;  %v6596_v48 = vunpack.i.l.bf16 %v6595_v29  ;;  %v1378_v34 = vsel %vm11007_vm9, %v1355_v39, %v6601_v20  ;;  %v1379_v61 = vsel %vm11007_vm9, %v1356_v16, %v6602_v54 }
 0x23b   :  { %v6610_v33 = vpop.permute.xlu0 %6609 }
 0x23c   :  { %v6612_v26 = vunpack.i.h.bf16 %v6610_v33  ;;  %v6611_v36 = vunpack.i.l.bf16 %v6610_v33  ;;  %v1471_v40 = vsel %vm11004_vm10, %v6592_v1, %v6597_v28  ;;  %v1470_v46 = vsel %vm11004_vm10, %v6591_v19, %v6596_v48 }
 0x23d   :  { %v6605_v8 = vpop.permute.xlu1 %6604 }
 0x23e   :  { %v6607_v50 = vunpack.i.h.bf16 %v6605_v8  ;;  %v6606_v11 = vunpack.i.l.bf16 %v6605_v8  ;;  %v1401_v13 = vsel %vm11006_vm11, %v1378_v34, %v6611_v36  ;;  %v1402_v27 = vsel %vm11006_vm11, %v1379_v61, %v6612_v26 }
 0x23f   :  { %v6615_v21 = vpop.permute.xlu0 %6614 }
 0x240   :  { %v6617_v24 = vunpack.i.h.bf16 %v6615_v21  ;;  %v6616_v60 = vunpack.i.l.bf16 %v6615_v21  ;;  %v1493_v43 = vsel %vm1474_vm12, %v1470_v46, %v6606_v11  ;;  %v1494_v52 = vsel %vm1474_vm12, %v1471_v40, %v6607_v50 }
 0x241   :  { %v6620_v9 = vpop.permute.xlu1 %6619  ;;  %v1516_v51 = vsel %vm1497_vm15, %v1493_v43, %v6581_v57  ;;  %v1517_v25 = vsel %vm1497_vm15, %v1494_v52, %v6582_v12  ;;  %v9232_v43 = vld [vmem:[%s11227_s9] ss:$0 sm:$0xff]  ;;  %s11234_s9 = sld [smem:[#allocation66_spill]] }
 0x242   :  { %v1424_v56 = vsel %vm11005_vm13, %v1401_v13, %v6616_v60  ;;  %v1425_v31 = vsel %vm11005_vm13, %v1402_v27, %v6617_v24  ;;  %v6622_v47 = vunpack.i.h.bf16 %v6620_v9  ;;  %v6621_v63 = vunpack.i.l.bf16 %v6620_v9 }
 0x243   :  { %v6625_v35 = vpop.permute.xlu0 %6624  ;;  %v1447_v23 = vsel %vm1428_vm14, %v1424_v56, %v6591_v19  ;;  %v1448_v62 = vsel %vm1428_vm14, %v1425_v31, %v6592_v1 }
 0x244   :  { %v1561_v32 = vpack.c.bf16 %v1448_v62, %v1447_v23  ;;  %v1540_v41 = vsel %vm1520_vm0, %v1517_v25, %v6622_v47  ;;  %v1539_v2 = vsel %vm1520_vm0, %v1516_v51, %v6621_v63  ;;  %v6627_v30 = vunpack.i.h.bf16 %v6625_v35 }
 0x245   :  { %v1562_v38 = vpack.c.bf16 %v1540_v41, %v1539_v2  ;;  %v6630_v7 = vpop.permute.xlu1 %6629  ;;  %v6626_v10 = vunpack.i.l.bf16 %v6625_v35 }
 0x246   :  { %v6632_v53 = vunpack.i.h.bf16 %v6630_v7  ;;  %v6631_v37 = vunpack.i.l.bf16 %v6630_v7  ;;  %v1358_v22 = vsel %vm1336_vm8, %v8570_v49, %v6627_v30 }
 0x247   :  { %v6650_v44 = vpop.permute.xlu0 %6649  ;;  %5560 = vmatprep.mubr.msk.bf16.mxu0 %vm1683_vm7, %v1562_v38  ;;  %v1357_v17 = vsel %vm1336_vm8, %v8532_v55, %v6626_v10 }
 0x248   :  { %1825 = vmatmul.mubr.bf16.gmra.mrb[84].mxu0 %v1561_v32  ;;  %v6652_v20 = vunpack.i.h.bf16 %v6650_v44  ;;  %v6651_v33 = vunpack.i.l.bf16 %v6650_v44 }
 0x249   :  { %v6635_v58 = vpop.permute.xlu1 %6634 }
 0x24a   :  { %v6637_v3 = vunpack.i.h.bf16 %v6635_v58  ;;  %v6636_v5 = vunpack.i.l.bf16 %v6635_v58 }
 0x24b   :  { %v6655_v6 = vpop.permute.xlu0 %6654 }
 0x24c   :  { %v6657_v15 = vunpack.i.h.bf16 %v6655_v6  ;;  %v6656_v18 = vunpack.i.l.bf16 %v6655_v6  ;;  %v1381_v48 = vsel %vm11007_vm9, %v1358_v22, %v6637_v3  ;;  %v1380_v26 = vsel %vm11007_vm9, %v1357_v17, %v6636_v5 }
 0x24d   :  { %v6640_v14 = vpop.permute.xlu1 %6639  ;;  %vm2801_vm9 = vcmask 793600  }
 0x24e   :  { %v6642_v0 = vunpack.i.h.bf16 %v6640_v14  ;;  %v6641_v59 = vunpack.i.l.bf16 %v6640_v14  ;;  %v1473_v29 = vsel %vm11004_vm10, %v6632_v53, %v6657_v15  ;;  %v1472_v54 = vsel %vm11004_vm10, %v6631_v37, %v6656_v18 }
 0x24f   :  { %v6660_v42 = vpop.permute.xlu0 %6659  ;;  %vm2783_vm10 = vcmask 384000  }
 0x250   :  { %v6662_v45 = vunpack.i.h.bf16 %v6660_v42  ;;  %v6661_v4 = vunpack.i.l.bf16 %v6660_v42  ;;  %v1403_v55 = vsel %vm11006_vm11, %v1380_v26, %v6641_v59  ;;  %v1404_v19 = vsel %vm11006_vm11, %v1381_v48, %v6642_v0 }
 0x251   :  { %v6645_v28 = vpop.permute.xlu1 %6644  ;;  %vm2792_vm11 = vcmask 588800  }
 0x252   :  { %v1495_v16 = vsel %vm1474_vm12, %v1472_v54, %v6661_v4  ;;  %v1496_v39 = vsel %vm1474_vm12, %v1473_v29, %v6662_v45  ;;  %v6647_v36 = vunpack.i.h.bf16 %v6645_v28  ;;  %v6646_v49 = vunpack.i.l.bf16 %v6645_v28 }
 0x253   :  { %v6665_v1 = vpop.permute.xlu0 %6664  ;;  %v1518_v11 = vsel %vm1497_vm15, %v1495_v16, %v6651_v33  ;;  %v1519_v21 = vsel %vm1497_vm15, %v1496_v39, %v6652_v20 }
 0x254   :  { %v6667_v8 = vunpack.i.h.bf16 %v6665_v1  ;;  %v6666_v34 = vunpack.i.l.bf16 %v6665_v1  ;;  %v1426_v61 = vsel %vm11005_vm13, %v1403_v55, %v6646_v49  ;;  %v1427_v50 = vsel %vm11005_vm13, %v1404_v19, %v6647_v36 }
 0x255   :  { %v1449_v24 = vsel %vm1428_vm14, %v1426_v61, %v6631_v37  ;;  %v1450_v60 = vsel %vm1428_vm14, %v1427_v50, %v6632_v53  ;;  %v9247_v50 = vld [vmem:[%s11228_s1] ss:$0 sm:$0xff]  ;;  %s7356_s1 = smov 25   ;;  %vm2757_vm13 = vcmask 818176  }
 0x256   :  { %v1541_v40 = vsel %vm1520_vm0, %v1518_v11, %v6666_v34  ;;  %v1542_v46 = vsel %vm1520_vm0, %v1519_v21, %v6667_v8  ;;  %v1563_v27 = vpack.c.bf16 %v1450_v60, %v1449_v24 }
 0x257   :  { %v1564_v13 = vpack.c.bf16 %v1542_v46, %v1541_v40 }
 0x259   :  { %5561 = vmatprep.mubr.msk.bf16.mxu0 %vm1683_vm7, %v1564_v13 }
 0x25a   :  { %1833 = vmatmul.mubr.bf16.gmra.mrb[88].mxu0 %v1563_v27 }
 0x278   :  { %v1754_v52 = vpop.f32.mrb[48].mxu0 }
 0x279   :  { %v1755_v12 = vadd.f32 %v9232_v43, %v1754_v52  ;;  %v1756_v57 = vpop.f32.mrb[49].mxu0  ;;  %v9255_v52 = vld [vmem:[%s11229_s4] ss:$0 sm:$0xff] }
 0x27a   :  { %v1757_v56 = vpop.f32.mrb[50].mxu0 }
 0x27b   :  { %v1863_v31 = vmin.f32 %v1755_v12, 0.0  ;;  %v1758_v9 = vadd.f32 %v9232_v43, %v1757_v56  ;;  %v1759_v47 = vpop.f32.mrb[51].mxu0  ;;  %vm1841_vm7 = vcmp.gt.f32.partialorder %v1755_v12, 0.0 }
 0x27d   :  { %v1885_v63 = vmul.f32 1.442695, %v1863_v31  ;;  %v1864_v35 = vmin.f32 %v1758_v9, 0.0  ;;  %vm1842_vm12 = vcmp.gt.f32.partialorder %v1758_v9, 0.0 }
 0x27f   :  { %7233 = vpow2.f32 %v1885_v63  ;;  %v1887_v23 = vmul.f32 1.442695, %v1864_v35  ;;  %v11230_v35 = vmov 0.0|0.0  }
 0x281   :  { %7235 = vpow2.f32 %v1887_v23 }
 0x289   :  { %v7234_v62 = vpop.eup %7233 }
 0x28a   :  { %v5562_v51 = vadd.f32 -1.0, %v7234_v62 }
 0x28b   :  { %v7236_v25 = vpop.eup %7235  ;;  %v1762_v32 = vpop.f32.mrb[52].mxu0 }
 0x28c   :  { %v1951_v41 = vsel %vm1841_vm7, %v1755_v12, %v5562_v51  ;;  %v5563_v2 = vadd.f32 -1.0, %v7236_v25  ;;  %v1763_v38 = vadd.f32 %v9232_v43, %v1762_v32  ;;  %v1764_v7 = vpop.f32.mrb[53].mxu0 }
 0x28d   :  { %v1765_v44 = vpop.f32.mrb[54].mxu0  ;;  %v1995_v15 = vrot.slane %v1951_v41, 1  ;;  %v2082_v18 = vrot.slane %v1951_v41, 2 }
 0x28e   :  { %v1952_v58 = vsel %vm1842_vm12, %v1758_v9, %v5563_v2  ;;  %v1865_v6 = vmin.f32 %v1763_v38, 0.0  ;;  %v1766_v30 = vadd.f32 %v9232_v43, %v1765_v44  ;;  %v1767_v10 = vpop.f32.mrb[55].mxu0  ;;  %vm1843_vm14 = vcmp.gt.f32.partialorder %v1763_v38, 0.0 }
 0x28f   :  { %v1996_v14 = vrot.slane %v1952_v58, 1  ;;  %v2083_v53 = vrot.slane %v1952_v58, 2 }
 0x290   :  { %v1889_v37 = vmul.f32 1.442695, %v1865_v6  ;;  %v1866_v3 = vmin.f32 %v1766_v30, 0.0  ;;  %vm1844_vm15 = vcmp.gt.f32.partialorder %v1766_v30, 0.0 }
 0x291   :  { %v1997_v5 = vsel %vm428_vm2, %v1995_v15, %v1996_v14  ;;  %v2084_v42 = vsel %vm11018_vm3, %v2082_v18, %v2083_v53 }
 0x292   :  { %v2060_v0 = vmax.f32 %v1951_v41, %v1997_v5  ;;  %7237 = vpow2.f32 %v1889_v37  ;;  %v1891_v59 = vmul.f32 1.442695, %v1866_v3 }
 0x294   :  { %v2147_v45 = vmax.f32 %v2060_v0, %v2084_v42  ;;  %7239 = vpow2.f32 %v1891_v59 }
 0x296   :  { %v2194_v27 = vmul.f32 %v9247_v50, %v2147_v45 }
 0x298   :  { %v2223_v56 = vadd.f32 %v9255_v52, %v2194_v27 }
 0x29c   :  { %v7238_v4 = vpop.eup %7237 }
 0x29d   :  { %v1770_v22 = vpop.f32.mrb[56].mxu0  ;;  %v5564_v17 = vadd.f32 -1.0, %v7238_v4 }
 0x29e   :  { %v1771_v29 = vadd.f32 %v9232_v43, %v1770_v22  ;;  %v1772_v54 = vpop.f32.mrb[57].mxu0  ;;  %v7240_v20 = vpop.eup %7239 }
 0x29f   :  { %v1773_v33 = vpop.f32.mrb[58].mxu0  ;;  %v1953_v16 = vsel %vm1843_vm14, %v1763_v38, %v5564_v17  ;;  %v5565_v39 = vadd.f32 -1.0, %v7240_v20 }
 0x2a0   :  { %v1867_v28 = vmin.f32 %v1771_v29, 0.0  ;;  %v1775_v48 = vpop.f32.mrb[59].mxu0  ;;  %v1998_v26 = vrot.slane %v1953_v16, 1  ;;  %v2085_v36 = vrot.slane %v1953_v16, 2  ;;  %v1774_v49 = vadd.f32 %v9232_v43, %v1773_v33 }
 0x2a1   :  { %v1954_v1 = vsel %vm1844_vm15, %v1766_v30, %v5565_v39  ;;  %vm1845_vm0 = vcmp.gt.f32.partialorder %v1771_v29, 0.0  ;;  %vm2245_vm15 = vcmask 334848  }
 0x2a2   :  { %v1893_v55 = vmul.f32 1.442695, %v1867_v28  ;;  %v1999_v19 = vsel %vm428_vm2, %v1996_v14, %v1998_v26  ;;  %v2086_v8 = vsel %vm11018_vm3, %v2083_v53, %v2085_v36  ;;  %v2000_v34 = vrot.slane %v1954_v1, 1 }
 0x2a3   :  { %v2087_v61 = vrot.slane %v1954_v1, 2  ;;  %v2061_v11 = vmax.f32 %v1952_v58, %v1999_v19  ;;  %v1868_v21 = vmin.f32 %v1774_v49, 0.0  ;;  %vm1846_vm7 = vcmp.gt.f32.partialorder %v1774_v49, 0.0 }
 0x2a4   :  { %7241 = vpow2.f32 %v1893_v55  ;;  %v2001_v40 = vsel %vm428_vm2, %v1998_v26, %v2000_v34 }
 0x2a5   :  { %v2088_v46 = vsel %vm11018_vm3, %v2085_v36, %v2087_v61  ;;  %v2148_v24 = vmax.f32 %v2061_v11, %v2086_v8  ;;  %v2062_v60 = vmax.f32 %v1953_v16, %v2001_v40  ;;  %v1895_v13 = vmul.f32 1.442695, %v1868_v21 }
 0x2a7   :  { %v2149_v12 = vmax.f32 %v2062_v60, %v2088_v46  ;;  %7243 = vpow2.f32 %v1895_v13  ;;  %v2195_v57 = vmul.f32 %v9247_v50, %v2148_v24 }
 0x2a9   :  { %v2224_v31 = vadd.f32 %v9255_v52, %v2195_v57  ;;  %v2196_v42 = vmul.f32 %v9247_v50, %v2149_v12 }
 0x2ab   :  { %v6024_v9 = vpack.c.bf16 %v2224_v31, %v2223_v56 }
 0x2ad   :  { %6025 = vmatpush1.bf16.msra.mxu0 %v6024_v9 }
 0x2ae   :  { %v7242_v47 = vpop.eup %7241  ;;  %6026 = vmatprep.subr.bf16.mxu0 %v11230_v35 }
 0x2af   :  { %v5566_v63 = vadd.f32 -1.0, %v7242_v47  ;;  %v1778_v23 = vpop.f32.mrb[60].mxu0 }
 0x2b0   :  { %v1779_v51 = vadd.f32 %v9232_v43, %v1778_v23  ;;  %v1780_v25 = vpop.f32.mrb[61].mxu0 }
 0x2b1   :  { %v1955_v62 = vsel %vm1845_vm0, %v1771_v29, %v5566_v63  ;;  %v7244_v32 = vpop.eup %7243  ;;  %v1781_v38 = vpop.f32.mrb[62].mxu0  ;;  %v2225_v29 = vadd.f32 %v9255_v52, %v2196_v42 }
 0x2b2   :  { %v2002_v41 = vrot.slane %v1955_v62, 1  ;;  %v2089_v2 = vrot.slane %v1955_v62, 2  ;;  %v5567_v7 = vadd.f32 -1.0, %v7244_v32  ;;  %v1869_v44 = vmin.f32 %v1779_v51, 0.0  ;;  %v1783_v6 = vpop.f32.mrb[63].mxu0 }
 0x2b3   :  { %v1782_v58 = vadd.f32 %v9232_v43, %v1781_v38  ;;  %vm1847_vm12 = vcmp.gt.f32.partialorder %v1779_v51, 0.0 }
 0x2b4   :  { %v2003_v30 = vsel %vm428_vm2, %v2000_v34, %v2002_v41  ;;  %v2090_v10 = vsel %vm11018_vm3, %v2087_v61, %v2089_v2  ;;  %v1956_v18 = vsel %vm1846_vm7, %v1774_v49, %v5567_v7  ;;  %v1897_v14 = vmul.f32 1.442695, %v1869_v44 }
 0x2b5   :  { %v2063_v15 = vmax.f32 %v1954_v1, %v2003_v30  ;;  %v2004_v53 = vrot.slane %v1956_v18, 1  ;;  %v2091_v37 = vrot.slane %v1956_v18, 2  ;;  %v1870_v3 = vmin.f32 %v1782_v58, 0.0 }
 0x2b6   :  { %7245 = vpow2.f32 %v1897_v14  ;;  %vm1848_vm14 = vcmp.gt.f32.partialorder %v1782_v58, 0.0 }
 0x2b7   :  { %v2150_v5 = vmax.f32 %v2063_v15, %v2090_v10  ;;  %v2005_v0 = vsel %vm428_vm2, %v2002_v41, %v2004_v53  ;;  %v2092_v59 = vsel %vm11018_vm3, %v2089_v2, %v2091_v37  ;;  %v1899_v45 = vmul.f32 1.442695, %v1870_v3  ;;  %v2170_v2 = vld [vmem:[%s11231_s29 + $0x8] sm:$0xff] }
 0x2b8   :  { %v2064_v4 = vmax.f32 %v1955_v62, %v2005_v0  ;;  %5587 = vmatprep.mubr.msk.f32.mxu0 %vm2245_vm15, %v2170_v2 }
 0x2b9   :  { %v2197_v22 = vmul.f32 %v9247_v50, %v2150_v5  ;;  %7247 = vpow2.f32 %v1899_v45 }
 0x2ba   :  { %v2151_v17 = vmax.f32 %v2064_v4, %v2092_v59 }
 0x2bb   :  { %v2226_v54 = vadd.f32 %v9255_v52, %v2197_v22 }
 0x2bc   :  { %v2198_v9 = vmul.f32 %v9247_v50, %v2151_v17 }
 0x2bd   :  { %v6027_v20 = vpack.c.bf16 %v2226_v54, %v2225_v29 }
 0x2be   :  { %v2227_v62 = vadd.f32 %v9255_v52, %v2198_v9 }
 0x2bf   :  { %6028 = vmatpush1.bf16.msra.mxu0 %v6027_v20 }
 0x2c0   :  { %6029 = vmatprep.subr.bf16.mxu0 %v11230_v35  ;;  %v7246_v33 = vpop.eup %7245 }
 0x2c1   :  { %v1786_v16 = vpop.f32.mrb[64].mxu0  ;;  %v5568_v39 = vadd.f32 -1.0, %v7246_v33 }
 0x2c2   :  { %v1787_v28 = vadd.f32 %v9232_v43, %v1786_v16  ;;  %v1788_v48 = vpop.f32.mrb[65].mxu0 }
 0x2c3   :  { %v1789_v26 = vpop.f32.mrb[66].mxu0  ;;  %v7248_v36 = vpop.eup %7247  ;;  %v1957_v49 = vsel %vm1847_vm12, %v1779_v51, %v5568_v39 }
 0x2c4   :  { %v1871_v1 = vmin.f32 %v1787_v28, 0.0  ;;  %v1790_v55 = vadd.f32 %v9232_v43, %v1789_v26  ;;  %v1791_v19 = vpop.f32.mrb[67].mxu0  ;;  %v2006_v8 = vrot.slane %v1957_v49, 1  ;;  %v2093_v34 = vrot.slane %v1957_v49, 2 }
 0x2c5   :  { %v5569_v61 = vadd.f32 -1.0, %v7248_v36  ;;  %vm1849_vm0 = vcmp.gt.f32.partialorder %v1787_v28, 0.0 }
 0x2c6   :  { %v1901_v11 = vmul.f32 1.442695, %v1871_v1  ;;  %v1872_v21 = vmin.f32 %v1790_v55, 0.0  ;;  %v2007_v40 = vsel %vm428_vm2, %v2004_v53, %v2006_v8  ;;  %v2094_v46 = vsel %vm11018_vm3, %v2091_v37, %v2093_v34 }
 0x2c7   :  { %v1958_v24 = vsel %vm1848_vm14, %v1782_v58, %v5569_v61  ;;  %v2065_v60 = vmax.f32 %v1956_v18, %v2007_v40  ;;  %vm1850_vm7 = vcmp.gt.f32.partialorder %v1790_v55, 0.0 }
 0x2c8   :  { %v2008_v13 = vrot.slane %v1958_v24, 1  ;;  %v2095_v27 = vrot.slane %v1958_v24, 2  ;;  %7249 = vpow2.f32 %v1901_v11  ;;  %v1903_v12 = vmul.f32 1.442695, %v1872_v21 }
 0x2c9   :  { %v2152_v57 = vmax.f32 %v2065_v60, %v2094_v46 }
 0x2ca   :  { %v2009_v56 = vsel %vm428_vm2, %v2006_v8, %v2008_v13  ;;  %v2096_v31 = vsel %vm11018_vm3, %v2093_v34, %v2095_v27  ;;  %7251 = vpow2.f32 %v1903_v12 }
 0x2cb   :  { %v2066_v47 = vmax.f32 %v1957_v49, %v2009_v56  ;;  %v2199_v63 = vmul.f32 %v9247_v50, %v2152_v57 }
 0x2cd   :  { %v2153_v23 = vmax.f32 %v2066_v47, %v2096_v31  ;;  %v2228_v51 = vadd.f32 %v9255_v52, %v2199_v63 }
 0x2cf   :  { %v6030_v25 = vpack.c.bf16 %v2228_v51, %v2227_v62  ;;  %v2200_v17 = vmul.f32 %v9247_v50, %v2153_v23 }
 0x2d1   :  { %6031 = vmatpush1.bf16.msra.mxu0 %v6030_v25  ;;  %v2229_v48 = vadd.f32 %v9255_v52, %v2200_v17 }
 0x2d2   :  { %v7250_v32 = vpop.eup %7249  ;;  %6032 = vmatprep.subr.bf16.mxu0 %v11230_v35 }
 0x2d3   :  { %v5570_v41 = vadd.f32 -1.0, %v7250_v32  ;;  %v1794_v38 = vpop.f32.mrb[68].mxu0 }
 0x2d4   :  { %v7252_v7 = vpop.eup %7251  ;;  %v1795_v58 = vadd.f32 %v9232_v43, %v1794_v38  ;;  %v1796_v6 = vpop.f32.mrb[69].mxu0 }
 0x2d5   :  { %v1959_v44 = vsel %vm1849_vm0, %v1787_v28, %v5570_v41  ;;  %v5571_v15 = vadd.f32 -1.0, %v7252_v7  ;;  %v1797_v18 = vpop.f32.mrb[70].mxu0 }
 0x2d6   :  { %v2010_v30 = vrot.slane %v1959_v44, 1  ;;  %v2097_v10 = vrot.slane %v1959_v44, 2  ;;  %v1873_v14 = vmin.f32 %v1795_v58, 0.0  ;;  %v1798_v53 = vadd.f32 %v9232_v43, %v1797_v18  ;;  %v1799_v37 = vpop.f32.mrb[71].mxu0 }
 0x2d7   :  { %v1960_v42 = vsel %vm1850_vm7, %v1790_v55, %v5571_v15  ;;  %vm1851_vm12 = vcmp.gt.f32.partialorder %v1795_v58, 0.0 }
 0x2d8   :  { %v2011_v3 = vsel %vm428_vm2, %v2008_v13, %v2010_v30  ;;  %v2098_v5 = vsel %vm11018_vm3, %v2095_v27, %v2097_v10  ;;  %v2012_v59 = vrot.slane %v1960_v42, 1  ;;  %v2099_v45 = vrot.slane %v1960_v42, 2 }
 0x2d9   :  { %v2067_v0 = vmax.f32 %v1958_v24, %v2011_v3  ;;  %v1905_v4 = vmul.f32 1.442695, %v1873_v14  ;;  %v1874_v22 = vmin.f32 %v1798_v53, 0.0  ;;  %vm1852_vm14 = vcmp.gt.f32.partialorder %v1798_v53, 0.0 }
 0x2da   :  { %v2013_v54 = vsel %vm428_vm2, %v2010_v30, %v2012_v59  ;;  %v2100_v20 = vsel %vm11018_vm3, %v2097_v10, %v2099_v45 }
 0x2db   :  { %v2154_v29 = vmax.f32 %v2067_v0, %v2098_v5  ;;  %7253 = vpow2.f32 %v1905_v4  ;;  %v2068_v33 = vmax.f32 %v1959_v44, %v2013_v54  ;;  %v1907_v16 = vmul.f32 1.442695, %v1874_v22 }
 0x2dd   :  { %v2201_v39 = vmul.f32 %v9247_v50, %v2154_v29  ;;  %v2155_v28 = vmax.f32 %v2068_v33, %v2100_v20  ;;  %7255 = vpow2.f32 %v1907_v16 }
 0x2df   :  { %v2230_v26 = vadd.f32 %v9255_v52, %v2201_v39  ;;  %v2202_v32 = vmul.f32 %v9247_v50, %v2155_v28 }
 0x2e1   :  { %v6033_v36 = vpack.c.bf16 %v2230_v26, %v2229_v48  ;;  %v2231_v7 = vadd.f32 %v9255_v52, %v2202_v32 }
 0x2e3   :  { %6034 = vmatpush1.bf16.msra.mxu0 %v6033_v36 }
 0x2e4   :  { %6035 = vmatprep.subr.bf16.mxu0 %v11230_v35 }
 0x2e5   :  { %v7254_v49 = vpop.eup %7253  ;;  %v1802_v1 = vpop.f32.mrb[72].mxu0 }
 0x2e6   :  { %v5572_v55 = vadd.f32 -1.0, %v7254_v49  ;;  %v1803_v19 = vadd.f32 %v9232_v43, %v1802_v1  ;;  %v1804_v8 = vpop.f32.mrb[73].mxu0 }
 0x2e7   :  { %v1805_v34 = vpop.f32.mrb[74].mxu0  ;;  %v7256_v61 = vpop.eup %7255 }
 0x2e8   :  { %v1961_v11 = vsel %vm1851_vm12, %v1795_v58, %v5572_v55  ;;  %v1875_v21 = vmin.f32 %v1803_v19, 0.0  ;;  %v1806_v40 = vadd.f32 %v9232_v43, %v1805_v34  ;;  %v1807_v46 = vpop.f32.mrb[75].mxu0  ;;  %v5573_v13 = vadd.f32 -1.0, %v7256_v61 }
 0x2e9   :  { %v2014_v24 = vrot.slane %v1961_v11, 1  ;;  %v2101_v60 = vrot.slane %v1961_v11, 2  ;;  %vm1853_vm0 = vcmp.gt.f32.partialorder %v1803_v19, 0.0 }
 0x2ea   :  { %v1909_v27 = vmul.f32 1.442695, %v1875_v21  ;;  %v1876_v12 = vmin.f32 %v1806_v40, 0.0  ;;  %v1962_v31 = vsel %vm1852_vm14, %v1798_v53, %v5573_v13  ;;  %vm1854_vm7 = vcmp.gt.f32.partialorder %v1806_v40, 0.0 }
 0x2eb   :  { %v2015_v57 = vsel %vm428_vm2, %v2012_v59, %v2014_v24  ;;  %v2102_v56 = vsel %vm11018_vm3, %v2099_v45, %v2101_v60  ;;  %v2016_v47 = vrot.slane %v1962_v31, 1  ;;  %v2103_v63 = vrot.slane %v1962_v31, 2 }
 0x2ec   :  { %v2069_v9 = vmax.f32 %v1960_v42, %v2015_v57  ;;  %7257 = vpow2.f32 %v1909_v27  ;;  %v1911_v23 = vmul.f32 1.442695, %v1876_v12 }
 0x2ed   :  { %v2017_v51 = vsel %vm428_vm2, %v2014_v24, %v2016_v47  ;;  %v2104_v25 = vsel %vm11018_vm3, %v2101_v60, %v2103_v63 }
 0x2ee   :  { %v2156_v62 = vmax.f32 %v2069_v9, %v2102_v56  ;;  %v2070_v41 = vmax.f32 %v1961_v11, %v2017_v51  ;;  %7259 = vpow2.f32 %v1911_v23 }
 0x2f0   :  { %v2203_v2 = vmul.f32 %v9247_v50, %v2156_v62  ;;  %v2157_v38 = vmax.f32 %v2070_v41, %v2104_v25 }
 0x2f2   :  { %v2232_v44 = vadd.f32 %v9255_v52, %v2203_v2  ;;  %v2204_v39 = vmul.f32 %v9247_v50, %v2157_v38 }
 0x2f4   :  { %v6036_v58 = vpack.c.bf16 %v2232_v44, %v2231_v7 }
 0x2f6   :  { %v7258_v6 = vpop.eup %7257  ;;  %6037 = vmatpush1.bf16.msra.mxu0 %v6036_v58 }
 0x2f7   :  { %v5574_v30 = vadd.f32 -1.0, %v7258_v6  ;;  %6038 = vmatprep.subr.bf16.mxu0 %v11230_v35  ;;  %v1810_v10 = vpop.f32.mrb[76].mxu0 }
 0x2f8   :  { %v7260_v15 = vpop.eup %7259  ;;  %v1811_v14 = vadd.f32 %v9232_v43, %v1810_v10  ;;  %v1812_v53 = vpop.f32.mrb[77].mxu0 }
 0x2f9   :  { %v1963_v18 = vsel %vm1853_vm0, %v1803_v19, %v5574_v30  ;;  %v5575_v5 = vadd.f32 -1.0, %v7260_v15  ;;  %v1813_v42 = vpop.f32.mrb[78].mxu0  ;;  %v2233_v19 = vadd.f32 %v9255_v52, %v2204_v39 }
 0x2fa   :  { %v2018_v37 = vrot.slane %v1963_v18, 1  ;;  %v2105_v3 = vrot.slane %v1963_v18, 2  ;;  %v1877_v0 = vmin.f32 %v1811_v14, 0.0  ;;  %v1814_v59 = vadd.f32 %v9232_v43, %v1813_v42  ;;  %v1815_v45 = vpop.f32.mrb[79].mxu0 }
 0x2fb   :  { %v1964_v17 = vsel %vm1854_vm7, %v1806_v40, %v5575_v5  ;;  %vm1855_vm12 = vcmp.gt.f32.partialorder %v1811_v14, 0.0 }
 0x2fc   :  { %v2019_v4 = vsel %vm428_vm2, %v2016_v47, %v2018_v37  ;;  %v2106_v22 = vsel %vm11018_vm3, %v2103_v63, %v2105_v3  ;;  %v2020_v54 = vrot.slane %v1964_v17, 1  ;;  %v2107_v20 = vrot.slane %v1964_v17, 2 }
 0x2fd   :  { %v2071_v29 = vmax.f32 %v1962_v31, %v2019_v4  ;;  %v1913_v33 = vmul.f32 1.442695, %v1877_v0  ;;  %v1878_v16 = vmin.f32 %v1814_v59, 0.0  ;;  %vm1856_vm14 = vcmp.gt.f32.partialorder %v1814_v59, 0.0 }
 0x2fe   :  { %v2021_v48 = vsel %vm428_vm2, %v2018_v37, %v2020_v54  ;;  %v2108_v26 = vsel %vm11018_vm3, %v2105_v3, %v2107_v20 }
 0x2ff   :  { %v2158_v28 = vmax.f32 %v2071_v29, %v2106_v22  ;;  %7261 = vpow2.f32 %v1913_v33  ;;  %v2072_v36 = vmax.f32 %v1963_v18, %v2021_v48  ;;  %v1915_v49 = vmul.f32 1.442695, %v1878_v16 }
 0x301   :  { %v2205_v1 = vmul.f32 %v9247_v50, %v2158_v28  ;;  %v2159_v55 = vmax.f32 %v2072_v36, %v2108_v26  ;;  %7263 = vpow2.f32 %v1915_v49 }
 0x303   :  { %v2234_v8 = vadd.f32 %v9255_v52, %v2205_v1  ;;  %v2206_v58 = vmul.f32 %v9247_v50, %v2159_v55 }
 0x305   :  { %v6039_v34 = vpack.c.bf16 %v2234_v8, %v2233_v19  ;;  %v2235_v15 = vadd.f32 %v9255_v52, %v2206_v58 }
 0x307   :  { %6040 = vmatpush1.bf16.msra.mxu0 %v6039_v34 }
 0x308   :  { %6041 = vmatprep.subr.bf16.mxu0 %v11230_v35 }
 0x309   :  { %v7262_v61 = vpop.eup %7261  ;;  %v1818_v11 = vpop.f32.mrb[80].mxu0 }
 0x30a   :  { %v5576_v21 = vadd.f32 -1.0, %v7262_v61  ;;  %v1819_v40 = vadd.f32 %v9232_v43, %v1818_v11  ;;  %v1820_v46 = vpop.f32.mrb[81].mxu0 }
 0x30b   :  { %v1821_v24 = vpop.f32.mrb[82].mxu0  ;;  %v7264_v60 = vpop.eup %7263 }
 0x30c   :  { %v1965_v13 = vsel %vm1855_vm12, %v1811_v14, %v5576_v21  ;;  %v1879_v27 = vmin.f32 %v1819_v40, 0.0  ;;  %v1822_v12 = vadd.f32 %v9232_v43, %v1821_v24  ;;  %v1823_v57 = vpop.f32.mrb[83].mxu0  ;;  %v5577_v9 = vadd.f32 -1.0, %v7264_v60 }
 0x30d   :  { %v2022_v56 = vrot.slane %v1965_v13, 1  ;;  %v2109_v31 = vrot.slane %v1965_v13, 2  ;;  %vm1857_vm0 = vcmp.gt.f32.partialorder %v1819_v40, 0.0 }
 0x30e   :  { %v1917_v47 = vmul.f32 1.442695, %v1879_v27  ;;  %v1880_v63 = vmin.f32 %v1822_v12, 0.0  ;;  %v1966_v51 = vsel %vm1856_vm14, %v1814_v59, %v5577_v9  ;;  %vm1858_vm7 = vcmp.gt.f32.partialorder %v1822_v12, 0.0 }
 0x30f   :  { %v2023_v23 = vsel %vm428_vm2, %v2020_v54, %v2022_v56  ;;  %v2110_v62 = vsel %vm11018_vm3, %v2107_v20, %v2109_v31  ;;  %v2024_v32 = vrot.slane %v1966_v51, 1  ;;  %v2111_v41 = vrot.slane %v1966_v51, 2 }
 0x310   :  { %v2073_v25 = vmax.f32 %v1964_v17, %v2023_v23  ;;  %7265 = vpow2.f32 %v1917_v47  ;;  %v1919_v2 = vmul.f32 1.442695, %v1880_v63 }
 0x311   :  { %v2025_v7 = vsel %vm428_vm2, %v2022_v56, %v2024_v32  ;;  %v2112_v44 = vsel %vm11018_vm3, %v2109_v31, %v2111_v41 }
 0x312   :  { %v2160_v38 = vmax.f32 %v2073_v25, %v2110_v62  ;;  %v2074_v6 = vmax.f32 %v1965_v13, %v2025_v7  ;;  %7267 = vpow2.f32 %v1919_v2 }
 0x314   :  { %v2207_v30 = vmul.f32 %v9247_v50, %v2160_v38  ;;  %v2161_v10 = vmax.f32 %v2074_v6, %v2112_v44 }
 0x316   :  { %v2236_v18 = vadd.f32 %v9255_v52, %v2207_v30  ;;  %v2208_v1 = vmul.f32 %v9247_v50, %v2161_v10 }
 0x318   :  { %v6042_v14 = vpack.c.bf16 %v2236_v18, %v2235_v15 }
 0x31a   :  { %v7266_v53 = vpop.eup %7265  ;;  %6043 = vmatpush1.bf16.msra.mxu0 %v6042_v14 }
 0x31b   :  { %v5578_v37 = vadd.f32 -1.0, %v7266_v53  ;;  %6044 = vmatprep.subr.bf16.mxu0 %v11230_v35  ;;  %v1826_v3 = vpop.f32.mrb[84].mxu0 }
 0x31c   :  { %v7268_v5 = vpop.eup %7267  ;;  %v1827_v0 = vadd.f32 %v9232_v43, %v1826_v3  ;;  %v1828_v59 = vpop.f32.mrb[85].mxu0 }
 0x31d   :  { %v1967_v42 = vsel %vm1857_vm0, %v1819_v40, %v5578_v37  ;;  %v5579_v22 = vadd.f32 -1.0, %v7268_v5  ;;  %v1829_v17 = vpop.f32.mrb[86].mxu0  ;;  %v2237_v40 = vadd.f32 %v9255_v52, %v2208_v1 }
 0x31e   :  { %v2026_v45 = vrot.slane %v1967_v42, 1  ;;  %v2113_v4 = vrot.slane %v1967_v42, 2  ;;  %v1881_v29 = vmin.f32 %v1827_v0, 0.0  ;;  %v1830_v54 = vadd.f32 %v9232_v43, %v1829_v17  ;;  %v1831_v20 = vpop.f32.mrb[87].mxu0 }
 0x31f   :  { %v1968_v39 = vsel %vm1858_vm7, %v1822_v12, %v5579_v22  ;;  %vm1859_vm12 = vcmp.gt.f32.partialorder %v1827_v0, 0.0 }
 0x320   :  { %v2027_v33 = vsel %vm428_vm2, %v2024_v32, %v2026_v45  ;;  %v2114_v16 = vsel %vm11018_vm3, %v2111_v41, %v2113_v4  ;;  %v2028_v48 = vrot.slane %v1968_v39, 1  ;;  %v2115_v26 = vrot.slane %v1968_v39, 2 }
 0x321   :  { %v2075_v28 = vmax.f32 %v1966_v51, %v2027_v33  ;;  %v1921_v36 = vmul.f32 1.442695, %v1881_v29  ;;  %v1882_v49 = vmin.f32 %v1830_v54, 0.0  ;;  %vm1860_vm14 = vcmp.gt.f32.partialorder %v1830_v54, 0.0 }
 0x322   :  { %v2029_v19 = vsel %vm428_vm2, %v2026_v45, %v2028_v48  ;;  %v2116_v8 = vsel %vm11018_vm3, %v2113_v4, %v2115_v26 }
 0x323   :  { %v2162_v55 = vmax.f32 %v2075_v28, %v2114_v16  ;;  %7269 = vpow2.f32 %v1921_v36  ;;  %v2076_v34 = vmax.f32 %v1967_v42, %v2029_v19  ;;  %v1923_v61 = vmul.f32 1.442695, %v1882_v49 }
 0x325   :  { %v2209_v11 = vmul.f32 %v9247_v50, %v2162_v55  ;;  %v2163_v21 = vmax.f32 %v2076_v34, %v2116_v8  ;;  %7271 = vpow2.f32 %v1923_v61 }
 0x327   :  { %v2238_v46 = vadd.f32 %v9255_v52, %v2209_v11  ;;  %v2210_v18 = vmul.f32 %v9247_v50, %v2163_v21 }
 0x329   :  { %v6045_v24 = vpack.c.bf16 %v2238_v46, %v2237_v40  ;;  %v2239_v3 = vadd.f32 %v9255_v52, %v2210_v18 }
 0x32b   :  { %6046 = vmatpush1.bf16.msra.mxu0 %v6045_v24 }
 0x32c   :  { %6047 = vmatprep.subr.bf16.mxu0 %v11230_v35 }
 0x32d   :  { %v7270_v60 = vpop.eup %7269  ;;  %v1834_v13 = vpop.f32.mrb[88].mxu0 }
 0x32e   :  { %v5580_v27 = vadd.f32 -1.0, %v7270_v60  ;;  %v1835_v12 = vadd.f32 %v9232_v43, %v1834_v13  ;;  %v1836_v57 = vpop.f32.mrb[89].mxu0 }
 0x32f   :  { %v1837_v56 = vpop.f32.mrb[90].mxu0  ;;  %v7272_v31 = vpop.eup %7271  ;;  %v2174_v57 = vld [vmem:[%s11231_s29 + $0x28] sm:$0xff] }
 0x330   :  { %v1969_v9 = vsel %vm1859_vm12, %v1827_v0, %v5580_v27  ;;  %v1883_v47 = vmin.f32 %v1835_v12, 0.0  ;;  %v1838_v63 = vadd.f32 %v9232_v43, %v1837_v56  ;;  %v1839_v23 = vpop.f32.mrb[91].mxu0  ;;  %v5581_v25 = vadd.f32 -1.0, %v7272_v31  ;;  %v2173_v56 = vld [vmem:[%s11231_s29 + $0x20] sm:$0xff]  ;;  %v2176_v31 = vld [vmem:[%s11231_s29 + $0x38] sm:$0xff]  ;;  %v3936_v27 = vld [vmem:[%s10924_s16 + $0x10] sm:$0xff] }
 0x331   :  { %v2030_v62 = vrot.slane %v1969_v9, 1  ;;  %v2117_v51 = vrot.slane %v1969_v9, 2  ;;  %vm1861_vm0 = vcmp.gt.f32.partialorder %v1835_v12, 0.0  ;;  %vm11014_vm12 = vmmov 1   ;;  %v2180_v23 = vld [vmem:[%s11231_s29 + $0x58] sm:$0xff] }
 0x332   :  { %v1925_v32 = vmul.f32 1.442695, %v1883_v47  ;;  %v1884_v41 = vmin.f32 %v1838_v63, 0.0  ;;  %v1970_v7 = vsel %vm1860_vm14, %v1830_v54, %v5581_v25  ;;  %vm1862_vm7 = vcmp.gt.f32.partialorder %v1838_v63, 0.0  ;;  %vm9368_vm14 = vmpackc.low %vm11015_vm6, %vm11014_vm12  ;;  %v2178_v47 = vld [vmem:[%s11231_s29 + $0x48] sm:$0xff]  ;;  %v2181_v25 = vld [vmem:[%s11231_s29 + $0x60] sm:$0xff] }
 0x333   :  { %v2031_v2 = vsel %vm428_vm2, %v2028_v48, %v2030_v62  ;;  %v2118_v38 = vsel %vm11018_vm3, %v2115_v26, %v2117_v51  ;;  %v2032_v58 = vrot.slane %v1970_v7, 1  ;;  %v2119_v6 = vrot.slane %v1970_v7, 2 }
 0x334   :  { %v2077_v44 = vmax.f32 %v1968_v39, %v2031_v2  ;;  %7273 = vpow2.f32 %v1925_v32  ;;  %v1927_v30 = vmul.f32 1.442695, %v1884_v41  ;;  %v2184_v32 = vld [vmem:[%s11231_s29 + $0x78] sm:$0xff]  ;;  %v2183_v41 = vld [vmem:[%s11231_s29 + $0x70] sm:$0xff]  ;;  %v2186_v2 = vld [vmem:[%s11231_s29 + $0x88] sm:$0xff] }
 0x335   :  { %v2033_v43 = vsel %vm428_vm2, %v2030_v62, %v2032_v58  ;;  %v2120_v15 = vsel %vm11018_vm3, %v2117_v51, %v2119_v6  ;;  %v2179_v62 = vld [vmem:[%s11231_s29 + $0x50] sm:$0xff]  ;;  %v2182_v51 = vld [vmem:[%s11231_s29 + $0x68] sm:$0xff] }
 0x336   :  { %v2164_v10 = vmax.f32 %v2077_v44, %v2118_v38  ;;  %v2078_v14 = vmax.f32 %v1969_v9, %v2033_v43  ;;  %7275 = vpow2.f32 %v1927_v30  ;;  %v2175_v9 = vld [vmem:[%s11231_s29 + $0x30] sm:$0xff]  ;;  %v2185_v38 = vld [vmem:[%s11231_s29 + $0x80] sm:$0xff]  ;;  %v7003_v43 = vld [vmem:[%s11234_s9 + $0x58] sm:$0xff]  }
 0x337   :  { %v6998_v44 = vld [vmem:[%s11234_s9] sm:$0xff]   ;;  %v7001_v30 = vld [vmem:[%s11234_s9 + $0x50] sm:$0xff]  }
 0x338   :  { %v2211_v53 = vmul.f32 %v9247_v50, %v2164_v10  ;;  %v2165_v37 = vmax.f32 %v2078_v14, %v2120_v15  ;;  %v7002_v10 = vld [vmem:[%s11234_s9 + $0x10] sm:$0xff]   ;;  %v7004_v14 = vld [vmem:[%s11234_s9 + $0x18] sm:$0xff]  }
 0x33a   :  { %v2240_v5 = vadd.f32 %v9255_v52, %v2211_v53  ;;  %v2212_v48 = vmul.f32 %v9247_v50, %v2165_v37 }
 0x33c   :  { %v6048_v42 = vpack.c.bf16 %v2240_v5, %v2239_v3  ;;  %v2241_v11 = vadd.f32 %v9255_v52, %v2212_v48 }
 0x33e   :  { %v7274_v0 = vpop.eup %7273  ;;  %6049 = vmatpush1.bf16.msra.mxu0 %v6048_v42 }
 0x33f   :  { %v5582_v59 = vadd.f32 -1.0, %v7274_v0  ;;  %6050 = vmatprep.subr.bf16.mxu0 %v11230_v35 }
 0x340   :  { %v7276_v45 = vpop.eup %7275 }
 0x341   :  { %v1971_v4 = vsel %vm1861_vm0, %v1835_v12, %v5582_v59  ;;  %v5583_v29 = vadd.f32 -1.0, %v7276_v45  ;;  %v2171_v12 = vld [vmem:[%s11231_s29 + $0x10] sm:$0xff]  ;;  %v7005_v45 = vld [vmem:[%s11234_s9 + $0x60] sm:$0xff]  }
 0x342   :  { %v2034_v22 = vrot.slane %v1971_v4, 1  ;;  %v2121_v17 = vrot.slane %v1971_v4, 2 }
 0x343   :  { %v1972_v33 = vsel %vm1862_vm7, %v1838_v63, %v5583_v29  ;;  %v2177_v63 = vld [vmem:[%s11231_s29 + $0x40] sm:$0xff] }
 0x344   :  { %v2035_v54 = vsel %vm428_vm2, %v2032_v58, %v2034_v22  ;;  %v2122_v20 = vsel %vm11018_vm3, %v2119_v6, %v2121_v17  ;;  %v2036_v39 = vrot.slane %v1972_v33, 1  ;;  %v2123_v28 = vrot.slane %v1972_v33, 2  ;;  %v6999_v58 = vld [vmem:[%s11234_s9 + $0x48] sm:$0xff]  }
 0x345   :  { %v2079_v16 = vmax.f32 %v1970_v7, %v2035_v54  ;;  %v6997_v7 = vld [vmem:[%s11234_s9 + $0x40] sm:$0xff]   ;;  %v7000_v6 = vld [vmem:[%s11234_s9 + $0x8] sm:$0xff]  }
 0x346   :  { %v2037_v36 = vsel %vm428_vm2, %v2034_v22, %v2036_v39  ;;  %v2081_v49 = vmax.f32 %v1972_v33, %v2036_v39  ;;  %v2124_v1 = vsel %vm11018_vm3, %v2121_v17, %v2123_v28  ;;  %5819 = vmatprep.subr.bf16.mxu1 %v6997_v7 }
 0x347   :  { %v2166_v26 = vmax.f32 %v2079_v16, %v2122_v20  ;;  %v2080_v55 = vmax.f32 %v1971_v4, %v2037_v36  ;;  %5820 = vmatpush3.bf16.msra.mxu1 %v6998_v44 }
 0x348   :  { %v2168_v19 = vmax.f32 %v2081_v49, %v2123_v28  ;;  %5821 = vmatprep.subr.bf16.mxu1 %v6999_v58  ;;  %v7006_v49 = vld [vmem:[%s11234_s9 + $0x20] sm:$0xff]  }
 0x349   :  { %v2213_v8 = vmul.f32 %v9247_v50, %v2166_v26  ;;  %v2167_v34 = vmax.f32 %v2080_v55, %v2124_v1 }
 0x34a   :  { %v2215_v61 = vmul.f32 %v9247_v50, %v2168_v19 }
 0x34b   :  { %v2242_v21 = vadd.f32 %v9255_v52, %v2213_v8  ;;  %v2214_v40 = vmul.f32 %v9247_v50, %v2167_v34  ;;  %v2169_v50 = vld [vmem:[%s11231_s29] sm:$0xff]  ;;  %5822 = vmatpush3.bf16.msra.mxu1 %v7000_v6  ;;  %v7007_v34 = vld [vmem:[%s11234_s9 + $0x68] sm:$0xff]  }
 0x34c   :  { %v2244_v46 = vadd.f32 %v9255_v52, %v2215_v61  ;;  %5823 = vmatprep.subr.bf16.mxu1 %v7001_v30 }
 0x34d   :  { %v6051_v24 = vpack.c.bf16 %v2242_v21, %v2241_v11  ;;  %v2243_v60 = vadd.f32 %v9255_v52, %v2214_v40  ;;  %v2172_v52 = vld [vmem:[%s11231_s29 + $0x18] sm:$0xff]  ;;  %s7361_s29 = smov 97  }
 0x34f   :  { %6052 = vmatpush1.bf16.msra.mxu0 %v6051_v24  ;;  %v6054_v13 = vpack.c.bf16 %v2244_v46, %v2243_v60  ;;  %5824 = vmatpush3.bf16.msra.mxu1 %v7002_v10 }
 0x350   :  { %6053 = vmatprep.subr.bf16.mxu0 %v11230_v35  ;;  %5825 = vmatprep.subr.bf16.mxu1 %v7003_v43 }
 0x353   :  { %6056 = vmatpush1.bf16.msk.msra.mxu0 %vm9368_vm14, %v6054_v13  ;;  %5826 = vmatpush3.bf16.msra.mxu1 %v7004_v14 }
 0x354   :  { %6057 = vmatprep.subr.bf16.mxu0 %v11230_v35  ;;  %5827 = vmatprep.subr.bf16.mxu1 %v7005_v45 }
 0x356   :  { %2341 = vmatmul.mubr.f32.vlgmr.msra.gmra.mrb[46].mxu0 %v2169_v50 }
 0x357   :  { %5588 = vmatprep.mubr.msk.f32.mxu0 %vm2245_vm15, %v2172_v52  ;;  %5828 = vmatpush3.bf16.msra.mxu1 %v7006_v49 }
 0x358   :  { %5829 = vmatprep.subr.bf16.mxu1 %v7007_v34 }
 0x35a   :  { %2346 = vmatmul.mubr.f32.gmra.mrb[92].mxu0 %v2171_v12 }
 0x35b   :  { %5589 = vmatprep.mubr.msk.f32.mxu0 %vm2245_vm15, %v2174_v57 }
 0x35e   :  { %2351 = vmatmul.mubr.f32.gmra.mrb[94].mxu0 %v2173_v56  ;;  %v7008_v56 = vld [vmem:[%s11234_s9 + $0x28] sm:$0xff]  }
 0x35f   :  { %5590 = vmatprep.mubr.msk.f32.mxu0 %vm2245_vm15, %v2176_v31  ;;  %5830 = vmatpush3.bf16.msra.mxu1 %v7008_v56 }
 0x362   :  { %2356 = vmatmul.mubr.f32.gmra.mrb[96].mxu0 %v2175_v9 }
 0x363   :  { %5591 = vmatprep.mubr.msk.f32.mxu0 %vm2245_vm15, %v2178_v47 }
 0x366   :  { %2361 = vmatmul.mubr.f32.gmra.mrb[98].mxu0 %v2177_v63 }
 0x367   :  { %5592 = vmatprep.mubr.msk.f32.mxu0 %vm2245_vm15, %v2180_v23 }
 0x36a   :  { %2366 = vmatmul.mubr.f32.gmra.mrb[100].mxu0 %v2179_v62  ;;  %v7009_v62 = vld [vmem:[%s11234_s9 + $0x70] sm:$0xff]  }
 0x36b   :  { %5593 = vmatprep.mubr.msk.f32.mxu0 %vm2245_vm15, %v2182_v51  ;;  %5831 = vmatprep.subr.bf16.mxu1 %v7009_v62 }
 0x36e   :  { %2371 = vmatmul.mubr.f32.gmra.mrb[102].mxu0 %v2181_v25 }
 0x36f   :  { %5594 = vmatprep.mubr.msk.f32.mxu0 %vm2245_vm15, %v2184_v32 }
 0x372   :  { %2376 = vmatmul.mubr.f32.gmra.mrb[104].mxu0 %v2183_v41 }
 0x373   :  { %5595 = vmatprep.mubr.msk.f32.mxu0 %vm2245_vm15, %v2186_v2  ;;  %vm11235_vm15 = vcmask 1043456  }
 0x374   :  { %vm11236_vm0 = vmmov %vm11235_vm15 }
 0x375   :  { %vm11237_vm7 = vmmov %vm11236_vm0 }
 0x376   :  { %2381 = vmatmul.mubr.f32.gmra.mrb[106].mxu0 %v2185_v38 }
 0x429   :  { %v9455_v15 = vpop.f32.mrb[46].mxu0 }
 0x42a   :  { %v2344_v18 = vpop.f32.mrb[47].mxu0  ;;  %v2557_v53 = vrot.slane %v9455_v15, 5  ;;  %v2394_v37 = vrot.slane %v9455_v15, 1  ;;  %v2434_v5 = vrot.slane %v9455_v15, 2  ;;  %v2598_v42 = vrot.slane %v9455_v15, 6 }
 0x42b   :  { %v2475_v0 = vrot.slane %v9455_v15, 3  ;;  %v2639_v59 = vrot.slane %v9455_v15, 7  ;;  %v2516_v16 = vrot.slane %v9455_v15, 4  ;;  %v7010_v18 = vld [vmem:[%s11234_s9 + $0x30] sm:$0xff]  }
 0x42c   :  { %5832 = vmatpush3.bf16.msra.mxu1 %v7010_v18 }
 0x42d   :  { %v9462_v3 = vpop.f32.mrb[92].mxu0 }
 0x42e   :  { %v2349_v4 = vpop.f32.mrb[93].mxu0  ;;  %v2558_v22 = vrot.slane %v9462_v3, 5  ;;  %v2395_v17 = vrot.slane %v9462_v3, 1  ;;  %v2435_v29 = vrot.slane %v9462_v3, 2  ;;  %v2599_v54 = vrot.slane %v9462_v3, 6 }
 0x42f   :  { %v2476_v20 = vrot.slane %v9462_v3, 3  ;;  %v2640_v33 = vrot.slane %v9462_v3, 7  ;;  %v2517_v39 = vrot.slane %v9462_v3, 4 }
 0x430   :  { %v2559_v28 = vsel %vm11009_vm4, %v2557_v53, %v2558_v22  ;;  %v2396_v48 = vsel %vm428_vm2, %v2394_v37, %v2395_v17  ;;  %v9482_v26 = vsel %vm11018_vm3, %v2434_v5, %v2435_v29  ;;  %v9485_v36 = vsel %vm11008_vm1, %v2598_v42, %v2599_v54  ;;  %v7011_v42 = vld [vmem:[%s11234_s9 + $0x78] sm:$0x1f]  }
 0x431   :  { %v9490_v1 = vpop.f32.mrb[94].mxu0  ;;  %v9493_v55 = vsel %vm11016_vm5, %v2475_v0, %v2476_v20  ;;  %v9496_v19 = vsel %vm11015_vm6, %v2639_v59, %v2640_v33  ;;  %v9499_v8 = vsel %vm11235_vm15, %v2516_v16, %v2517_v39  ;;  %6139 = vmatprep.subr.msk.bf16.mxu1 %vm11016_vm5, %v7011_v42  ;;  %vm11238_vm15 = vmmov %vm11236_vm0 }
 0x432   :  { %v2354_v61 = vpop.f32.mrb[95].mxu0  ;;  %v6668_v11 = vpack.i.bf16 %v9490_v1, %v9462_v3  ;;  %v2560_v21 = vrot.slane %v9490_v1, 5  ;;  %v2397_v40 = vrot.slane %v9490_v1, 1  ;;  %v2437_v46 = vrot.slane %v9490_v1, 2 }
 0x433   :  { %v2601_v24 = vrot.slane %v9490_v1, 6  ;;  %v2478_v60 = vrot.slane %v9490_v1, 3  ;;  %v2642_v13 = vrot.slane %v9490_v1, 7  ;;  %v2519_v50 = vrot.slane %v9490_v1, 4 }
 0x434   :  { %6669 = vrot.lane.b32.xlu1 %v6668_v11, %s7354_s0  ;;  %v2561_v52 = vsel %vm11009_vm4, %v2558_v22, %v2560_v21  ;;  %v9516_v12 = vsel %vm428_vm2, %v2395_v17, %v2397_v40  ;;  %v2438_v57 = vsel %vm11018_vm3, %v2435_v29, %v2437_v46  ;;  %v7012_v17 = vld [vmem:[%s11234_s9 + $0x38] sm:$0xff]   ;;  %s7358_s9 = smov 75  }
 0x435   :  { %v9522_v31 = vpop.f32.mrb[96].mxu0  ;;  %v6678_v9 = vpack.i.bf16 %v2561_v52, %v2559_v28  ;;  %v6673_v47 = vpack.i.bf16 %v9516_v12, %v2396_v48  ;;  %v6688_v63 = vpack.i.bf16 %v2438_v57, %v9482_v26  ;;  %v2602_v23 = vsel %vm11008_vm1, %v2599_v54, %v2601_v24  ;;  %5834 = vmatpush3.bf16.msra.mxu1 %v7012_v17 }
 0x436   :  { %v2359_v51 = vpop.f32.mrb[97].mxu0  ;;  %v6683_v25 = vpack.i.bf16 %v2602_v23, %v9485_v36  ;;  %v2479_v32 = vsel %vm11016_vm5, %v2476_v20, %v2478_v60  ;;  %v2643_v41 = vsel %vm11015_vm6, %v2640_v33, %v2642_v13  ;;  %v9538_v2 = vsel %vm11236_vm0, %v2517_v39, %v2519_v50 }
 0x437   :  { %6679 = vrot.lane.b32.xlu0 %v6678_v9, %s7355_s7  ;;  %v6698_v38 = vpack.i.bf16 %v2479_v32, %v9493_v55  ;;  %v6693_v7 = vpack.i.bf16 %v2643_v41, %v9496_v19  ;;  %v6703_v44 = vpack.i.bf16 %v9538_v2, %v9499_v8  ;;  %v2399_v58 = vrot.slane %v9522_v31, 1 }
 0x438   :  { %6674 = vrot.lane.b32.xlu1 %v6673_v47, %s7356_s1  ;;  %v2562_v6 = vrot.slane %v9522_v31, 5  ;;  %v2439_v30 = vrot.slane %v9522_v31, 2  ;;  %v2603_v10 = vrot.slane %v9522_v31, 6  ;;  %v2480_v43 = vrot.slane %v9522_v31, 3 }
 0x439   :  { %v9554_v14 = vpop.f32.mrb[98].mxu0  ;;  %v9557_v53 = vsel %vm428_vm2, %v2397_v40, %v2399_v58  ;;  %v2644_v37 = vrot.slane %v9522_v31, 7  ;;  %v2521_v5 = vrot.slane %v9522_v31, 4 }
 0x43a   :  { %v2364_v0 = vpop.f32.mrb[99].mxu0  ;;  %v6708_v59 = vpack.i.bf16 %v9557_v53, %v9516_v12  ;;  %v6713_v45 = vpack.i.bf16 %v9554_v14, %v9522_v31  ;;  %v9569_v4 = vsel %vm11009_vm4, %v2560_v21, %v2562_v6  ;;  %v2564_v22 = vrot.slane %v9554_v14, 5 }
 0x43b   :  { %6689 = vrot.lane.b32.xlu0 %v6688_v63, %s7357_s6  ;;  %v2401_v29 = vrot.slane %v9554_v14, 1  ;;  %v9578_v54 = vsel %vm11018_vm3, %v2437_v46, %v2439_v30  ;;  %v2441_v20 = vrot.slane %v9554_v14, 2  ;;  %v9582_v33 = vsel %vm11008_vm1, %v2601_v24, %v2603_v10 }
 0x43c   :  { %6684 = vrot.lane.b32.xlu1 %v6683_v25, %s7346_s2  ;;  %v9587_v16 = vsel %vm11009_vm4, %v2562_v6, %v2564_v22  ;;  %v2605_v39 = vrot.slane %v9554_v14, 6  ;;  %v9591_v28 = vsel %vm11016_vm5, %v2478_v60, %v2480_v43  ;;  %v2482_v48 = vrot.slane %v9554_v14, 3 }
 0x43d   :  { %v9594_v26 = vpop.f32.mrb[100].mxu0  ;;  %v6723_v36 = vpack.i.bf16 %v9587_v16, %v9569_v4  ;;  %v9599_v49 = vsel %vm428_vm2, %v2399_v58, %v2401_v29  ;;  %v9602_v55 = vsel %vm11018_vm3, %v2439_v30, %v2441_v20  ;;  %v9607_v19 = vsel %vm11015_vm6, %v2642_v13, %v2644_v37 }
 0x43e   :  { %v2369_v34 = vpop.f32.mrb[101].mxu0  ;;  %v6718_v61 = vpack.i.bf16 %v9599_v49, %v9557_v53  ;;  %v6733_v11 = vpack.i.bf16 %v9602_v55, %v9578_v54  ;;  %v9614_v21 = vsel %vm11008_vm1, %v2603_v10, %v2605_v39  ;;  %v9617_v40 = vsel %vm11016_vm5, %v2480_v43, %v2482_v48 }
 0x43f   :  { %6699 = vrot.lane.b32.xlu0 %v6698_v38, %s7358_s9  ;;  %v6728_v46 = vpack.i.bf16 %v9614_v21, %v9582_v33  ;;  %v6743_v24 = vpack.i.bf16 %v9617_v40, %v9591_v28  ;;  %v2646_v60 = vrot.slane %v9554_v14, 7  ;;  %v9628_v13 = vsel %vm11237_vm7, %v2519_v50, %v2521_v5  ;;  %vm11239_vm7 = vmmov %vm11236_vm0 }
 0x440   :  { %6694 = vrot.lane.b32.xlu1 %v6693_v7, %s7359_s5  ;;  %v2523_v52 = vrot.slane %v9554_v14, 4  ;;  %v2403_v12 = vrot.slane %v9594_v26, 1  ;;  %v2566_v57 = vrot.slane %v9594_v26, 5  ;;  %v2443_v56 = vrot.slane %v9594_v26, 2 }
 0x441   :  { %v9635_v9 = vpop.f32.mrb[102].mxu0  ;;  %v9638_v47 = vsel %vm11015_vm6, %v2644_v37, %v2646_v60  ;;  %v2607_v63 = vrot.slane %v9594_v26, 6  ;;  %v2484_v50 = vrot.slane %v9594_v26, 3  ;;  %v2648_v23 = vrot.slane %v9594_v26, 7 }
 0x442   :  { %v2374_v62 = vpop.f32.mrb[103].mxu0  ;;  %v6738_v51 = vpack.i.bf16 %v9638_v47, %v9607_v19  ;;  %v9646_v25 = vsel %vm11238_vm15, %v2521_v5, %v2523_v52  ;;  %v9649_v32 = vsel %vm428_vm2, %v2401_v29, %v2403_v12  ;;  %v6758_v41 = vpack.i.bf16 %v9635_v9, %v9594_v26  ;;  %vm11240_vm15 = vmmov %vm11236_vm0 }
 0x443   :  { %6704 = vrot.lane.b32.xlu0 %v6703_v44, %s7360_s28  ;;  %v6748_v38 = vpack.i.bf16 %v9646_v25, %v9628_v13  ;;  %v6753_v7 = vpack.i.bf16 %v9649_v32, %v9599_v49  ;;  %v9662_v58 = vsel %vm11009_vm4, %v2564_v22, %v2566_v57  ;;  %v2568_v6 = vrot.slane %v9635_v9, 5 }
 0x444   :  { %6709 = vrot.lane.b32.xlu1 %v6708_v59, %s7361_s29  ;;  %v2405_v30 = vrot.slane %v9635_v9, 1  ;;  %v9668_v10 = vsel %vm11018_vm3, %v2441_v20, %v2443_v56  ;;  %v2445_v8 = vrot.slane %v9635_v9, 2  ;;  %v9672_v2 = vsel %vm11008_vm1, %v2605_v39, %v2607_v63 }
 0x445   :  { %v9674_v44 = vpop.f32.mrb[104].mxu0  ;;  %v9677_v43 = vsel %vm11009_vm4, %v2566_v57, %v2568_v6  ;;  %v2609_v18 = vrot.slane %v9635_v9, 6  ;;  %v9681_v37 = vsel %vm11016_vm5, %v2482_v48, %v2484_v50  ;;  %v2486_v5 = vrot.slane %v9635_v9, 3 }
 0x446   :  { %v2379_v42 = vpop.f32.mrb[105].mxu0  ;;  %v6768_v0 = vpack.i.bf16 %v9677_v43, %v9662_v58  ;;  %v9687_v59 = vsel %vm428_vm2, %v2403_v12, %v2405_v30  ;;  %v9690_v4 = vsel %vm11018_vm3, %v2443_v56, %v2445_v8  ;;  %v9693_v22 = vsel %vm11015_vm6, %v2646_v60, %v2648_v23 }
 0x447   :  { %6714 = vrot.lane.b32.xlu0 %v6713_v45, %s7354_s0  ;;  %v6763_v17 = vpack.i.bf16 %v9687_v59, %v9649_v32  ;;  %v9704_v20 = vsel %vm11008_vm1, %v2607_v63, %v2609_v18  ;;  %v9707_v16 = vsel %vm11016_vm5, %v2484_v50, %v2486_v5  ;;  %v2650_v48 = vrot.slane %v9635_v9, 7 }
 0x448   :  { %6724 = vrot.lane.b32.xlu1 %v6723_v36, %s7355_s7  ;;  %v6773_v39 = vpack.i.bf16 %v9704_v20, %v9672_v2  ;;  %v6788_v45 = vpack.i.bf16 %v9707_v16, %v9681_v37  ;;  %v2525_v34 = vrot.slane %v9594_v26, 4  ;;  %v2527_v12 = vrot.slane %v9635_v9, 4 }
 0x449   :  { %v9716_v60 = vpop.f32.mrb[106].mxu0  ;;  %v2407_v57 = vrot.slane %v9674_v44, 1  ;;  %v2570_v56 = vrot.slane %v9674_v44, 5  ;;  %v2447_v36 = vrot.slane %v9674_v44, 2  ;;  %v2651_v63 = vsel %vm11015_vm6, %v2648_v23, %v2650_v48 }
 0x44a   :  { %v2526_v50 = vsel %vm11236_vm0, %v2523_v52, %v2525_v34  ;;  %v2384_v62 = vpop.f32.mrb[107].mxu0  ;;  %v2572_v2 = vrot.slane %v9716_v60, 5  ;;  %v6808_v37 = vpack.i.bf16 %v9716_v60, %v9674_v44  ;;  %v6783_v42 = vpack.i.bf16 %v2651_v63, %v9693_v22 }
 0x44b   :  { %6719 = vrot.lane.b32.xlu0 %v6718_v61, %s7356_s1  ;;  %v2528_v20 = vsel %vm11239_vm7, %v2525_v34, %v2527_v12  ;;  %v2408_v16 = vsel %vm428_vm2, %v2405_v30, %v2407_v57  ;;  %v2571_v23 = vsel %vm11009_vm4, %v2568_v6, %v2570_v56  ;;  %v2448_v22 = vsel %vm11018_vm3, %v2445_v8, %v2447_v36 }
 0x44c   :  { %6734 = vrot.lane.b32.xlu1 %v6733_v11, %s7357_s6  ;;  %v6793_v52 = vpack.i.bf16 %v2528_v20, %v2526_v50  ;;  %v6798_v62 = vpack.i.bf16 %v2408_v16, %v9687_v59  ;;  %v6803_v29 = vpack.i.bf16 %v2407_v57, %v2408_v16  ;;  %v2573_v53 = vsel %vm11009_vm4, %v2570_v56, %v2572_v2 }
 0x44d   :  { %v6813_v61 = vpack.i.bf16 %v2573_v53, %v2571_v23  ;;  %v2449_v34 = vrot.slane %v9716_v60, 2  ;;  %v2611_v30 = vrot.slane %v9674_v44, 6  ;;  %v2613_v6 = vrot.slane %v9716_v60, 6 }
 0x44e   :  { %v2488_v63 = vrot.slane %v9674_v44, 3  ;;  %v2490_v54 = vrot.slane %v9716_v60, 3  ;;  %v2652_v55 = vrot.slane %v9674_v44, 7  ;;  %v2654_v56 = vrot.slane %v9716_v60, 7 }
 0x44f   :  { %6729 = vrot.lane.b32.xlu0 %v6728_v46, %s7346_s2  ;;  %v2450_v11 = vsel %vm11018_vm3, %v2447_v36, %v2449_v34  ;;  %v2612_v8 = vsel %vm11008_vm1, %v2609_v18, %v2611_v30  ;;  %v2529_v50 = vrot.slane %v9674_v44, 4  ;;  %v2614_v20 = vsel %vm11008_vm1, %v2611_v30, %v2613_v6 }
 0x450   :  { %6744 = vrot.lane.b32.xlu1 %v6743_v24, %s7358_s9  ;;  %v6823_v2 = vpack.i.bf16 %v2450_v11, %v2448_v22  ;;  %v2489_v16 = vsel %vm11016_vm5, %v2486_v5, %v2488_v63  ;;  %v2491_v33 = vsel %vm11016_vm5, %v2488_v63, %v2490_v54  ;;  %v6818_v21 = vpack.i.bf16 %v2614_v20, %v2612_v8 }
 0x451   :  { %v6833_v46 = vpack.i.bf16 %v2491_v33, %v2489_v16  ;;  %v2653_v18 = vsel %vm11015_vm6, %v2650_v48, %v2652_v55  ;;  %v2655_v36 = vsel %vm11015_vm6, %v2652_v55, %v2654_v56  ;;  %v2530_v53 = vsel %vm11240_vm15, %v2527_v12, %v2529_v50 }
 0x452   :  { %v6828_v23 = vpack.i.bf16 %v2655_v36, %v2653_v18  ;;  %v2531_v34 = vrot.slane %v9716_v60, 4  ;;  %v2704_v28 = vrot.slane %v9716_v60, 1  ;;  %v11241_v49 = vpack.i.bf16 %v9690_v4, %v9668_v10 }
 0x453   :  { %6739 = vrot.lane.b32.xlu0 %v6738_v51, %s7359_s5  ;;  %vm11017_vm7 = vcmask 203776   ;;  %vm2739_vm15 = vcmask 408576   ;;  %vm2952_vm1 = vcmask 998400   ;;  %vm2766_vm4 = vcmask 1022976  }
 0x454   :  { %6749 = vrot.lane.b32.xlu1 %v6748_v38, %s7360_s28  ;;  %v2532_v40 = vsel %vm11236_vm0, %v2529_v50, %v2531_v34  ;;  %v2705_v24 = vsel %vm428_vm2, %v2407_v57, %v2704_v28  ;;  %vm2748_vm0 = vcmask 613376  }
 0x455   :  { %v6838_v5 = vpack.i.bf16 %v2532_v40, %v2530_v53  ;;  %v6843_v48 = vpack.i.bf16 %v2704_v28, %v2705_v24 }
 0x457   :  { %6754 = vrot.lane.b32.xlu0 %v6753_v7, %s7361_s29 }
 0x458   :  { %6759 = vrot.lane.b32.xlu1 %v6758_v41, %s7354_s0 }
 0x45b   :  { %6769 = vrot.lane.b32.xlu0 %v6768_v0, %s7355_s7 }
 0x45c   :  { %6764 = vrot.lane.b32.xlu1 %v6763_v17, %s7356_s1 }
 0x45f   :  { %6779 = vrot.lane.b32.xlu0 %v11241_v49, %s7357_s6 }
 0x460   :  { %6774 = vrot.lane.b32.xlu1 %v6773_v39, %s7346_s2 }
 0x463   :  { %6789 = vrot.lane.b32.xlu0 %v6788_v45, %s7358_s9 }
 0x464   :  { %6784 = vrot.lane.b32.xlu1 %v6783_v42, %s7359_s5 }
 0x467   :  { %6794 = vrot.lane.b32.xlu0 %v6793_v52, %s7360_s28 }
 0x468   :  { %6799 = vrot.lane.b32.xlu1 %v6798_v62, %s7361_s29 }
 0x46b   :  { %6804 = vrot.lane.b32.xlu0 %v6803_v29, %s7356_s1  ;;  %s7363_s1 = smov 16  }
 0x46c   :  { %6814 = vrot.lane.b32.xlu1 %v6813_v61, %s7355_s7 }
 0x46f   :  { %6809 = vrot.lane.b32.xlu0 %v6808_v37, %s7354_s0 }
 0x470   :  { %6824 = vrot.lane.b32.xlu1 %v6823_v2, %s7357_s6 }
 0x473   :  { %6819 = vrot.lane.b32.xlu0 %v6818_v21, %s7346_s2 }
 0x474   :  { %6834 = vrot.lane.b32.xlu1 %v6833_v46, %s7358_s9  ;;  %s7365_s9 = smov 122  }
 0x477   :  { %6829 = vrot.lane.b32.xlu0 %v6828_v23, %s7359_s5  ;;  %s11256_s5 = smov 44  }
 0x478   :  { %6839 = vrot.lane.b32.xlu1 %v6838_v5, %s7360_s28 }
 0x47b   :  { %6844 = vrot.lane.b32.xlu0 %v6843_v48, %s7361_s29  ;;  %s11245_s29 = sld [smem:[#allocation69_spill]] }
 0x4a6   :  { %v6670_v19 = vpop.permute.xlu1 %6669 }
 0x4a7   :  { %v6672_v60 = vunpack.i.h.bf16 %v6670_v19  ;;  %v6671_v12 = vunpack.i.l.bf16 %v6670_v19 }
 0x4a9   :  { %v6680_v13 = vpop.permute.xlu0 %6679 }
 0x4aa   :  { %v6675_v47 = vpop.permute.xlu1 %6674  ;;  %v6682_v10 = vunpack.i.h.bf16 %v6680_v13  ;;  %v6681_v43 = vunpack.i.l.bf16 %v6680_v13 }
 0x4ab   :  { %v6677_v38 = vunpack.i.h.bf16 %v6675_v47  ;;  %v6676_v7 = vunpack.i.l.bf16 %v6675_v47 }
 0x4ad   :  { %v6690_v51 = vpop.permute.xlu0 %6689  ;;  %v2732_v42 = vsel %vm11017_vm7, %v9462_v3, %v6677_v38  ;;  %v2731_v52 = vsel %vm11017_vm7, %v9455_v15, %v6676_v7 }
 0x4ae   :  { %v6685_v25 = vpop.permute.xlu1 %6684  ;;  %v6692_v0 = vunpack.i.h.bf16 %v6690_v51  ;;  %v6691_v59 = vunpack.i.l.bf16 %v6690_v51 }
 0x4af   :  { %v6687_v32 = vunpack.i.h.bf16 %v6685_v25  ;;  %v6686_v41 = vunpack.i.l.bf16 %v6685_v25 }
 0x4b0   :  { %v2740_v30 = vsel %vm2739_vm15, %v2731_v52, %v6691_v59  ;;  %v2741_v6 = vsel %vm2739_vm15, %v2732_v42, %v6692_v0 }
 0x4b1   :  { %v6700_v58 = vpop.permute.xlu0 %6699  ;;  %v2776_v57 = vsel %vm1336_vm8, %v6682_v10, %v6687_v32  ;;  %v2775_v37 = vsel %vm1336_vm8, %v6681_v43, %v6686_v41 }
 0x4b2   :  { %v6695_v4 = vpop.permute.xlu1 %6694  ;;  %v6702_v17 = vunpack.i.h.bf16 %v6700_v58  ;;  %v6701_v29 = vunpack.i.l.bf16 %v6700_v58 }
 0x4b3   :  { %v6697_v39 = vunpack.i.h.bf16 %v6695_v4  ;;  %v6696_v45 = vunpack.i.l.bf16 %v6695_v4 }
 0x4b4   :  { %v2749_v11 = vsel %vm2748_vm0, %v2740_v30, %v6701_v29  ;;  %v2750_v8 = vsel %vm2748_vm0, %v2741_v6, %v6702_v17 }
 0x4b5   :  { %v2784_v62 = vsel %vm2783_vm10, %v2775_v37, %v6696_v45  ;;  %v2785_v61 = vsel %vm2783_vm10, %v2776_v57, %v6697_v39  ;;  %v6705_v22 = vpop.permute.xlu0 %6704 }
 0x4b6   :  { %v6707_v63 = vunpack.i.h.bf16 %v6705_v22  ;;  %v6706_v54 = vunpack.i.l.bf16 %v6705_v22  ;;  %v6710_v55 = vpop.permute.xlu1 %6709  ;;  %v2793_v2 = vsel %vm2792_vm11, %v2784_v62, %v6671_v12  ;;  %v2794_v20 = vsel %vm2792_vm11, %v2785_v61, %v6672_v60 }
 0x4b7   :  { %v6712_v3 = vunpack.i.h.bf16 %v6710_v55  ;;  %v6711_v56 = vunpack.i.l.bf16 %v6710_v55 }
 0x4b8   :  { %v2758_v15 = vsel %vm2757_vm13, %v2749_v11, %v6706_v54  ;;  %v2759_v50 = vsel %vm2757_vm13, %v2750_v8, %v6707_v63 }
 0x4b9   :  { %v6715_v16 = vpop.permute.xlu0 %6714  ;;  %v2802_v33 = vsel %vm2801_vm9, %v2793_v2, %v6711_v56  ;;  %v2803_v21 = vsel %vm2801_vm9, %v2794_v20, %v6712_v3  ;;  %v2767_v46 = vsel %vm2766_vm4, %v2758_v15, %v6681_v43  ;;  %v2768_v18 = vsel %vm2766_vm4, %v2759_v50, %v6682_v10 }
 0x4ba   :  { %v6725_v36 = vpop.permute.xlu1 %6724  ;;  %v2811_v23 = vpack.c.bf16 %v2803_v21, %v2802_v33  ;;  %v2810_v53 = vpack.c.bf16 %v2768_v18, %v2767_v46  ;;  %v6717_v57 = vunpack.i.h.bf16 %v6715_v16  ;;  %v6716_v37 = vunpack.i.l.bf16 %v6715_v16 }
 0x4bb   :  { %v6727_v38 = vunpack.i.h.bf16 %v6725_v36  ;;  %v6726_v7 = vunpack.i.l.bf16 %v6725_v36 }
 0x4bc   :  { %5613 = vmatprep.mubr.msk.bf16.mxu1 %vm2952_vm1, %v2811_v23 }
 0x4bd   :  { %3001 = vmatmul.mubr.bf16.vlgmr.msra.gmra.mrb[0].mxu1 %v2810_v53  ;;  %v6720_v34 = vpop.permute.xlu0 %6719 }
 0x4be   :  { %v6735_v28 = vpop.permute.xlu1 %6734  ;;  %v6722_v40 = vunpack.i.h.bf16 %v6720_v34  ;;  %v6721_v24 = vunpack.i.l.bf16 %v6720_v34 }
 0x4bf   :  { %v6737_v48 = vunpack.i.h.bf16 %v6735_v28  ;;  %v6736_v49 = vunpack.i.l.bf16 %v6735_v28 }
 0x4c0   :  { %v2734_v13 = vsel %vm11017_vm7, %v9522_v31, %v6722_v40  ;;  %v2733_v47 = vsel %vm11017_vm7, %v9490_v1, %v6721_v24 }
 0x4c1   :  { %v6730_v5 = vpop.permute.xlu0 %6729  ;;  %v2742_v10 = vsel %vm2739_vm15, %v2733_v47, %v6736_v49  ;;  %v2743_v43 = vsel %vm2739_vm15, %v2734_v13, %v6737_v48 }
 0x4c2   :  { %v6745_v19 = vpop.permute.xlu1 %6744  ;;  %v6732_v51 = vunpack.i.h.bf16 %v6730_v5  ;;  %v6731_v25 = vunpack.i.l.bf16 %v6730_v5 }
 0x4c3   :  { %v6747_v32 = vunpack.i.h.bf16 %v6745_v19  ;;  %v6746_v41 = vunpack.i.l.bf16 %v6745_v19 }
 0x4c4   :  { %v2778_v17 = vsel %vm1336_vm8, %v6727_v38, %v6732_v51  ;;  %v2777_v31 = vsel %vm1336_vm8, %v6726_v7, %v6731_v25 }
 0x4c5   :  { %v6740_v58 = vpop.permute.xlu0 %6739  ;;  %v2751_v39 = vsel %vm2748_vm0, %v2742_v10, %v6746_v41  ;;  %v2752_v45 = vsel %vm2748_vm0, %v2743_v43, %v6747_v32 }
 0x4c6   :  { %v6742_v0 = vunpack.i.h.bf16 %v6740_v58  ;;  %v6741_v59 = vunpack.i.l.bf16 %v6740_v58  ;;  %v6750_v4 = vpop.permute.xlu1 %6749 }
 0x4c7   :  { %v6752_v29 = vunpack.i.h.bf16 %v6750_v4  ;;  %v6751_v1 = vunpack.i.l.bf16 %v6750_v4 }
 0x4c8   :  { %v2786_v60 = vsel %vm2783_vm10, %v2777_v31, %v6741_v59  ;;  %v2787_v12 = vsel %vm2783_vm10, %v2778_v17, %v6742_v0 }
 0x4c9   :  { %v2760_v42 = vsel %vm2757_vm13, %v2751_v39, %v6751_v1  ;;  %v2761_v52 = vsel %vm2757_vm13, %v2752_v45, %v6752_v29  ;;  %v6755_v62 = vpop.permute.xlu0 %6754  ;;  %v2795_v54 = vsel %vm2792_vm11, %v2786_v60, %v6716_v37  ;;  %v2796_v55 = vsel %vm2792_vm11, %v2787_v12, %v6717_v57 }
 0x4ca   :  { %v6757_v61 = vunpack.i.h.bf16 %v6755_v62  ;;  %v6756_v22 = vunpack.i.l.bf16 %v6755_v62  ;;  %v6760_v30 = vpop.permute.xlu1 %6759  ;;  %v2769_v6 = vsel %vm2766_vm4, %v2760_v42, %v6726_v7  ;;  %v2770_v63 = vsel %vm2766_vm4, %v2761_v52, %v6727_v38 }
 0x4cb   :  { %v2812_v11 = vpack.c.bf16 %v2770_v63, %v2769_v6  ;;  %v6762_v49 = vunpack.i.h.bf16 %v6760_v30  ;;  %v6761_v19 = vunpack.i.l.bf16 %v6760_v30 }
 0x4cc   :  { %v2805_v8 = vsel %vm2801_vm9, %v2796_v55, %v6757_v61  ;;  %v2804_v3 = vsel %vm2801_vm9, %v2795_v54, %v6756_v22 }
 0x4cd   :  { %v2813_v56 = vpack.c.bf16 %v2805_v8, %v2804_v3  ;;  %v6770_v15 = vpop.permute.xlu0 %6769 }
 0x4ce   :  { %v6765_v50 = vpop.permute.xlu1 %6764  ;;  %v6772_v36 = vunpack.i.h.bf16 %v6770_v15  ;;  %v6771_v23 = vunpack.i.l.bf16 %v6770_v15 }
 0x4cf   :  { %5614 = vmatprep.mubr.msk.bf16.mxu1 %vm2952_vm1, %v2813_v56  ;;  %v6767_v21 = vunpack.i.h.bf16 %v6765_v50  ;;  %v6766_v46 = vunpack.i.l.bf16 %v6765_v50 }
 0x4d0   :  { %3009 = vmatmul.mubr.bf16.gmra.mrb[4].mxu1 %v2812_v11 }
 0x4d1   :  { %v6780_v2 = vpop.permute.xlu0 %6779  ;;  %v2736_v51 = vsel %vm11017_vm7, %v9594_v26, %v6767_v21  ;;  %v2735_v25 = vsel %vm11017_vm7, %v9554_v14, %v6766_v46 }
 0x4d2   :  { %v6775_v20 = vpop.permute.xlu1 %6774  ;;  %v6782_v53 = vunpack.i.h.bf16 %v6780_v2  ;;  %v6781_v34 = vunpack.i.l.bf16 %v6780_v2 }
 0x4d3   :  { %v6777_v16 = vunpack.i.h.bf16 %v6775_v20  ;;  %v6776_v33 = vunpack.i.l.bf16 %v6775_v20 }
 0x4d4   :  { %v2744_v7 = vsel %vm2739_vm15, %v2735_v25, %v6781_v34  ;;  %v2745_v58 = vsel %vm2739_vm15, %v2736_v51, %v6782_v53 }
 0x4d5   :  { %v6790_v18 = vpop.permute.xlu0 %6789  ;;  %v2780_v13 = vsel %vm1336_vm8, %v6772_v36, %v6777_v16  ;;  %v2779_v47 = vsel %vm1336_vm8, %v6771_v23, %v6776_v33 }
 0x4d6   :  { %v6785_v28 = vpop.permute.xlu1 %6784  ;;  %v6792_v40 = vunpack.i.h.bf16 %v6790_v18  ;;  %v6791_v24 = vunpack.i.l.bf16 %v6790_v18 }
 0x4d7   :  { %v6787_v5 = vunpack.i.h.bf16 %v6785_v28  ;;  %v6786_v48 = vunpack.i.l.bf16 %v6785_v28 }
 0x4d8   :  { %v2753_v59 = vsel %vm2748_vm0, %v2744_v7, %v6791_v24  ;;  %v2754_v4 = vsel %vm2748_vm0, %v2745_v58, %v6792_v40 }
 0x4d9   :  { %v2788_v32 = vsel %vm2783_vm10, %v2779_v47, %v6786_v48  ;;  %v2789_v41 = vsel %vm2783_vm10, %v2780_v13, %v6787_v5  ;;  %v6795_v38 = vpop.permute.xlu0 %6794 }
 0x4da   :  { %v6797_v10 = vunpack.i.h.bf16 %v6795_v38  ;;  %v6796_v43 = vunpack.i.l.bf16 %v6795_v38  ;;  %v6800_v0 = vpop.permute.xlu1 %6799  ;;  %v2797_v29 = vsel %vm2792_vm11, %v2788_v32, %v6761_v19  ;;  %v2798_v1 = vsel %vm2792_vm11, %v2789_v41, %v6762_v49 }
 0x4db   :  { %v6802_v26 = vunpack.i.h.bf16 %v6800_v0  ;;  %v6801_v17 = vunpack.i.l.bf16 %v6800_v0  ;;  %v11242_v0 = vmov 0.0  }
 0x4dc   :  { %v2762_v14 = vsel %vm2757_vm13, %v2753_v59, %v6796_v43  ;;  %v2763_v31 = vsel %vm2757_vm13, %v2754_v4, %v6797_v10  ;;  %v9901_v4 = vld [vmem:[%s11243_s8] ss:$0 sm:$0xff] }
 0x4dd   :  { %v2807_v39 = vsel %vm2801_vm9, %v2798_v1, %v6802_v26  ;;  %v2806_v45 = vsel %vm2801_vm9, %v2797_v29, %v6801_v17  ;;  %v6805_v60 = vpop.permute.xlu0 %6804  ;;  %v2771_v12 = vsel %vm2766_vm4, %v2762_v14, %v6771_v23  ;;  %v2772_v57 = vsel %vm2766_vm4, %v2763_v31, %v6772_v36 }
 0x4de   :  { %v2815_v37 = vpack.c.bf16 %v2807_v39, %v2806_v45  ;;  %v6815_v42 = vpop.permute.xlu1 %6814  ;;  %v2814_v52 = vpack.c.bf16 %v2772_v57, %v2771_v12  ;;  %v6807_v22 = vunpack.i.h.bf16 %v6805_v60  ;;  %v6806_v30 = vunpack.i.l.bf16 %v6805_v60 }
 0x4df   :  { %v6817_v2 = vunpack.i.h.bf16 %v6815_v42  ;;  %v6816_v20 = vunpack.i.l.bf16 %v6815_v42 }
 0x4e0   :  { %5615 = vmatprep.mubr.msk.bf16.mxu1 %vm2952_vm1, %v2815_v37  ;;  %v2738_v15 = vsel %vm11017_vm7, %v9674_v44, %v6807_v22  ;;  %v2737_v50 = vsel %vm11017_vm7, %v9635_v9, %v6806_v30  ;;  %vm11260_vm7 = vcmask 539648  }
 0x4e1   :  { %3017 = vmatmul.mubr.bf16.gmra.mrb[8].mxu1 %v2814_v52  ;;  %v6810_v62 = vpop.permute.xlu0 %6809 }
 0x4e2   :  { %v6825_v61 = vpop.permute.xlu1 %6824  ;;  %v6812_v5 = vunpack.i.h.bf16 %v6810_v62  ;;  %v6811_v48 = vunpack.i.l.bf16 %v6810_v62 }
 0x4e3   :  { %v6827_v63 = vunpack.i.h.bf16 %v6825_v61  ;;  %v6826_v54 = vunpack.i.l.bf16 %v6825_v61 }
 0x4e5   :  { %v6820_v6 = vpop.permute.xlu0 %6819  ;;  %v2747_v33 = vsel %vm2739_vm15, %v2738_v15, %v6827_v63  ;;  %v2746_v21 = vsel %vm2739_vm15, %v2737_v50, %v6826_v54 }
 0x4e6   :  { %v6835_v55 = vpop.permute.xlu1 %6834  ;;  %v6822_v11 = vunpack.i.h.bf16 %v6820_v6  ;;  %v6821_v8 = vunpack.i.l.bf16 %v6820_v6 }
 0x4e7   :  { %v6837_v3 = vunpack.i.h.bf16 %v6835_v55  ;;  %v6836_v56 = vunpack.i.l.bf16 %v6835_v55 }
 0x4e8   :  { %v2781_v23 = vsel %vm1336_vm8, %v6816_v20, %v6821_v8  ;;  %v2782_v53 = vsel %vm1336_vm8, %v6817_v2, %v6822_v11 }
 0x4e9   :  { %v6830_v16 = vpop.permute.xlu0 %6829  ;;  %v2755_v44 = vsel %vm2748_vm0, %v2746_v21, %v6836_v56  ;;  %v2756_v9 = vsel %vm2748_vm0, %v2747_v33, %v6837_v3 }
 0x4ea   :  { %v6832_v46 = vunpack.i.h.bf16 %v6830_v16  ;;  %v6831_v18 = vunpack.i.l.bf16 %v6830_v16  ;;  %v6840_v36 = vpop.permute.xlu1 %6839 }
 0x4eb   :  { %v6842_v34 = vunpack.i.h.bf16 %v6840_v36  ;;  %v6841_v28 = vunpack.i.l.bf16 %v6840_v36 }
 0x4ec   :  { %v2790_v40 = vsel %vm2783_vm10, %v2781_v23, %v6831_v18  ;;  %v2791_v24 = vsel %vm2783_vm10, %v2782_v53, %v6832_v46  ;;  %vm7362_vm10 = vmmov 0  }
 0x4ed   :  { %v2764_v49 = vsel %vm2757_vm13, %v2755_v44, %v6841_v28  ;;  %v2765_v19 = vsel %vm2757_vm13, %v2756_v9, %v6842_v34  ;;  %v6845_v13 = vpop.permute.xlu0 %6844  ;;  %v2799_v41 = vsel %vm2792_vm11, %v2790_v40, %v6811_v48  ;;  %v2800_v38 = vsel %vm2792_vm11, %v2791_v24, %v6812_v5  ;;  %5954 = vmatprep.mubr.msk.f32.mxu0 %vm7362_vm10, %v11242_v0 }
 0x4ee   :  { %v6847_v47 = vunpack.i.h.bf16 %v6845_v13  ;;  %v6846_v51 = vunpack.i.l.bf16 %v6845_v13  ;;  %v2773_v25 = vsel %vm2766_vm4, %v2764_v49, %v6816_v20  ;;  %v2774_v32 = vsel %vm2766_vm4, %v2765_v19, %v6817_v2 }
 0x4ef   :  { %v2816_v7 = vpack.c.bf16 %v2774_v32, %v2773_v25 }
 0x4f0   :  { %v2808_v58 = vsel %vm2801_vm9, %v2799_v41, %v6846_v51  ;;  %v2809_v10 = vsel %vm2801_vm9, %v2800_v38, %v6847_v47 }
 0x4f1   :  { %v2817_v43 = vpack.c.bf16 %v2809_v10, %v2808_v58 }
 0x4f3   :  { %5616 = vmatprep.mubr.msk.bf16.mxu1 %vm2952_vm1, %v2817_v43 }
 0x4f4   :  { %3025 = vmatmul.mubr.bf16.gmra.mrb[12].mxu1 %v2816_v7 }
 0x590   :  { %v5835_v59 = vpop.f32.mrb[0].mxu1 }
 0x591   :  { %v5836_v26 = vpop.f32.mrb[1].mxu1 }
 0x592   :  { %v5837_v17 = vadd.f32 %v5836_v26, %v5835_v59  ;;  %v5838_v14 = vpop.f32.mrb[2].mxu1  ;;  %v9916_v59 = vld [vmem:[%s11244_s27] ss:$0 sm:$0xff]  ;;  %s7364_s27 = smov 94  }
 0x593   :  { %v5839_v31 = vpop.f32.mrb[3].mxu1 }
 0x594   :  { %v3003_v29 = vadd.f32 %v5837_v17, %v9901_v4  ;;  %v5840_v1 = vadd.f32 %v5839_v31, %v5838_v14 }
 0x596   :  { %v3041_v39 = vmin.f32 %v3003_v29, 0.0  ;;  %v3006_v45 = vadd.f32 %v5840_v1, %v9901_v4  ;;  %vm3033_vm4 = vcmp.gt.f32.partialorder %v3003_v29, 0.0 }
 0x598   :  { %v3049_v60 = vmul.f32 1.442695, %v3041_v39  ;;  %v3042_v12 = vmin.f32 %v3006_v45, 0.0  ;;  %vm3034_vm9 = vcmp.gt.f32.partialorder %v3006_v45, 0.0 }
 0x59a   :  { %7277 = vpow2.f32 %v3049_v60  ;;  %v3051_v57 = vmul.f32 1.442695, %v3042_v12  ;;  %v9924_v60 = vld [vmem:[%s11245_s29] ss:$0 sm:$0xff]  ;;  %s11257_s29 = smov 66  }
 0x59c   :  { %7279 = vpow2.f32 %v3051_v57 }
 0x5a3   :  { %v5841_v37 = vpop.f32.mrb[4].mxu1 }
 0x5a4   :  { %v7278_v42 = vpop.eup %7277  ;;  %v5842_v52 = vpop.f32.mrb[5].mxu1 }
 0x5a5   :  { %v5617_v62 = vadd.f32 -1.0, %v7278_v42  ;;  %v5843_v61 = vadd.f32 %v5842_v52, %v5841_v37  ;;  %v5844_v22 = vpop.f32.mrb[6].mxu1 }
 0x5a6   :  { %v7280_v30 = vpop.eup %7279  ;;  %v5845_v6 = vpop.f32.mrb[7].mxu1 }
 0x5a7   :  { %v3073_v63 = vsel %vm3033_vm4, %v3003_v29, %v5617_v62  ;;  %v5618_v54 = vadd.f32 -1.0, %v7280_v30  ;;  %v3011_v55 = vadd.f32 %v5843_v61, %v9901_v4  ;;  %v5846_v11 = vadd.f32 %v5845_v6, %v5844_v22 }
 0x5a8   :  { %v3089_v15 = vrot.slane %v3073_v63, 1  ;;  %v3120_v50 = vrot.slane %v3073_v63, 2 }
 0x5a9   :  { %v3074_v8 = vsel %vm3034_vm9, %v3006_v45, %v5618_v54  ;;  %v3043_v3 = vmin.f32 %v3011_v55, 0.0  ;;  %v3014_v56 = vadd.f32 %v5846_v11, %v9901_v4  ;;  %vm3035_vm0 = vcmp.gt.f32.partialorder %v3011_v55, 0.0 }
 0x5aa   :  { %v3090_v2 = vrot.slane %v3074_v8, 1  ;;  %v3121_v20 = vrot.slane %v3074_v8, 2 }
 0x5ab   :  { %v3053_v16 = vmul.f32 1.442695, %v3043_v3  ;;  %v3044_v33 = vmin.f32 %v3014_v56, 0.0  ;;  %vm3036_vm4 = vcmp.gt.f32.partialorder %v3014_v56, 0.0 }
 0x5ac   :  { %v3091_v21 = vsel %vm428_vm2, %v3089_v15, %v3090_v2  ;;  %v3122_v46 = vsel %vm11018_vm3, %v3120_v50, %v3121_v20 }
 0x5ad   :  { %v3112_v18 = vmax.f32 %v3073_v63, %v3091_v21  ;;  %7281 = vpow2.f32 %v3053_v16  ;;  %v3055_v36 = vmul.f32 1.442695, %v3044_v33 }
 0x5af   :  { %7283 = vpow2.f32 %v3055_v36  ;;  %v3143_v23 = vmax.f32 %v3112_v18, %v3122_v46 }
 0x5b1   :  { %v3163_v45 = vmul.f32 %v9916_v59, %v3143_v23 }
 0x5b3   :  { %v3178_v37 = vadd.f32 %v9924_v60, %v3163_v45 }
 0x5b4   :  { %v5847_v53 = vpop.f32.mrb[8].mxu1 }
 0x5b5   :  { %v5848_v34 = vpop.f32.mrb[9].mxu1 }
 0x5b6   :  { %v5849_v28 = vadd.f32 %v5848_v34, %v5847_v53  ;;  %v5850_v44 = vpop.f32.mrb[10].mxu1 }
 0x5b7   :  { %v7282_v9 = vpop.eup %7281  ;;  %v5851_v40 = vpop.f32.mrb[11].mxu1 }
 0x5b8   :  { %v5619_v24 = vadd.f32 -1.0, %v7282_v9  ;;  %v3019_v5 = vadd.f32 %v5849_v28, %v9901_v4  ;;  %v5852_v48 = vadd.f32 %v5851_v40, %v5850_v44 }
 0x5b9   :  { %v7284_v49 = vpop.eup %7283 }
 0x5ba   :  { %v3075_v19 = vsel %vm3035_vm0, %v3011_v55, %v5619_v24  ;;  %v5620_v13 = vadd.f32 -1.0, %v7284_v49  ;;  %v3045_v47 = vmin.f32 %v3019_v5, 0.0  ;;  %v3022_v32 = vadd.f32 %v5852_v48, %v9901_v4 }
 0x5bb   :  { %v3092_v51 = vrot.slane %v3075_v19, 1  ;;  %v3123_v25 = vrot.slane %v3075_v19, 2  ;;  %vm3037_vm9 = vcmp.gt.f32.partialorder %v3019_v5, 0.0 }
 0x5bc   :  { %v3076_v41 = vsel %vm3036_vm4, %v3014_v56, %v5620_v13  ;;  %v3057_v38 = vmul.f32 1.442695, %v3045_v47  ;;  %v3046_v17 = vmin.f32 %v3022_v32, 0.0  ;;  %vm3038_vm0 = vcmp.gt.f32.partialorder %v3022_v32, 0.0 }
 0x5bd   :  { %v3093_v7 = vsel %vm428_vm2, %v3090_v2, %v3092_v51  ;;  %v3124_v58 = vsel %vm11018_vm3, %v3121_v20, %v3123_v25  ;;  %v3094_v10 = vrot.slane %v3076_v41, 1  ;;  %v3125_v43 = vrot.slane %v3076_v41, 2 }
 0x5be   :  { %v3113_v26 = vmax.f32 %v3074_v8, %v3093_v7  ;;  %7285 = vpow2.f32 %v3057_v38  ;;  %v3059_v1 = vmul.f32 1.442695, %v3046_v17 }
 0x5bf   :  { %v3095_v14 = vsel %vm428_vm2, %v3092_v51, %v3094_v10  ;;  %v3126_v31 = vsel %vm11018_vm3, %v3123_v25, %v3125_v43 }
 0x5c0   :  { %v3114_v29 = vmax.f32 %v3075_v19, %v3095_v14  ;;  %v3144_v39 = vmax.f32 %v3113_v26, %v3124_v58  ;;  %7287 = vpow2.f32 %v3059_v1 }
 0x5c2   :  { %v3164_v12 = vmul.f32 %v9916_v59, %v3144_v39  ;;  %v3145_v57 = vmax.f32 %v3114_v29, %v3126_v31 }
 0x5c4   :  { %v3179_v42 = vadd.f32 %v9924_v60, %v3164_v12  ;;  %v3165_v28 = vmul.f32 %v9916_v59, %v3145_v57 }
 0x5c6   :  { %v6058_v52 = vpack.c.bf16 %v3179_v42, %v3178_v37 }
 0x5c7   :  { %v5853_v62 = vpop.f32.mrb[12].mxu1 }
 0x5c8   :  { %v7286_v61 = vpop.eup %7285  ;;  %v5854_v22 = vpop.f32.mrb[13].mxu1  ;;  %6059 = vmatpush3.bf16.msra.mxu0 %v6058_v52 }
 0x5c9   :  { %v5621_v30 = vadd.f32 -1.0, %v7286_v61  ;;  %v5855_v6 = vadd.f32 %v5854_v22, %v5853_v62  ;;  %v5856_v63 = vpop.f32.mrb[14].mxu1  ;;  %6060 = vmatprep.subr.bf16.mxu0 %v11230_v35 }
 0x5ca   :  { %v5857_v54 = vpop.f32.mrb[15].mxu1  ;;  %v7288_v3 = vpop.eup %7287 }
 0x5cb   :  { %v3077_v55 = vsel %vm3037_vm9, %v3019_v5, %v5621_v30  ;;  %v3027_v11 = vadd.f32 %v5855_v6, %v9901_v4  ;;  %v5858_v8 = vadd.f32 %v5857_v54, %v5856_v63  ;;  %v5622_v50 = vadd.f32 -1.0, %v7288_v3  ;;  %v7013_v3 = vld [vmem:[%s10920_s12 + $0x40] sm:$0xff]  }
 0x5cc   :  { %v3096_v56 = vrot.slane %v3077_v55, 1  ;;  %v3127_v15 = vrot.slane %v3077_v55, 2  ;;  %v3180_v5 = vadd.f32 %v9924_v60, %v3165_v28  ;;  %5872 = vmatprep.subr.bf16.mxu1 %v7013_v3  ;;  %v7028_v28 = vld [vmem:[%s10920_s12 + $0xd8] sm:$0xff]   ;;  %v5813_v54 = vld [vmem:[%s10931_s23] ss:$0 sm:$0xff] }
 0x5cd   :  { %v3047_v2 = vmin.f32 %v3027_v11, 0.0  ;;  %v3030_v20 = vadd.f32 %v5858_v8, %v9901_v4  ;;  %v3078_v46 = vsel %vm3038_vm0, %v3022_v32, %v5622_v50  ;;  %vm3039_vm4 = vcmp.gt.f32.partialorder %v3027_v11, 0.0  ;;  %vm9956_vm0 = vmpackc.low %vm11016_vm5, %vm11014_vm12  ;;  %v3155_v8 = vld [vmem:[%s10919_s11 + $0x20] sm:$0xf] }
 0x5ce   :  { %v3097_v16 = vsel %vm428_vm2, %v3094_v10, %v3096_v56  ;;  %v3128_v33 = vsel %vm11018_vm3, %v3125_v43, %v3127_v15  ;;  %v3098_v36 = vrot.slane %v3078_v46, 1  ;;  %v3129_v23 = vrot.slane %v3078_v46, 2  ;;  %v7016_v50 = vld [vmem:[%s10920_s12 + $0xc0] sm:$0xff]  }
 0x5cf   :  { %v3115_v21 = vmax.f32 %v3076_v41, %v3097_v16  ;;  %v3061_v18 = vmul.f32 1.442695, %v3047_v2  ;;  %v3048_v53 = vmin.f32 %v3030_v20, 0.0  ;;  %vm3040_vm9 = vcmp.gt.f32.partialorder %v3030_v20, 0.0  ;;  %v7018_v2 = vld [vmem:[%s10920_s12 + $0x80] sm:$0xff]   ;;  %v7017_v16 = vld [vmem:[%s10920_s12 + $0x8] sm:$0xff]  }
 0x5d0   :  { %v3099_v44 = vsel %vm428_vm2, %v3096_v56, %v3098_v36  ;;  %v3130_v9 = vsel %vm11018_vm3, %v3127_v15, %v3129_v23  ;;  %v7014_v56 = vld [vmem:[%s10920_s12] sm:$0xff]   ;;  %v7015_v15 = vld [vmem:[%s10920_s12 + $0x48] sm:$0xff]   ;;  %vm11250_vm12 = vcmask 1041408  }
 0x5d1   :  { %7289 = vpow2.f32 %v3061_v18  ;;  %v3146_v34 = vmax.f32 %v3115_v21, %v3128_v33  ;;  %v3063_v4 = vmul.f32 1.442695, %v3048_v53  ;;  %v3116_v40 = vmax.f32 %v3077_v55, %v3099_v44  ;;  %v3153_v55 = vld [vmem:[%s10919_s11 + $0x10] sm:$0xff]  ;;  %5873 = vmatpush3.bf16.msra.mxu1 %v7014_v56  ;;  %v7022_v21 = vld [vmem:[%s10920_s12 + $0x88] sm:$0xff]   ;;  %v7025_v53 = vld [vmem:[%s10920_s12 + $0x18] sm:$0xff]  }
 0x5d2   :  { %5874 = vmatprep.subr.bf16.mxu1 %v7015_v15  ;;  %v7019_v33 = vld [vmem:[%s10920_s12 + $0x50] sm:$0xff]  }
 0x5d3   :  { %v3166_v24 = vmul.f32 %v9916_v59, %v3146_v34  ;;  %7291 = vpow2.f32 %v3063_v4  ;;  %v3147_v49 = vmax.f32 %v3116_v40, %v3130_v9  ;;  %v7021_v18 = vld [vmem:[%s10920_s12 + $0x10] sm:$0xff]   ;;  %v7027_v34 = vld [vmem:[%s10920_s12 + $0x60] sm:$0xff]   ;;  %v7030_v40 = vld [vmem:[%s10920_s12 + $0x98] sm:$0xff]  }
 0x5d4   :  { %v7029_v4 = vld [vmem:[%s10920_s12 + $0x20] sm:$0xff]   ;;  %v7037_v15 = vld [vmem:[%s10920_s12 + $0x30] sm:$0xff]  }
 0x5d5   :  { %v3181_v48 = vadd.f32 %v9924_v60, %v3166_v24  ;;  %v3167_v14 = vmul.f32 %v9916_v59, %v3147_v49  ;;  %5875 = vmatpush3.bf16.msra.mxu1 %v7017_v16 }
 0x5d6   :  { %5876 = vmatprep.subr.bf16.mxu1 %v7019_v33 }
 0x5d7   :  { %v6061_v19 = vpack.c.bf16 %v3181_v48, %v3180_v5  ;;  %v3182_v52 = vadd.f32 %v9924_v60, %v3167_v14 }
 0x5d9   :  { %6062 = vmatpush3.bf16.msra.mxu0 %v6061_v19  ;;  %5877 = vmatpush3.bf16.msra.mxu1 %v7021_v18 }
 0x5da   :  { %6063 = vmatprep.subr.bf16.mxu0 %v11230_v35 }
 0x5db   :  { %v7290_v13 = vpop.eup %7289 }
 0x5dc   :  { %v5623_v47 = vadd.f32 -1.0, %v7290_v13 }
 0x5dd   :  { %v7292_v51 = vpop.eup %7291 }
 0x5de   :  { %v3079_v25 = vsel %vm3039_vm4, %v3027_v11, %v5623_v47  ;;  %v5624_v38 = vadd.f32 -1.0, %v7292_v51  ;;  %vm3186_vm4 = vcmask 498688   ;;  %v3154_v11 = vld [vmem:[%s10919_s11 + $0x18] sm:$0xff]  ;;  %v7031_v51 = vld [vmem:[%s10920_s12 + $0x68] sm:$0xff]  }
 0x5df   :  { %v3100_v32 = vrot.slane %v3079_v25, 1  ;;  %v3131_v41 = vrot.slane %v3079_v25, 2 }
 0x5e0   :  { %v3080_v10 = vsel %vm3040_vm9, %v3030_v20, %v5624_v38  ;;  %v7020_v20 = vld [vmem:[%s10920_s12 + $0xc8] sm:$0xff]   ;;  %vm11248_vm9 = vcmask 1043456  }
 0x5e1   :  { %v3101_v7 = vsel %vm428_vm2, %v3098_v36, %v3100_v32  ;;  %v3132_v58 = vsel %vm11018_vm3, %v3129_v23, %v3131_v41  ;;  %v3102_v26 = vrot.slane %v3080_v10, 1  ;;  %v3133_v17 = vrot.slane %v3080_v10, 2  ;;  %v7023_v36 = vld [vmem:[%s10920_s12 + $0x58] sm:$0xff]   ;;  %v7026_v23 = vld [vmem:[%s10920_s12 + $0x90] sm:$0xff]  }
 0x5e2   :  { %v3117_v43 = vmax.f32 %v3078_v46, %v3101_v7  ;;  %v7024_v46 = vld [vmem:[%s10920_s12 + $0xd0] sm:$0xff]   ;;  %5878 = vmatprep.subr.bf16.mxu1 %v7023_v36 }
 0x5e3   :  { %v3103_v31 = vsel %vm428_vm2, %v3100_v32, %v3102_v26  ;;  %v3119_v29 = vmax.f32 %v3080_v10, %v3102_v26  ;;  %v3134_v1 = vsel %vm11018_vm3, %v3131_v41, %v3133_v17  ;;  %5879 = vmatpush3.bf16.msra.mxu1 %v7025_v53 }
 0x5e4   :  { %v3148_v39 = vmax.f32 %v3117_v43, %v3132_v58  ;;  %v3118_v45 = vmax.f32 %v3079_v25, %v3103_v31  ;;  %5880 = vmatprep.subr.bf16.mxu1 %v7027_v34  ;;  %v7032_v25 = vld [vmem:[%s10920_s12 + $0xe0] sm:$0xff]  }
 0x5e5   :  { %v3150_v12 = vmax.f32 %v3119_v29, %v3133_v17 }
 0x5e6   :  { %v3168_v57 = vmul.f32 %v9916_v59, %v3148_v39  ;;  %v3149_v37 = vmax.f32 %v3118_v45, %v3134_v1 }
 0x5e7   :  { %v3170_v42 = vmul.f32 %v9916_v59, %v3150_v12  ;;  %5881 = vmatpush3.bf16.msra.mxu1 %v7029_v4 }
 0x5e8   :  { %v3183_v62 = vadd.f32 %v9924_v60, %v3168_v57  ;;  %v3169_v61 = vmul.f32 %v9916_v59, %v3149_v37  ;;  %v3151_v59 = vld [vmem:[%s10919_s11] sm:$0xff]  ;;  %5882 = vmatprep.subr.bf16.mxu1 %v7031_v51 }
 0x5e9   :  { %v3185_v30 = vadd.f32 %v9924_v60, %v3170_v42 }
 0x5ea   :  { %v6064_v22 = vpack.c.bf16 %v3183_v62, %v3182_v52  ;;  %v3184_v6 = vadd.f32 %v9924_v60, %v3169_v61  ;;  %v3152_v60 = vld [vmem:[%s10919_s11 + $0x8] sm:$0xff]  ;;  %s7371_s11 = smov 98  }
 0x5ec   :  { %6065 = vmatpush3.bf16.msra.mxu0 %v6064_v22  ;;  %v6067_v63 = vpack.c.bf16 %v3185_v30, %v3184_v6  ;;  %v7033_v22 = vld [vmem:[%s10920_s12 + $0x28] sm:$0xff]   ;;  %v7034_v30 = vld [vmem:[%s10920_s12 + $0xa0] sm:$0xff]  }
 0x5ed   :  { %6066 = vmatprep.subr.bf16.mxu0 %v11230_v35  ;;  %5883 = vmatpush3.bf16.msra.mxu1 %v7033_v22 }
 0x5f0   :  { %6069 = vmatpush3.bf16.msk.msra.mxu0 %vm9956_vm0, %v6067_v63 }
 0x5f1   :  { %5900 = vmatprep.subr.bf16.mxu0 %v7016_v50 }
 0x5f3   :  { %5955 = vmatmul.mubr.msk.f32.vlgmr.msra.gmra.mrb[108].mxu0 %vm3186_vm4, %v3151_v59 }
 0x5f4   :  { %5957 = vmatprep.mubr.msk.f32.mxu0 %vm7362_vm10, %v11242_v0  ;;  %5901 = vmatpush3.bf16.msra.mxu0 %v7018_v2 }
 0x5f5   :  { %5902 = vmatprep.subr.bf16.mxu0 %v7020_v20 }
 0x5f7   :  { %5958 = vmatmul.mubr.msk.f32.gmra.mrb[110].mxu0 %vm3186_vm4, %v3152_v60 }
 0x5f8   :  { %5960 = vmatprep.mubr.msk.f32.mxu0 %vm7362_vm10, %v11242_v0  ;;  %5903 = vmatpush3.bf16.msra.mxu0 %v7022_v21  ;;  %v7038_v21 = vld [vmem:[%s10920_s12 + $0xa8] sm:$0xff]  }
 0x5f9   :  { %5904 = vmatprep.subr.bf16.mxu0 %v7024_v46  ;;  %v7039_v46 = vld [vmem:[%s10920_s12 + $0x78] sm:$0xff]  }
 0x5fb   :  { %5961 = vmatmul.mubr.msk.f32.gmra.mrb[112].mxu0 %vm3186_vm4, %v3153_v55  ;;  %v7035_v55 = vld [vmem:[%s10920_s12 + $0x70] sm:$0xff]  }
 0x5fc   :  { %5963 = vmatprep.mubr.msk.f32.mxu0 %vm7362_vm10, %v11242_v0  ;;  %5905 = vmatpush3.bf16.msra.mxu0 %v7026_v23 }
 0x5fd   :  { %5906 = vmatprep.subr.bf16.mxu0 %v7028_v28  ;;  %5884 = vmatprep.subr.bf16.mxu1 %v7035_v55  ;;  %v7040_v28 = vld [vmem:[%s10920_s12 + $0xf0] sm:$0xff]  }
 0x5fe   :  { %5885 = vmatpush3.bf16.msra.mxu1 %v7037_v15 }
 0x5ff   :  { %5964 = vmatmul.mubr.msk.f32.gmra.mrb[114].mxu0 %vm3186_vm4, %v3154_v11  ;;  %v7036_v11 = vld [vmem:[%s10920_s12 + $0xe8] sm:$0xff]   ;;  %5886 = vmatprep.subr.bf16.mxu1 %v7039_v46 }
 0x600   :  { %5966 = vmatprep.mubr.msk.f32.mxu0 %vm7362_vm10, %v11242_v0  ;;  %5907 = vmatpush3.bf16.msra.mxu0 %v7030_v40 }
 0x601   :  { %5908 = vmatprep.subr.bf16.mxu0 %v7032_v25 }
 0x603   :  { %5967 = vmatmul.mubr.msk.f32.gmra.mrb[116].mxu0 %vm3186_vm4, %v3155_v8  ;;  %vm11249_vm4 = vcmask 1042432  }
 0x604   :  { %5909 = vmatpush3.bf16.msra.mxu0 %v7034_v30 }
 0x605   :  { %5910 = vmatprep.subr.bf16.mxu0 %v7036_v11 }
 0x608   :  { %5911 = vmatpush3.bf16.msra.mxu0 %v7038_v21 }
 0x609   :  { %5912 = vmatprep.subr.bf16.mxu0 %v7040_v28 }
 0x6c6   :  { %v10033_v44 = vpop.f32.mrb[108].mxu0 }
 0x6c7   :  { %v5956_v9 = vpop.f32.mrb[109].mxu0  ;;  %v3337_v24 = vrot.slane %v10033_v44, 3  ;;  %v3318_v5 = vrot.slane %v10033_v44, 2  ;;  %v3299_v48 = vrot.slane %v10033_v44, 1  ;;  %v3356_v19 = vrot.slane %v10033_v44, 4 }
 0x6c8   :  { %v3416_v13 = vrot.slane %v10033_v44, 7  ;;  %v3375_v47 = vrot.slane %v10033_v44, 5  ;;  %v3395_v26 = vrot.slane %v10033_v44, 6 }
 0x6ca   :  { %v10044_v49 = vpop.f32.mrb[110].mxu0 }
 0x6cb   :  { %v5959_v32 = vpop.f32.mrb[111].mxu0  ;;  %v3338_v41 = vrot.slane %v10044_v49, 3  ;;  %v3319_v38 = vrot.slane %v10044_v49, 2  ;;  %v3300_v7 = vrot.slane %v10044_v49, 1  ;;  %v3357_v58 = vrot.slane %v10044_v49, 4 }
 0x6cc   :  { %v3417_v10 = vrot.slane %v10044_v49, 7  ;;  %v3376_v43 = vrot.slane %v10044_v49, 5  ;;  %v3396_v17 = vrot.slane %v10044_v49, 6 }
 0x6cd   :  { %v3339_v14 = vsel %vm11016_vm5, %v3337_v24, %v3338_v41  ;;  %v3320_v31 = vsel %vm11018_vm3, %v3318_v5, %v3319_v38  ;;  %v10066_v29 = vsel %vm428_vm2, %v3299_v48, %v3300_v7  ;;  %v10069_v1 = vsel %vm11248_vm9, %v3356_v19, %v3357_v58 }
 0x6ce   :  { %v10071_v39 = vpop.f32.mrb[112].mxu0  ;;  %v10074_v45 = vsel %vm11015_vm6, %v3416_v13, %v3417_v10  ;;  %v10077_v12 = vsel %vm11249_vm4, %v3375_v47, %v3376_v43  ;;  %v10080_v57 = vsel %vm11250_vm12, %v3395_v26, %v3396_v17  ;;  %vm11251_vm12 = vmmov %vm11248_vm9  ;;  %v7042_v26 = vld [vmem:[%s10920_s12 + $0xb0] sm:$0xff]  }
 0x6cf   :  { %v5962_v37 = vpop.f32.mrb[113].mxu0  ;;  %v6848_v42 = vpack.i.bf16 %v10071_v39, %v10044_v49  ;;  %v3340_v52 = vrot.slane %v10071_v39, 3  ;;  %v3321_v62 = vrot.slane %v10071_v39, 2  ;;  %v3302_v61 = vrot.slane %v10071_v39, 1  ;;  %vm11252_vm9 = vmmov %vm11249_vm4  ;;  %5913 = vmatpush3.bf16.msra.mxu0 %v7042_v26 }
 0x6d0   :  { %v3359_v6 = vrot.slane %v10071_v39, 4  ;;  %v3419_v63 = vrot.slane %v10071_v39, 7  ;;  %v3378_v59 = vrot.slane %v10071_v39, 5  ;;  %v3398_v60 = vrot.slane %v10071_v39, 6 }
 0x6d1   :  { %6849 = vrot.lane.b32.xlu1 %v6848_v42, %s7363_s1  ;;  %v3341_v8 = vsel %vm11016_vm5, %v3338_v41, %v3340_v52  ;;  %v3322_v3 = vsel %vm11018_vm3, %v3319_v38, %v3321_v62  ;;  %v10109_v56 = vsel %vm428_vm2, %v3300_v7, %v3302_v61  ;;  %vm11253_vm4 = vcmask 1041408  }
 0x6d2   :  { %v10114_v50 = vpop.f32.mrb[114].mxu0  ;;  %v6858_v2 = vpack.i.bf16 %v3341_v8, %v3339_v14  ;;  %v6853_v20 = vpack.i.bf16 %v3322_v3, %v3320_v31  ;;  %v6868_v16 = vpack.i.bf16 %v10109_v56, %v10066_v29  ;;  %v3360_v33 = vsel %vm11251_vm12, %v3357_v58, %v3359_v6 }
 0x6d3   :  { %v5965_v18 = vpop.f32.mrb[115].mxu0  ;;  %v6863_v36 = vpack.i.bf16 %v3360_v33, %v10069_v1  ;;  %v3420_v23 = vsel %vm11015_vm6, %v3417_v10, %v3419_v63  ;;  %v3379_v53 = vsel %vm11252_vm9, %v3376_v43, %v3378_v59  ;;  %v3399_v34 = vsel %vm11253_vm4, %v3396_v17, %v3398_v60  ;;  %v7041_v43 = vld [vmem:[%s10920_s12 + $0x38] sm:$0xff]  }
 0x6d4   :  { %6859 = vrot.lane.b32.xlu0 %v6858_v2, %s7346_s2  ;;  %v6878_v9 = vpack.i.bf16 %v3420_v23, %v10074_v45  ;;  %v6873_v4 = vpack.i.bf16 %v3379_v53, %v10077_v12  ;;  %v6883_v40 = vpack.i.bf16 %v3399_v34, %v10080_v57  ;;  %v3304_v24 = vrot.slane %v10114_v50, 1  ;;  %v7043_v1 = vld [vmem:[%s10920_s12 + $0xf8] ss:$0 sps:$4 sm:$0x33]   ;;  %5887 = vmatpush3.bf16.msra.mxu1 %v7041_v43 }
 0x6d5   :  { %6854 = vrot.lane.b32.xlu1 %v6853_v20, %s7360_s28  ;;  %v3323_v5 = vrot.slane %v10114_v50, 2  ;;  %v3342_v48 = vrot.slane %v10114_v50, 3  ;;  %v3361_v19 = vrot.slane %v10114_v50, 4  ;;  %v3380_v51 = vrot.slane %v10114_v50, 5  ;;  %6070 = vmatprep.subr.bf16.mxu1 %v11230_v35 }
 0x6d6   :  { %v3291_v13 = vpop.f32.mrb[116].mxu0  ;;  %v3305_v47 = vsel %vm428_vm2, %v3302_v61, %v3304_v24  ;;  %v3421_v25 = vrot.slane %v10114_v50, 7  ;;  %v3400_v32 = vrot.slane %v10114_v50, 6 }
 0x6d7   :  { %v6918_v41 = vpack.i.bf16 %v3291_v13, %v10114_v50  ;;  %v3402_v38 = vrot.slane %v3291_v13, 6  ;;  %v3423_v7 = vrot.slane %v3291_v13, 7  ;;  %v3449_v58 = vrot.slane %v3291_v13, 1  ;;  %v5968_v10 = vpop.f32.mrb[117].mxu0 }
 0x6d8   :  { %6869 = vrot.lane.b32.xlu0 %v6868_v16, %s7357_s6  ;;  %v6888_v17 = vpack.i.bf16 %v3305_v47, %v10109_v56  ;;  %v3324_v14 = vsel %vm11018_vm3, %v3321_v62, %v3323_v5  ;;  %v3343_v31 = vsel %vm11016_vm5, %v3340_v52, %v3342_v48  ;;  %v3362_v29 = vsel %vm11251_vm12, %v3359_v6, %v3361_v19  ;;  %vm11254_vm12 = vmmov %vm11253_vm4 }
 0x6d9   :  { %6864 = vrot.lane.b32.xlu1 %v6863_v36, %s7354_s0  ;;  %v6893_v45 = vpack.i.bf16 %v3323_v5, %v3324_v14  ;;  %v6898_v12 = vpack.i.bf16 %v3342_v48, %v3343_v31  ;;  %v6903_v57 = vpack.i.bf16 %v3361_v19, %v3362_v29  ;;  %v6908_v37 = vpack.i.bf16 %v3304_v24, %v3305_v47  ;;  %vm11261_vm3 = vmmov %vm11260_vm7 }
 0x6da   :  { %v3381_v42 = vsel %vm11252_vm9, %v3378_v59, %v3380_v51  ;;  %v3422_v52 = vsel %vm11015_vm6, %v3419_v63, %v3421_v25  ;;  %v3424_v62 = vsel %vm11015_vm6, %v3421_v25, %v3423_v7  ;;  %v3401_v61 = vsel %vm11253_vm4, %v3398_v60, %v3400_v32  ;;  %v7044_v59 = vld [vmem:[%s10920_s12 + $0xb8] sm:$0xff]   ;;  %vm11255_vm9 = vmmov %vm11253_vm4 }
 0x6db   :  { %v6913_v22 = vpack.i.bf16 %v3380_v51, %v3381_v42  ;;  %v6923_v30 = vpack.i.bf16 %v3424_v62, %v3422_v52  ;;  %v3403_v6 = vsel %vm11254_vm12, %v3400_v32, %v3402_v38  ;;  %v3450_v55 = vsel %vm428_vm2, %v3304_v24, %v3449_v58  ;;  %6140 = vmatprep.subr.msk.bf16.mxu0 %vm11255_vm9, %v7043_v1 }
 0x6dc   :  { %6879 = vrot.lane.b32.xlu0 %v6878_v9, %s7364_s27  ;;  %v6928_v63 = vpack.i.bf16 %v3403_v6, %v3401_v61  ;;  %v6933_v11 = vpack.i.bf16 %v3449_v58, %v3450_v55  ;;  %5915 = vmatpush3.bf16.msra.mxu0 %v7044_v59  ;;  %vm3492_vm4 = vcmask 130048   ;;  %vm3487_vm12 = vcmask 769024  }
 0x6dd   :  { %6874 = vrot.lane.b32.xlu1 %v6873_v4, %s7365_s9  ;;  %6083 = vmatprep.subr.bf16.mxu0 %v11230_v35  ;;  %vm3768_vm9 = vcmask 949248   ;;  %vm11258_vm6 = vcmask 359424  }
 0x6de   :  { %vm11259_vm5 = vmmov %vm11258_vm6 }
 0x6e0   :  { %6884 = vrot.lane.b32.xlu0 %v6883_v40, %s11256_s5 }
 0x6e1   :  { %6889 = vrot.lane.b32.xlu1 %v6888_v17, %s11257_s29 }
 0x6e4   :  { %6894 = vrot.lane.b32.xlu0 %v6893_v45, %s7360_s28 }
 0x6e5   :  { %6899 = vrot.lane.b32.xlu1 %v6898_v12, %s7346_s2 }
 0x6e8   :  { %6904 = vrot.lane.b32.xlu0 %v6903_v57, %s7354_s0 }
 0x6e9   :  { %6909 = vrot.lane.b32.xlu1 %v6908_v37, %s7357_s6 }
 0x6ec   :  { %6914 = vrot.lane.b32.xlu0 %v6913_v22, %s7365_s9 }
 0x6ed   :  { %6924 = vrot.lane.b32.xlu1 %v6923_v30, %s7364_s27  ;;  %s7368_s27 = smov 32  }
 0x6f0   :  { %6919 = vrot.lane.b32.xlu0 %v6918_v41, %s7363_s1 }
 0x6f1   :  { %6929 = vrot.lane.b32.xlu1 %v6928_v63, %s11256_s5 }
 0x6f4   :  { %6934 = vrot.lane.b32.xlu0 %v6933_v11, %s11257_s29 }
 0x743   :  { %v6850_v60 = vpop.permute.xlu1 %6849 }
 0x744   :  { %v6852_v51 = vunpack.i.h.bf16 %v6850_v60  ;;  %v6851_v38 = vunpack.i.l.bf16 %v6850_v60 }
 0x746   :  { %v6860_v8 = vpop.permute.xlu0 %6859 }
 0x747   :  { %v6855_v3 = vpop.permute.xlu1 %6854  ;;  %v6862_v16 = vunpack.i.h.bf16 %v6860_v8  ;;  %v6861_v33 = vunpack.i.l.bf16 %v6860_v8 }
 0x748   :  { %v6857_v21 = vunpack.i.h.bf16 %v6855_v3  ;;  %v6856_v46 = vunpack.i.l.bf16 %v6855_v3 }
 0x74a   :  { %v6870_v56 = vpop.permute.xlu0 %6869  ;;  %v3472_v24 = vsel %vm1336_vm8, %v6857_v21, %v6862_v16  ;;  %v3471_v5 = vsel %vm1336_vm8, %v6856_v46, %v6861_v33 }
 0x74b   :  { %v6872_v15 = vunpack.i.h.bf16 %v6870_v56  ;;  %v6871_v2 = vunpack.i.l.bf16 %v6870_v56  ;;  %v6865_v20 = vpop.permute.xlu1 %6864 }
 0x74c   :  { %v6867_v23 = vunpack.i.h.bf16 %v6865_v20  ;;  %v6866_v53 = vunpack.i.l.bf16 %v6865_v20 }
 0x74d   :  { %v3464_v18 = vsel %vm2739_vm15, %v10044_v49, %v6872_v15  ;;  %v3463_v36 = vsel %vm2739_vm15, %v10033_v44, %v6871_v2 }
 0x74e   :  { %v3468_v34 = vsel %vm2757_vm13, %v3464_v18, %v6857_v21  ;;  %v3467_v28 = vsel %vm2757_vm13, %v3463_v36, %v6856_v46  ;;  %v6880_v9 = vpop.permute.xlu0 %6879  ;;  %v3475_v49 = vsel %vm2792_vm11, %v3471_v5, %v6866_v53  ;;  %v3476_v44 = vsel %vm2792_vm11, %v3472_v24, %v6867_v23 }
 0x74f   :  { %v3501_v4 = vpack.c.bf16 %v3468_v34, %v3467_v28  ;;  %v6875_v40 = vpop.permute.xlu1 %6874  ;;  %v6882_v13 = vunpack.i.h.bf16 %v6880_v9  ;;  %v6881_v47 = vunpack.i.l.bf16 %v6880_v9 }
 0x750   :  { %v6877_v48 = vunpack.i.h.bf16 %v6875_v40  ;;  %v6876_v19 = vunpack.i.l.bf16 %v6875_v40 }
 0x751   :  { %v3494_v14 = vsel %vm3492_vm4, %v6882_v13, %v6852_v51  ;;  %v3493_v31 = vsel %vm3492_vm4, %v6881_v47, %v6851_v38 }
 0x752   :  { %v6885_v25 = vpop.permute.xlu0 %6884  ;;  %v3479_v32 = vsel %vm2952_vm1, %v3475_v49, %v6876_v19  ;;  %v3480_v41 = vsel %vm2952_vm1, %v3476_v44, %v6877_v48 }
 0x753   :  { %v6887_v7 = vunpack.i.h.bf16 %v6885_v25  ;;  %v6886_v58 = vunpack.i.l.bf16 %v6885_v25  ;;  %v6890_v10 = vpop.permute.xlu1 %6889  ;;  %v3502_v43 = vpack.c.bf16 %v3480_v41, %v3479_v32 }
 0x754   :  { %v6892_v26 = vunpack.i.h.bf16 %v6890_v10  ;;  %v6891_v17 = vunpack.i.l.bf16 %v6890_v10 }
 0x755   :  { %v3484_v29 = vsel %vm11258_vm6, %v6877_v48, %v6887_v7  ;;  %v3483_v1 = vsel %vm11259_vm5, %v6876_v19, %v6886_v58  ;;  %3810 = vmatprep.mubr.bf16.mxu1 %v3502_v43 }
 0x756   :  { %v3488_v45 = vsel %vm3487_vm12, %v3483_v1, %v6881_v47  ;;  %v3489_v12 = vsel %vm3487_vm12, %v3484_v29, %v6882_v13  ;;  %v3498_v57 = vsel %vm11260_vm7, %v3494_v14, %v6892_v26  ;;  %v3497_v37 = vsel %vm11261_vm3, %v3493_v31, %v6891_v17  ;;  %3811 = vmatmul.mubr.bf16.vlgmr.msra.gmra.mrb[16].mxu1 %v3501_v4  ;;  %v6895_v42 = vpop.permute.xlu0 %6894  ;;  %vm11262_vm3 = vmmov %vm11259_vm5  ;;  %v5633_v1 = vld [vmem:[%s10921_s13] ss:$0 sm:$0xff] }
 0x757   :  { %v3503_v52 = vpack.c.bf16 %v3489_v12, %v3488_v45  ;;  %v3504_v62 = vpack.c.bf16 %v3498_v57, %v3497_v37  ;;  %v6900_v61 = vpop.permute.xlu1 %6899  ;;  %v6897_v22 = vunpack.i.h.bf16 %v6895_v42  ;;  %v6896_v30 = vunpack.i.l.bf16 %v6895_v42  ;;  %vm11263_vm5 = vmmov %vm11262_vm3 }
 0x758   :  { %v6902_v6 = vunpack.i.h.bf16 %v6900_v61  ;;  %v6901_v55 = vunpack.i.l.bf16 %v6900_v61 }
 0x759   :  { %5666 = vmatprep.mubr.msk.bf16.mxu0 %vm3768_vm9, %v3504_v62 }
 0x75a   :  { %v6905_v59 = vpop.permute.xlu0 %6904  ;;  %3860 = vmatmul.mubr.bf16.vlgmr.msra.gmra.mrb[120].mxu0 %v3503_v52  ;;  %v3474_v56 = vsel %vm1336_vm8, %v6897_v22, %v6902_v6  ;;  %v3473_v15 = vsel %vm1336_vm8, %v6896_v30, %v6901_v55 }
 0x75b   :  { %v6910_v63 = vpop.permute.xlu1 %6909  ;;  %v6907_v11 = vunpack.i.h.bf16 %v6905_v59  ;;  %v6906_v60 = vunpack.i.l.bf16 %v6905_v59 }
 0x75c   :  { %v6912_v8 = vunpack.i.h.bf16 %v6910_v63  ;;  %v6911_v3 = vunpack.i.l.bf16 %v6910_v63 }
 0x75d   :  { %v3477_v23 = vsel %vm2792_vm11, %v3473_v15, %v6906_v60  ;;  %v3478_v53 = vsel %vm2792_vm11, %v3474_v56, %v6907_v11 }
 0x75e   :  { %v3466_v2 = vsel %vm2739_vm15, %v10114_v50, %v6912_v8  ;;  %v3465_v20 = vsel %vm2739_vm15, %v10071_v39, %v6911_v3  ;;  %v6915_v16 = vpop.permute.xlu0 %6914  ;;  %vm11266_vm15 = vcmask 1045504  }
 0x75f   :  { %v6917_v33 = vunpack.i.h.bf16 %v6915_v16  ;;  %v6916_v21 = vunpack.i.l.bf16 %v6915_v16  ;;  %v6925_v46 = vpop.permute.xlu1 %6924  ;;  %v3469_v18 = vsel %vm2757_vm13, %v3465_v20, %v6896_v30  ;;  %v3470_v36 = vsel %vm2757_vm13, %v3466_v2, %v6897_v22 }
 0x760   :  { %v3505_v34 = vpack.c.bf16 %v3470_v36, %v3469_v18  ;;  %v6927_v19 = vunpack.i.h.bf16 %v6925_v46  ;;  %v6926_v49 = vunpack.i.l.bf16 %v6925_v46 }
 0x761   :  { %v3481_v28 = vsel %vm2952_vm1, %v3477_v23, %v6916_v21  ;;  %v3482_v50 = vsel %vm2952_vm1, %v3478_v53, %v6917_v33  ;;  %vm11264_vm1 = vmmov %vm11260_vm7 }
 0x762   :  { %v6920_v9 = vpop.permute.xlu0 %6919  ;;  %v3506_v4 = vpack.c.bf16 %v3482_v50, %v3481_v28  ;;  %vm11265_vm6 = vmmov %vm11264_vm1 }
 0x763   :  { %v6930_v39 = vpop.permute.xlu1 %6929  ;;  %v6922_v40 = vunpack.i.h.bf16 %v6920_v9  ;;  %v6921_v24 = vunpack.i.l.bf16 %v6920_v9 }
 0x764   :  { %v6932_v5 = vunpack.i.h.bf16 %v6930_v39  ;;  %v6931_v48 = vunpack.i.l.bf16 %v6930_v39  ;;  %3818 = vmatprep.mubr.bf16.mxu1 %v3506_v4 }
 0x765   :  { %3819 = vmatmul.mubr.bf16.gmra.mrb[20].mxu1 %v3505_v34  ;;  %v3495_v32 = vsel %vm3492_vm4, %v6926_v49, %v6921_v24  ;;  %v3496_v41 = vsel %vm3492_vm4, %v6927_v19, %v6922_v40 }
 0x766   :  { %v3486_v44 = vsel %vm11262_vm3, %v6917_v33, %v6932_v5  ;;  %v3485_v13 = vsel %vm11263_vm5, %v6916_v21, %v6931_v48  ;;  %v6935_v47 = vpop.permute.xlu0 %6934  ;;  %5977 = vmatprep.mubr.msk.f32.mxu1 %vm7362_vm10, %v11242_v0  ;;  %vm11267_vm5 = vmmov %vm11266_vm15 }
 0x767   :  { %v6937_v51 = vunpack.i.h.bf16 %v6935_v47  ;;  %v6936_v25 = vunpack.i.l.bf16 %v6935_v47  ;;  %v3490_v38 = vsel %vm3487_vm12, %v3485_v13, %v6926_v49  ;;  %v3491_v7 = vsel %vm3487_vm12, %v3486_v44, %v6927_v19 }
 0x768   :  { %v3507_v26 = vpack.c.bf16 %v3491_v7, %v3490_v38 }
 0x769   :  { %v3499_v58 = vsel %vm11264_vm1, %v3495_v32, %v6936_v25  ;;  %v3500_v10 = vsel %vm11265_vm6, %v3496_v41, %v6937_v51  ;;  %vm11268_vm1 = vmmov %vm11267_vm5  ;;  %vm11269_vm6 = vcmask 203776  }
 0x76a   :  { %v3508_v43 = vpack.c.bf16 %v3500_v10, %v3499_v58 }
 0x76c   :  { %5667 = vmatprep.mubr.msk.bf16.mxu0 %vm3768_vm9, %v3508_v43 }
 0x76d   :  { %3868 = vmatmul.mubr.bf16.gmra.mrb[124].mxu0 %v3507_v26 }
 0x829   :  { %v5888_v17 = vpop.f32.mrb[16].mxu1 }
 0x82a   :  { %v5889_v14 = vpop.f32.mrb[17].mxu1 }
 0x82b   :  { %v5890_v31 = vadd.f32 %v5889_v14, %v5888_v17  ;;  %v5891_v29 = vpop.f32.mrb[18].mxu1 }
 0x82c   :  { %v5892_v45 = vpop.f32.mrb[19].mxu1 }
 0x82d   :  { %v5893_v12 = vadd.f32 %v5892_v45, %v5891_v29  ;;  %v5916_v57 = vpop.f32.mrb[120].mxu0  ;;  %v3813_v42 = vadd.f32 %v5890_v31, %v5633_v1 }
 0x82e   :  { %v5917_v37 = vpop.f32.mrb[121].mxu0 }
 0x82f   :  { %v5918_v52 = vadd.f32 %v5917_v37, %v5916_v57  ;;  %v5919_v62 = vpop.f32.mrb[122].mxu0  ;;  %v3816_v22 = vadd.f32 %v5893_v12, %v5633_v1  ;;  %v5672_v57 = vld [vmem:[%s10922_s14] ss:$0 sm:$0xff] }
 0x830   :  { %v5920_v61 = vpop.f32.mrb[123].mxu0 }
 0x831   :  { %v3862_v30 = vadd.f32 %v5918_v52, %v3813_v42  ;;  %v5921_v6 = vadd.f32 %v5920_v61, %v5919_v62 }
 0x833   :  { %v3880_v55 = vmin.f32 %v3862_v30, 0.0  ;;  %v3865_v59 = vadd.f32 %v5921_v6, %v3816_v22  ;;  %vm3876_vm8 = vcmp.gt.f32.partialorder %v3862_v30, 0.0 }
 0x835   :  { %v3884_v63 = vmul.f32 1.442695, %v3880_v55  ;;  %v3881_v11 = vmin.f32 %v3865_v59, 0.0  ;;  %vm3877_vm7 = vcmp.gt.f32.partialorder %v3865_v59, 0.0  ;;  %v5673_v55 = vld [vmem:[%s10923_s15] ss:$0 sm:$0xff] }
 0x837   :  { %7293 = vpow2.f32 %v3884_v63  ;;  %v3886_v60 = vmul.f32 1.442695, %v3881_v11 }
 0x838   :  { %v5894_v8 = vpop.f32.mrb[20].mxu1 }
 0x839   :  { %7295 = vpow2.f32 %v3886_v60  ;;  %v5895_v3 = vpop.f32.mrb[21].mxu1 }
 0x83a   :  { %v5896_v56 = vadd.f32 %v5895_v3, %v5894_v8  ;;  %v5897_v15 = vpop.f32.mrb[22].mxu1 }
 0x83b   :  { %v5898_v2 = vpop.f32.mrb[23].mxu1 }
 0x83c   :  { %v5899_v20 = vadd.f32 %v5898_v2, %v5897_v15  ;;  %v3821_v18 = vadd.f32 %v5896_v56, %v5633_v1 }
 0x83e   :  { %v3824_v34 = vadd.f32 %v5899_v20, %v5633_v1 }
 0x840   :  { %v5922_v16 = vpop.f32.mrb[124].mxu0 }
 0x841   :  { %v7294_v33 = vpop.eup %7293  ;;  %v5923_v21 = vpop.f32.mrb[125].mxu0 }
 0x842   :  { %v5668_v46 = vadd.f32 -1.0, %v7294_v33  ;;  %v5924_v36 = vadd.f32 %v5923_v21, %v5922_v16  ;;  %v5925_v23 = vpop.f32.mrb[126].mxu0  ;;  %v3934_v16 = vld [vmem:[%s10924_s16] sm:$0xff]  ;;  %v3935_v33 = vld [vmem:[%s10924_s16 + $0x8] sm:$0xff]  ;;  %s7370_s16 = smov 30  }
 0x843   :  { %v7296_v53 = vpop.eup %7295  ;;  %v5926_v28 = vpop.f32.mrb[127].mxu0  ;;  %v7045_v21 = vld [vmem:[%s10925_s17] ss:$8 sps:$4 sm:$0xff]  }
 0x844   :  { %v3896_v50 = vsel %vm3876_vm8, %v3862_v30, %v5668_v46  ;;  %v5669_v9 = vadd.f32 -1.0, %v7296_v53  ;;  %v3870_v4 = vadd.f32 %v5924_v36, %v3821_v18  ;;  %v5927_v39 = vadd.f32 %v5926_v28, %v5925_v23  ;;  %vm11270_vm8 = vmmov %vm11269_vm6  ;;  %v7047_v46 = vld [vmem:[%s10925_s17 + $0x4] ss:$8 sps:$4 sm:$0xff]   ;;  %v7050_v18 = vld [vmem:[%s10925_s17 + $0x14] ss:$8 sps:$4 sm:$0xff]  }
 0x845   :  { %v3904_v48 = vrot.slane %v3896_v50, 1  ;;  %v3919_v19 = vrot.slane %v3896_v50, 2  ;;  %v7048_v36 = vld [vmem:[%s10925_s17 + $0x10] ss:$8 sps:$4 sm:$0xff]   ;;  %v7053_v23 = vld [vmem:[%s10925_s17 + $0x24] ss:$8 sps:$4 sm:$0xff]  }
 0x846   :  { %v3897_v40 = vsel %vm3877_vm7, %v3865_v59, %v5669_v9  ;;  %v3882_v24 = vmin.f32 %v3870_v4, 0.0  ;;  %v3873_v5 = vadd.f32 %v5927_v39, %v3824_v34  ;;  %vm3878_vm12 = vcmp.gt.f32.partialorder %v3870_v4, 0.0  ;;  %v7051_v53 = vld [vmem:[%s10925_s17 + $0x20] ss:$8 sps:$4 sm:$0xff]   ;;  %v7056_v34 = vld [vmem:[%s10925_s17 + $0x34] ss:$8 sps:$4 sm:$0xff]  }
 0x847   :  { %v3905_v49 = vrot.slane %v3897_v40, 1  ;;  %v3920_v44 = vrot.slane %v3897_v40, 2  ;;  %v7054_v28 = vld [vmem:[%s10925_s17 + $0x30] ss:$8 sps:$4 sm:$0xff]   ;;  %v7057_v9 = vld [vmem:[%s10925_s17 + $0x40] ss:$8 sps:$4 sm:$0xff]  }
 0x848   :  { %v3888_v13 = vmul.f32 1.442695, %v3882_v24  ;;  %v3883_v47 = vmin.f32 %v3873_v5, 0.0  ;;  %vm3879_vm3 = vcmp.gt.f32.partialorder %v3873_v5, 0.0  ;;  %v7060_v39 = vld [vmem:[%s10925_s17 + $0x50] ss:$8 sps:$4 sm:$0xff]  }
 0x849   :  { %v3906_v51 = vsel %vm428_vm2, %v3904_v48, %v3905_v49  ;;  %v3921_v25 = vsel %vm11266_vm15, %v3919_v19, %v3920_v44  ;;  %v7063_v24 = vld [vmem:[%s10925_s17 + $0x60] ss:$8 sps:$4 sm:$0xff]   ;;  %v7066_v48 = vld [vmem:[%s10925_s17 + $0x70] ss:$8 sps:$4 sm:$0xff]   ;;  %v7071_v19 = vld [vmem:[%s10925_s17 + $0x84] ss:$8 sps:$4 sm:$0xff]  }
 0x84a   :  { %v3915_v32 = vmax.f32 %v3896_v50, %v3906_v51  ;;  %7297 = vpow2.f32 %v3888_v13  ;;  %v3890_v41 = vmul.f32 1.442695, %v3883_v47  ;;  %v7059_v50 = vld [vmem:[%s10925_s17 + $0x44] ss:$8 sps:$4 sm:$0xff]   ;;  %v7072_v13 = vld [vmem:[%s10925_s17 + $0x90] ss:$8 sps:$4 sm:$0xff]   ;;  %vm11273_vm15 = vmmov %vm11268_vm1 }
 0x84b   :  { %v7077_v47 = vld [vmem:[%s10925_s17 + $0xa4] ss:$8 sps:$4 sm:$0xff]   ;;  %v7075_v51 = vld [vmem:[%s10925_s17 + $0xa0] ss:$8 sps:$4 sm:$0xff]   ;;  %vm11272_vm7 = vcmask 1044480  }
 0x84c   :  { %7299 = vpow2.f32 %v3890_v41  ;;  %v3930_v38 = vmax.f32 %v3915_v32, %v3921_v25  ;;  %v7080_v25 = vld [vmem:[%s10925_s17 + $0xb4] ss:$8 sps:$4 sm:$0xff]   ;;  %v7078_v32 = vld [vmem:[%s10925_s17 + $0xb0] ss:$8 sps:$4 sm:$0xff]   ;;  %v7083_v41 = vld [vmem:[%s10925_s17 + $0xc4] ss:$8 sps:$4 sm:$0xff]  }
 0x84e   :  { %v3944_v30 = vmul.f32 %v5672_v57, %v3930_v38  ;;  %v7081_v38 = vld [vmem:[%s10925_s17 + $0xc0] ss:$8 sps:$4 sm:$0xff]  }
 0x850   :  { %v3955_v60 = vadd.f32 %v5673_v55, %v3944_v30 }
 0x854   :  { %v7298_v7 = vpop.eup %7297 }
 0x855   :  { %v5670_v58 = vadd.f32 -1.0, %v7298_v7  ;;  %v7086_v7 = vld [vmem:[%s10925_s17 + $0xd4] ss:$8 sps:$4 sm:$0xff]  }
 0x856   :  { %v7300_v10 = vpop.eup %7299 }
 0x857   :  { %v3898_v43 = vsel %vm3878_vm12, %v3870_v4, %v5670_v58  ;;  %v5671_v26 = vadd.f32 -1.0, %v7300_v10  ;;  %v7062_v4 = vld [vmem:[%s10925_s17 + $0x54] ss:$8 sps:$4 sm:$0xff]   ;;  %v7084_v58 = vld [vmem:[%s10925_s17 + $0xd0] ss:$8 sps:$4 sm:$0xff]   ;;  %vm11274_vm12 = vcmask 1042432  }
 0x858   :  { %v3907_v17 = vrot.slane %v3898_v43, 1  ;;  %v3922_v14 = vrot.slane %v3898_v43, 2 }
 0x859   :  { %v3899_v31 = vsel %vm3879_vm3, %v3873_v5, %v5671_v26  ;;  %v7068_v5 = vld [vmem:[%s10925_s17 + $0x74] ss:$8 sps:$4 sm:$0xff]   ;;  %v7089_v26 = vld [vmem:[%s10925_s17 + $0xe4] ss:$8 sps:$4 sm:$0xff]   ;;  %vm11275_vm3 = vcmask 1043456  }
 0x85a   :  { %v3908_v29 = vsel %vm428_vm2, %v3905_v49, %v3907_v17  ;;  %v3923_v1 = vsel %vm11267_vm5, %v3920_v44, %v3922_v14  ;;  %v3909_v45 = vrot.slane %v3899_v31, 1  ;;  %v3924_v12 = vrot.slane %v3899_v31, 2  ;;  %v7069_v49 = vld [vmem:[%s10925_s17 + $0x80] ss:$8 sps:$4 sm:$0xff]   ;;  %v7074_v44 = vld [vmem:[%s10925_s17 + $0x94] ss:$8 sps:$4 sm:$0xff]  }
 0x85b   :  { %v3916_v37 = vmax.f32 %v3897_v40, %v3908_v29  ;;  %v7065_v40 = vld [vmem:[%s10925_s17 + $0x64] ss:$8 sps:$4 sm:$0xff]   ;;  %vm11276_vm5 = vcmask 1040384  }
 0x85c   :  { %v3910_v42 = vsel %vm428_vm2, %v3907_v17, %v3909_v45  ;;  %v3918_v52 = vmax.f32 %v3899_v31, %v3909_v45  ;;  %v3925_v62 = vsel %vm11268_vm1, %v3922_v14, %v3924_v12  ;;  %vm11277_vm1 = vcmask 1041408  }
 0x85d   :  { %v3917_v61 = vmax.f32 %v3898_v43, %v3910_v42  ;;  %v3931_v22 = vmax.f32 %v3916_v37, %v3923_v1  ;;  %v7087_v43 = vld [vmem:[%s10925_s17 + $0xe0] ss:$8 sps:$4 sm:$0xff]   ;;  %v7090_v37 = vld [vmem:[%s10925_s17 + $0xf0] ss:$8 sps:$4 sm:$0xff]   ;;  %v7092_v42 = vld [vmem:[%s10925_s17 + $0xf4] ss:$8 sps:$4 sm:$0xff]  }
 0x85e   :  { %v3933_v6 = vmax.f32 %v3918_v52, %v3924_v12 }
 0x85f   :  { %v3932_v59 = vmax.f32 %v3917_v61, %v3925_v62  ;;  %v3945_v63 = vmul.f32 %v5672_v57, %v3931_v22 }
 0x860   :  { %v3947_v11 = vmul.f32 %v5672_v57, %v3933_v6 }
 0x861   :  { %v3956_v8 = vadd.f32 %v5673_v55, %v3945_v63  ;;  %v3946_v3 = vmul.f32 %v5672_v57, %v3932_v59 }
 0x862   :  { %v3958_v56 = vadd.f32 %v5673_v55, %v3947_v11 }
 0x863   :  { %v6071_v15 = vpack.c.bf16 %v3956_v8, %v3955_v60  ;;  %v3957_v2 = vadd.f32 %v5673_v55, %v3946_v3 }
 0x865   :  { %6072 = vmatpush3.bf16.msra.mxu1 %v6071_v15  ;;  %v6074_v20 = vpack.c.bf16 %v3958_v56, %v3957_v2  ;;  %v7095_v56 = vld [vmem:[%s10925_s17 + $0x104] ss:$8 sps:$4 sm:$0xff]  }
 0x866   :  { %6073 = vmatprep.subr.bf16.mxu1 %v11230_v35 }
 0x869   :  { %6076 = vmatpush3.bf16.msk.msra.mxu1 %vm9368_vm14, %v6074_v20  ;;  %vm11271_vm14 = vmmov %vm11269_vm6 }
 0x86a   :  { %4943 = vmatprep.subr.bf16.mxu1 %v7047_v46 }
 0x86c   :  { %5978 = vmatmul.mubr.msk.f32.vlgmr.msra.gmra.mrb[24].mxu1 %vm11269_vm6, %v3934_v16  ;;  %vm11278_vm6 = vmmov %vm11272_vm7 }
 0x86d   :  { %5980 = vmatprep.mubr.msk.f32.mxu1 %vm7362_vm10, %v11242_v0  ;;  %4944 = vmatpush1.bf16.msra.mxu1 %v7045_v21 }
 0x86e   :  { %4945 = vmatprep.subr.bf16.mxu1 %v7050_v18 }
 0x870   :  { %5981 = vmatmul.mubr.msk.f32.gmra.mrb[26].mxu1 %vm11270_vm8, %v3935_v33  ;;  %vm11279_vm8 = vmmov %vm11273_vm15 }
 0x871   :  { %5983 = vmatprep.mubr.msk.f32.mxu1 %vm7362_vm10, %v11242_v0  ;;  %4946 = vmatpush1.bf16.msra.mxu1 %v7048_v36 }
 0x872   :  { %4947 = vmatprep.subr.bf16.mxu1 %v7053_v23 }
 0x874   :  { %5984 = vmatmul.mubr.msk.f32.gmra.mrb[28].mxu1 %vm11271_vm14, %v3936_v27  ;;  %vm11280_vm14 = vmmov %vm11274_vm12 }
 0x875   :  { %4948 = vmatpush1.bf16.msra.mxu1 %v7051_v53 }
 0x876   :  { %4949 = vmatprep.subr.bf16.mxu1 %v7056_v34 }
 0x879   :  { %4950 = vmatpush1.bf16.msra.mxu1 %v7054_v28 }
 0x87a   :  { %4951 = vmatprep.subr.bf16.mxu1 %v7059_v50 }
 0x87d   :  { %4952 = vmatpush1.bf16.msra.mxu1 %v7057_v9 }
 0x87e   :  { %4953 = vmatprep.subr.bf16.mxu1 %v7062_v4 }
 0x881   :  { %4954 = vmatpush1.bf16.msra.mxu1 %v7060_v39 }
 0x882   :  { %4955 = vmatprep.subr.bf16.mxu1 %v7065_v40 }
 0x885   :  { %4956 = vmatpush1.bf16.msra.mxu1 %v7063_v24 }
 0x886   :  { %4957 = vmatprep.subr.bf16.mxu1 %v7068_v5 }
 0x889   :  { %4958 = vmatpush1.bf16.msra.mxu1 %v7066_v48 }
 0x88a   :  { %4959 = vmatprep.subr.bf16.mxu1 %v7071_v19 }
 0x88d   :  { %4960 = vmatpush1.bf16.msra.mxu1 %v7069_v49 }
 0x88e   :  { %4961 = vmatprep.subr.bf16.mxu1 %v7074_v44 }
 0x891   :  { %4962 = vmatpush1.bf16.msra.mxu1 %v7072_v13 }
 0x892   :  { %4963 = vmatprep.subr.bf16.mxu1 %v7077_v47 }
 0x895   :  { %4964 = vmatpush1.bf16.msra.mxu1 %v7075_v51 }
 0x896   :  { %4965 = vmatprep.subr.bf16.mxu1 %v7080_v25 }
 0x899   :  { %4966 = vmatpush1.bf16.msra.mxu1 %v7078_v32 }
 0x89a   :  { %4967 = vmatprep.subr.bf16.mxu1 %v7083_v41 }
 0x89d   :  { %4968 = vmatpush1.bf16.msra.mxu1 %v7081_v38 }
 0x89e   :  { %4969 = vmatprep.subr.bf16.mxu1 %v7086_v7 }
 0x8a1   :  { %4970 = vmatpush1.bf16.msra.mxu1 %v7084_v58 }
 0x8a2   :  { %4971 = vmatprep.subr.bf16.mxu1 %v7089_v26 }
 0x8a5   :  { %4972 = vmatpush1.bf16.msra.mxu1 %v7087_v43 }
 0x8a6   :  { %4973 = vmatprep.subr.bf16.mxu1 %v7092_v42 }
 0x8a9   :  { %4974 = vmatpush1.bf16.msra.mxu1 %v7090_v37 }
 0x8aa   :  { %4986 = vmatprep.subr.bf16.mxu1 %v7095_v56 }
 0x93f   :  { %v10358_v10 = vpop.f32.mrb[24].mxu1 }
 0x940   :  { %v5979_v17 = vpop.f32.mrb[25].mxu1  ;;  %v4053_v14 = vrot.slane %v10358_v10, 1  ;;  %v4074_v31 = vrot.slane %v10358_v10, 3  ;;  %v4063_v29 = vrot.slane %v10358_v10, 2  ;;  %v4096_v1 = vrot.slane %v10358_v10, 5 }
 0x941   :  { %v4085_v45 = vrot.slane %v10358_v10, 4  ;;  %v4118_v57 = vrot.slane %v10358_v10, 7  ;;  %v4107_v59 = vrot.slane %v10358_v10, 6 }
 0x943   :  { %v10371_v12 = vpop.f32.mrb[26].mxu1 }
 0x944   :  { %v5982_v52 = vpop.f32.mrb[27].mxu1  ;;  %v4054_v62 = vrot.slane %v10371_v12, 1  ;;  %v4075_v61 = vrot.slane %v10371_v12, 3  ;;  %v4064_v22 = vrot.slane %v10371_v12, 2  ;;  %v4097_v30 = vrot.slane %v10371_v12, 5 }
 0x945   :  { %v4086_v6 = vrot.slane %v10371_v12, 4  ;;  %v4119_v55 = vrot.slane %v10371_v12, 7  ;;  %v4108_v63 = vrot.slane %v10371_v12, 6 }
 0x946   :  { %v4055_v11 = vsel %vm428_vm2, %v4053_v14, %v4054_v62  ;;  %v4076_v60 = vsel %vm11272_vm7, %v4074_v31, %v4075_v61  ;;  %v4065_v8 = vsel %vm11273_vm15, %v4063_v29, %v4064_v22  ;;  %v4098_v3 = vsel %vm11274_vm12, %v4096_v1, %v4097_v30  ;;  %vm11281_vm7 = vmmov %vm11275_vm3 }
 0x947   :  { %v4047_v15 = vpop.f32.mrb[28].mxu1  ;;  %v6938_v2 = vpack.i.bf16 %v4054_v62, %v4055_v11  ;;  %v4087_v20 = vsel %vm11275_vm3, %v4085_v45, %v4086_v6  ;;  %v4120_v16 = vsel %vm11276_vm5, %v4118_v57, %v4119_v55  ;;  %v4109_v33 = vsel %vm11277_vm1, %v4107_v59, %v4108_v63  ;;  %vm11282_vm15 = vmmov %vm11276_vm5 }
 0x948   :  { %v4077_v27 = vrot.slane %v4047_v15, 3  ;;  %v4066_v21 = vrot.slane %v4047_v15, 2  ;;  %v5985_v46 = vpop.f32.mrb[29].mxu1  ;;  %v4099_v18 = vrot.slane %v4047_v15, 5  ;;  %v4088_v36 = vrot.slane %v4047_v15, 4  ;;  %vm11283_vm12 = vmmov %vm11277_vm1 }
 0x949   :  { %6939 = vrot.lane.b32.xlu1 %v6938_v2, %s7360_s28  ;;  %v4121_v23 = vrot.slane %v4047_v15, 7  ;;  %v4110_v53 = vrot.slane %v4047_v15, 6  ;;  %v4135_v34 = vrot.slane %v4047_v15, 1  ;;  %v6973_v28 = vpack.i.bf16 %v4047_v15, %v10371_v12  ;;  %s7366_s28 = smov 116   ;;  %v7101_v2 = vld [vmem:[%s10925_s17 + $0x124] ss:$8 sps:$4 sm:$0xff]  }
 0x94a   :  { %v4078_v50 = vsel %vm11278_vm6, %v4075_v61, %v4077_v27  ;;  %v4067_v9 = vsel %vm11279_vm8, %v4064_v22, %v4066_v21  ;;  %v4100_v4 = vsel %vm11280_vm14, %v4097_v30, %v4099_v18  ;;  %v4089_v39 = vsel %vm11281_vm7, %v4086_v6, %v4088_v36  ;;  %v7099_v18 = vld [vmem:[%s10925_s17 + $0x120] ss:$8 sps:$4 sm:$0xff]  }
 0x94b   :  { %v6948_v40 = vpack.i.bf16 %v4078_v50, %v4076_v60  ;;  %v6943_v24 = vpack.i.bf16 %v4067_v9, %v4065_v8  ;;  %v6958_v5 = vpack.i.bf16 %v4100_v4, %v4098_v3  ;;  %v6953_v48 = vpack.i.bf16 %v4089_v39, %v4087_v20  ;;  %v7096_v60 = vld [vmem:[%s10925_s17 + $0x110] ss:$8 sps:$4 sm:$0xff]  }
 0x94c   :  { %v4122_v19 = vsel %vm11282_vm15, %v4119_v55, %v4121_v23  ;;  %v4111_v49 = vsel %vm11283_vm12, %v4108_v63, %v4110_v53  ;;  %v4136_v44 = vsel %vm428_vm2, %v4054_v62, %v4135_v34  ;;  %vm11286_vm3 = vcmask 359424   ;;  %v7093_v62 = vld [vmem:[%s10925_s17 + $0x100] ss:$8 sps:$4 sm:$0xff]   ;;  %v7098_v55 = vld [vmem:[%s10925_s17 + $0x114] ss:$8 sps:$4 sm:$0xff]   ;;  %vm11292_vm15 = vmmov %vm11281_vm7 }
 0x94d   :  { %6949 = vrot.lane.b32.xlu1 %v6948_v40, %s11256_s5  ;;  %6944 = vrot.lane.b32.xlu0 %v6943_v24, %s7354_s0  ;;  %v6968_v13 = vpack.i.bf16 %v4122_v19, %v4120_v16  ;;  %v6963_v47 = vpack.i.bf16 %v4111_v49, %v4109_v33  ;;  %v6978_v51 = vpack.i.bf16 %v4135_v34, %v4136_v44  ;;  %vm11287_vm5 = vmmov %vm11286_vm3  ;;  %v7102_v39 = vld [vmem:[%s10925_s17 + $0x130] ss:$8 sps:$4 sm:$0xff]   ;;  %v7107_v40 = vld [vmem:[%s10925_s17 + $0x144] ss:$8 sps:$4 sm:$0xff]   ;;  %vm4155_vm1 = vcmask 490496  }
 0x94e   :  { %v7105_v24 = vld [vmem:[%s10925_s17 + $0x140] ss:$8 sps:$4 sm:$0xff]   ;;  %v7113_v19 = vld [vmem:[%s10925_s17 + $0x164] ss:$8 sps:$4 sm:$0xff]   ;;  %v7116_v44 = vld [vmem:[%s10925_s17 + $0x174] ss:$8 sps:$4 sm:$0xff]  }
 0x94f   :  { %v7111_v49 = vld [vmem:[%s10925_s17 + $0x160] ss:$8 sps:$4 sm:$0xff]   ;;  %vm11290_vm6 = vcmask 31744   ;;  %vm4933_vm14 = vcmask 850944  }
 0x950   :  { %vm11291_vm8 = vmmov %vm11290_vm6 }
 0x951   :  { %6959 = vrot.lane.b32.xlu1 %v6958_v5, %s7366_s28  ;;  %6954 = vrot.lane.b32.xlu0 %v6953_v48, %s7363_s1  ;;  %v7110_v5 = vld [vmem:[%s10925_s17 + $0x154] ss:$8 sps:$4 sm:$0xff]   ;;  %v7108_v48 = vld [vmem:[%s10925_s17 + $0x150] ss:$8 sps:$4 sm:$0xff]  }
 0x955   :  { %6969 = vrot.lane.b32.xlu1 %v6968_v13, %s7367_s3  ;;  %6964 = vrot.lane.b32.xlu0 %v6963_v47, %s11284_s30  ;;  %v7114_v13 = vld [vmem:[%s10925_s17 + $0x170] ss:$8 sps:$4 sm:$0xff]   ;;  %v7119_v47 = vld [vmem:[%s10925_s17 + $0x184] ss:$8 sps:$4 sm:$0xff]  }
 0x959   :  { %6979 = vrot.lane.b32.xlu1 %v6978_v51, %s11285_s10  ;;  %6974 = vrot.lane.b32.xlu0 %v6973_v28, %s7368_s27  ;;  %v7104_v28 = vld [vmem:[%s10925_s17 + $0x134] ss:$8 sps:$4 sm:$0xff]   ;;  %v7117_v51 = vld [vmem:[%s10925_s17 + $0x180] ss:$8 sps:$4 sm:$0xff]  }
 0x9bb   :  { %v6940_v25 = vpop.permute.xlu1 %6939 }
 0x9bc   :  { %v6942_v32 = vunpack.i.h.bf16 %v6940_v25  ;;  %v6941_v41 = vunpack.i.l.bf16 %v6940_v25  ;;  %v7122_v25 = vld [vmem:[%s10925_s17 + $0x194] ss:$8 sps:$4 sm:$0xff]  }
 0x9be   :  { %v4144_v38 = vsel %vm2757_vm13, %v10371_v12, %v6942_v32  ;;  %v4143_v7 = vsel %vm2757_vm13, %v10358_v10, %v6941_v41  ;;  %vm11288_vm13 = vcmask 719872  }
 0x9bf   :  { %v4163_v58 = vpack.c.bf16 %v4144_v38, %v4143_v7  ;;  %v6950_v43 = vpop.permute.xlu1 %6949  ;;  %v6945_v26 = vpop.permute.xlu0 %6944  ;;  %v7123_v38 = vld [vmem:[%s10925_s17 + $0x1a0] ss:$8 sps:$4 sm:$0xff]   ;;  %v7128_v7 = vld [vmem:[%s10925_s17 + $0x1b4] ss:$8 sps:$4 sm:$0xff]  }
 0x9c0   :  { %v6952_v17 = vunpack.i.h.bf16 %v6950_v43  ;;  %v6951_v14 = vunpack.i.l.bf16 %v6950_v43  ;;  %v6947_v31 = vunpack.i.h.bf16 %v6945_v26  ;;  %v6946_v29 = vunpack.i.l.bf16 %v6945_v26  ;;  %v7131_v43 = vld [vmem:[%s10925_s17 + $0x1c4] ss:$8 sps:$4 sm:$0xff]   ;;  %v7129_v26 = vld [vmem:[%s10925_s17 + $0x1c0] ss:$8 sps:$4 sm:$0xff]  }
 0x9c2   :  { %v10417_v1 = vsel %vm11286_vm3, %v6947_v31, %v6952_v17  ;;  %v10420_v45 = vsel %vm11287_vm5, %v6946_v29, %v6951_v14  ;;  %v4145_v57 = vsel %vm2792_vm11, %v6941_v41, %v6946_v29  ;;  %v4146_v12 = vsel %vm2792_vm11, %v6942_v32, %v6947_v31  ;;  %v7120_v32 = vld [vmem:[%s10925_s17 + $0x190] ss:$8 sps:$4 sm:$0xff]   ;;  %v7125_v41 = vld [vmem:[%s10925_s17 + $0x1a4] ss:$8 sps:$4 sm:$0xff]   ;;  %v7135_v29 = vld [vmem:[%s10925_s17 + $0x1e0] ss:$8 sps:$4 sm:$0xff]  }
 0x9c3   :  { %v4165_v10 = vpack.c.bf16 %v10417_v1, %v10420_v45  ;;  %v6960_v37 = vpop.permute.xlu1 %6959  ;;  %v6955_v42 = vpop.permute.xlu0 %6954  ;;  %v4164_v52 = vpack.c.bf16 %v4146_v12, %v4145_v57  ;;  %v7137_v31 = vld [vmem:[%s10925_s17 + $0x1e4] ss:$8 sps:$4 sm:$0xff]   ;;  %v7140_v57 = vld [vmem:[%s10925_s17 + $0x1f4] ss:$8 sps:$4 sm:$0xff]   ;;  %v7138_v12 = vld [vmem:[%s10925_s17 + $0x1f0] ss:$8 sps:$4 sm:$0xff]  }
 0x9c4   :  { %v6962_v61 = vunpack.i.h.bf16 %v6960_v37  ;;  %v6961_v22 = vunpack.i.l.bf16 %v6960_v37  ;;  %v6957_v30 = vunpack.i.h.bf16 %v6955_v42  ;;  %v6956_v6 = vunpack.i.l.bf16 %v6955_v42  ;;  %v7143_v37 = vld [vmem:[%s10925_s17 + $0x204] ss:$8 sps:$4 sm:$0xff]   ;;  %v7152_v1 = vld [vmem:[%s10925_s17 + $0x234] ss:$8 sps:$4 sm:$0xff]   ;;  %v7150_v45 = vld [vmem:[%s10925_s17 + $0x230] ss:$8 sps:$4 sm:$0xff]  }
 0x9c5   :  { %4975 = vmatprep.mubr.bf16.mxu1 %v4164_v52 }
 0x9c6   :  { %v4150_v59 = vsel %vm3492_vm4, %v6952_v17, %v6957_v30  ;;  %v4149_v63 = vsel %vm3492_vm4, %v6951_v14, %v6956_v6  ;;  %4976 = vmatmul.mubr.bf16.vlgmr.msra.gmra.mrb[32].mxu1 %v4163_v58  ;;  %vm11289_vm4 = vmmov %vm11288_vm13  ;;  %v7126_v58 = vld [vmem:[%s10925_s17 + $0x1b0] ss:$8 sps:$4 sm:$0xff]   ;;  %v7134_v17 = vld [vmem:[%s10925_s17 + $0x1d4] ss:$8 sps:$4 sm:$0xff]  }
 0x9c7   :  { %4987 = vmatpush1.bf16.msra.mxu1 %v7093_v62  ;;  %v10434_v11 = vpop.permute.xlu0 %6964  ;;  %v4151_v8 = vsel %vm3768_vm9, %v4149_v63, %v6961_v22  ;;  %v4152_v3 = vsel %vm3768_vm9, %v4150_v59, %v6962_v61  ;;  %v10446_v20 = vpop.permute.xlu1 %6969  ;;  %vm4158_vm9 = vcmask 261120   ;;  %v7132_v14 = vld [vmem:[%s10925_s17 + $0x1d0] ss:$8 sps:$4 sm:$0xff]   ;;  %v7141_v62 = vld [vmem:[%s10925_s17 + $0x200] ss:$8 sps:$4 sm:$0xff]  }
 0x9c8   :  { %v6967_v56 = vunpack.i.h.bf16 %v10434_v11  ;;  %v6966_v15 = vunpack.i.l.bf16 %v10434_v11  ;;  %4988 = vmatprep.subr.bf16.mxu1 %v7098_v55  ;;  %v4166_v16 = vpack.c.bf16 %v4152_v3, %v4151_v8  ;;  %v6972_v36 = vunpack.i.h.bf16 %v10446_v20  ;;  %v7144_v30 = vld [vmem:[%s10925_s17 + $0x210] ss:$8 sps:$4 sm:$0xff]   ;;  %v7149_v6 = vld [vmem:[%s10925_s17 + $0x224] ss:$8 sps:$4 sm:$0xff]   ;;  %v7147_v55 = vld [vmem:[%s10925_s17 + $0x220] ss:$8 sps:$4 sm:$0xff]  }
 0x9c9   :  { %v6971_v23 = vunpack.i.l.bf16 %v10446_v20  ;;  %v7153_v59 = vld [vmem:[%s10925_s17 + $0x240] ss:$8 sps:$4 sm:$0xff]   ;;  %v7158_v63 = vld [vmem:[%s10925_s17 + $0x254] ss:$8 sps:$4 sm:$0xff]   ;;  %v7156_v11 = vld [vmem:[%s10925_s17 + $0x250] ss:$8 sps:$4 sm:$0xff]  }
 0x9ca   :  { %v10451_v33 = vsel %vm11288_vm13, %v6962_v61, %v6967_v56  ;;  %v10456_v27 = vsel %vm11289_vm4, %v6961_v22, %v6966_v15  ;;  %5018 = vmatprep.mubr.bf16.mxu1 %v4166_v16  ;;  %v4157_v52 = vsel %vm4155_vm1, %v6967_v56, %v6972_v36  ;;  %v7146_v61 = vld [vmem:[%s10925_s17 + $0x214] ss:$8 sps:$4 sm:$0xff]   ;;  %v7159_v8 = vld [vmem:[%s10925_s17 + $0x260] ss:$8 sps:$4 sm:$0xff]   ;;  %v7162_v56 = vld [vmem:[%s10925_s17 + $0x270] ss:$8 sps:$4 sm:$0xff]  }
 0x9cb   :  { %v4167_v21 = vpack.c.bf16 %v10451_v33, %v10456_v27  ;;  %4989 = vmatpush1.bf16.msra.mxu1 %v7096_v60  ;;  %v10460_v46 = vpop.permute.xlu0 %6974  ;;  %v4156_v42 = vsel %vm4155_vm1, %v6966_v15, %v6971_v23  ;;  %v7161_v60 = vld [vmem:[%s10925_s17 + $0x264] ss:$8 sps:$4 sm:$0xff]   ;;  %v7164_v3 = vld [vmem:[%s10925_s17 + $0x274] ss:$8 sps:$4 sm:$0xff]   ;;  %v7168_v16 = vld [vmem:[%s10925_s17 + $0x290] ss:$8 sps:$4 sm:$0xff]  }
 0x9cc   :  { %v6977_v53 = vunpack.i.h.bf16 %v10460_v46  ;;  %v6976_v34 = vunpack.i.l.bf16 %v10460_v46  ;;  %4990 = vmatprep.subr.bf16.mxu1 %v7101_v2  ;;  %v4168_v22 = vpack.c.bf16 %v4157_v52, %v4156_v42  ;;  %v7167_v15 = vld [vmem:[%s10925_s17 + $0x284] ss:$8 sps:$4 sm:$0xff]   ;;  %v7165_v2 = vld [vmem:[%s10925_s17 + $0x280] ss:$8 sps:$4 sm:$0xff]   ;;  %v7170_v20 = vld [vmem:[%s10925_s17 + $0x294] ss:$8 sps:$4 sm:$0xff]  }
 0x9cd   :  { %v7192_v46 = vld [vmem:[%s10925_s17 + $0x310] ss:$8 sps:$4 sm:$0xff]   ;;  %v7200_v33 = vld [vmem:[%s10925_s17 + $0x334] ss:$8 sps:$4 sm:$0xff]   ;;  %vm11293_vm4 = vcmask 1045504   ;;  %vm5420_vm1 = vcmask 80896  }
 0x9ce   :  { %v10476_v50 = vsel %vm4158_vm9, %v6972_v36, %v6977_v53  ;;  %v10480_v9 = vsel %vm4158_vm9, %v6971_v23, %v6976_v34  ;;  %v7171_v36 = vld [vmem:[%s10925_s17 + $0x2a0] ss:$8 sps:$4 sm:$0xff]   ;;  %v7176_v23 = vld [vmem:[%s10925_s17 + $0x2b4] ss:$8 sps:$4 sm:$0xff]   ;;  %v7198_v27 = vld [vmem:[%s10925_s17 + $0x330] ss:$8 sps:$4 sm:$0xff]  }
 0x9cf   :  { %v4169_v4 = vpack.c.bf16 %v10476_v50, %v10480_v9  ;;  %4991 = vmatpush1.bf16.msra.mxu1 %v7099_v18  ;;  %v7173_v18 = vld [vmem:[%s10925_s17 + $0x2a4] ss:$8 sps:$4 sm:$0xff]   ;;  %v7218_v42 = vld [vmem:[%s10925_s17 + $0x394] ss:$8 sps:$4 sm:$0xff]   ;;  %v7216_v52 = vld [vmem:[%s10925_s17 + $0x390] ss:$8 sps:$4 sm:$0xff]  }
 0x9d0   :  { %4992 = vmatprep.subr.bf16.mxu1 %v7104_v28  ;;  %v7174_v28 = vld [vmem:[%s10925_s17 + $0x2b0] ss:$8 sps:$4 sm:$0xff]   ;;  %vm11294_vm9 = vmmov %vm11293_vm4 }
 0x9d1   :  { %v5288_v50 = vld [vmem:[%s10930_s22 + $0x18] sm:$0xff] }
 0x9d3   :  { %4993 = vmatpush1.bf16.msra.mxu1 %v7102_v39  ;;  %v7179_v39 = vld [vmem:[%s10925_s17 + $0x2c4] ss:$8 sps:$4 sm:$0xff]  }
 0x9d4   :  { %4994 = vmatprep.subr.bf16.mxu1 %v7107_v40  ;;  %v7177_v40 = vld [vmem:[%s10925_s17 + $0x2c0] ss:$8 sps:$4 sm:$0xff]  }
 0x9d7   :  { %4995 = vmatpush1.bf16.msra.mxu1 %v7105_v24  ;;  %v7182_v24 = vld [vmem:[%s10925_s17 + $0x2d4] ss:$8 sps:$4 sm:$0xff]  }
 0x9d8   :  { %4996 = vmatprep.subr.bf16.mxu1 %v7110_v5  ;;  %v7180_v5 = vld [vmem:[%s10925_s17 + $0x2d0] ss:$8 sps:$4 sm:$0xff]  }
 0x9db   :  { %4997 = vmatpush1.bf16.msra.mxu1 %v7108_v48  ;;  %v7185_v48 = vld [vmem:[%s10925_s17 + $0x2e4] ss:$8 sps:$4 sm:$0xff]  }
 0x9dc   :  { %4998 = vmatprep.subr.bf16.mxu1 %v7113_v19  ;;  %v6980_v19 = vpop.permute.xlu1 %6979 }
 0x9df   :  { %4999 = vmatpush1.bf16.msra.mxu1 %v7111_v49  ;;  %v7183_v49 = vld [vmem:[%s10925_s17 + $0x2e0] ss:$8 sps:$4 sm:$0xff]  }
 0x9e0   :  { %5000 = vmatprep.subr.bf16.mxu1 %v7116_v44  ;;  %v7188_v44 = vld [vmem:[%s10925_s17 + $0x2f4] ss:$8 sps:$4 sm:$0xff]  }
 0x9e3   :  { %5001 = vmatpush1.bf16.msra.mxu1 %v7114_v13  ;;  %v6982_v13 = vunpack.i.h.bf16 %v6980_v19 }
 0x9e4   :  { %5002 = vmatprep.subr.bf16.mxu1 %v7119_v47  ;;  %v6981_v47 = vunpack.i.l.bf16 %v6980_v19 }
 0x9e7   :  { %5003 = vmatpush1.bf16.msra.mxu1 %v7117_v51  ;;  %v7186_v51 = vld [vmem:[%s10925_s17 + $0x2f0] ss:$8 sps:$4 sm:$0xff]  }
 0x9e8   :  { %5004 = vmatprep.subr.bf16.mxu1 %v7122_v25  ;;  %v7191_v25 = vld [vmem:[%s10925_s17 + $0x304] ss:$8 sps:$4 sm:$0xff]  }
 0x9eb   :  { %5005 = vmatpush1.bf16.msra.mxu1 %v7120_v32  ;;  %v4162_v32 = vsel %vm11290_vm6, %v6977_v53, %v6982_v13  ;;  %v7197_v53 = vld [vmem:[%s10925_s17 + $0x324] ss:$8 sps:$4 sm:$0xff]   ;;  %vm5496_vm6 = vcmask 25600  }
 0x9ec   :  { %5006 = vmatprep.subr.bf16.mxu1 %v7125_v41  ;;  %v4161_v41 = vsel %vm11291_vm8, %v6976_v34, %v6981_v47  ;;  %v7195_v34 = vld [vmem:[%s10925_s17 + $0x320] ss:$8 sps:$4 sm:$0xff]  }
 0x9ed   :  { %v5301_v47 = vld [vmem:[%s10930_s22 + $0x80] sm:$0xff] }
 0x9ef   :  { %5007 = vmatpush1.bf16.msra.mxu1 %v7123_v38  ;;  %v7189_v38 = vld [vmem:[%s10925_s17 + $0x300] ss:$8 sps:$4 sm:$0xff]  }
 0x9f0   :  { %5008 = vmatprep.subr.bf16.mxu1 %v7128_v7  ;;  %v7194_v7 = vld [vmem:[%s10925_s17 + $0x314] ss:$8 sps:$4 sm:$0xff]  }
 0x9f3   :  { %5009 = vmatpush1.bf16.msra.mxu1 %v7126_v58  ;;  %v4170_v58 = vpack.c.bf16 %v4162_v32, %v4161_v41  ;;  %v5303_v32 = vld [vmem:[%s10930_s22 + $0x90] sm:$0xff]  ;;  %v5304_v41 = vld [vmem:[%s10930_s22 + $0x98] sm:$0xff] }
 0x9f4   :  { %5010 = vmatprep.subr.bf16.mxu1 %v7131_v43  ;;  %v7201_v43 = vld [vmem:[%s10925_s17 + $0x340] ss:$8 sps:$4 sm:$0xff]  }
 0x9f7   :  { %5011 = vmatpush1.bf16.msra.mxu1 %v7129_v26  ;;  %v7206_v26 = vld [vmem:[%s10925_s17 + $0x354] ss:$8 sps:$4 sm:$0xff]  }
 0x9f8   :  { %5012 = vmatprep.subr.bf16.mxu1 %v7134_v17  ;;  %v7204_v17 = vld [vmem:[%s10925_s17 + $0x350] ss:$8 sps:$4 sm:$0xff]  }
 0x9fb   :  { %5013 = vmatpush1.bf16.msra.mxu1 %v7132_v14  ;;  %v7209_v14 = vld [vmem:[%s10925_s17 + $0x364] ss:$8 sps:$4 sm:$0xff]  }
 0x9fc   :  { %5014 = vmatprep.subr.bf16.mxu1 %v7137_v31  ;;  %v7207_v31 = vld [vmem:[%s10925_s17 + $0x360] ss:$8 sps:$4 sm:$0xff]  }
 0x9ff   :  { %5015 = vmatpush1.bf16.msra.mxu1 %v7135_v29  ;;  %v7212_v29 = vld [vmem:[%s10925_s17 + $0x374] ss:$8 sps:$4 sm:$0xff]  }
 0xa00   :  { %5016 = vmatprep.subr.bf16.mxu1 %v7140_v57  ;;  %v7210_v57 = vld [vmem:[%s10925_s17 + $0x370] ss:$8 sps:$4 sm:$0xff]  }
 0xa03   :  { %5017 = vmatpush1.bf16.msra.mxu1 %v7138_v12  ;;  %v7215_v12 = vld [vmem:[%s10925_s17 + $0x384] ss:$8 sps:$4 sm:$0xff]  }
 0xa04   :  { %5029 = vmatprep.subr.bf16.mxu1 %v7143_v37  ;;  %v7213_v37 = vld [vmem:[%s10925_s17 + $0x380] ss:$8 sps:$4 sm:$0xff]  }
 0xa06   :  { %5019 = vmatmul.mubr.bf16.vlgmr.msra.gmra.mrb[32].mxu1 %v4165_v10  ;;  %v7155_v10 = vld [vmem:[%s10925_s17 + $0x244] ss:$8 sps:$4 sm:$0xff]  }
 0xa07   :  { %5030 = vmatpush1.bf16.msra.mxu1 %v7141_v62  ;;  %5061 = vmatprep.mubr.bf16.mxu1 %v4168_v22  ;;  %v7221_v62 = vld [vmem:[%s10925_s17 + $0x3a4] ss:$8 sps:$4 sm:$0xff]   ;;  %v7224_v22 = vld [vmem:[%s10925_s17 + $0x3b4] ss:$8 sps:$4 sm:$0xff]  }
 0xa08   :  { %5031 = vmatprep.subr.bf16.mxu1 %v7146_v61  ;;  %v7219_v61 = vld [vmem:[%s10925_s17 + $0x3a0] ss:$8 sps:$4 sm:$0xff]  }
 0xa0b   :  { %5032 = vmatpush1.bf16.msra.mxu1 %v7144_v30  ;;  %v7222_v30 = vld [vmem:[%s10925_s17 + $0x3b0] ss:$8 sps:$4 sm:$0xff]  }
 0xa0c   :  { %5033 = vmatprep.subr.bf16.mxu1 %v7149_v6  ;;  %v7227_v6 = vld [vmem:[%s10925_s17 + $0x3c4] ss:$8 sps:$4 sm:$0xff]  }
 0xa0f   :  { %5034 = vmatpush1.bf16.msra.mxu1 %v7147_v55  ;;  %v7225_v55 = vld [vmem:[%s10925_s17 + $0x3c0] ss:$8 sps:$4 sm:$0xff]  }
 0xa10   :  { %5035 = vmatprep.subr.bf16.mxu1 %v7152_v1  ;;  %v7230_v1 = vld [vmem:[%s10925_s17 + $0x3d4] ss:$8 sps:$4 sm:$0xff]  }
 0xa13   :  { %5036 = vmatpush1.bf16.msra.mxu1 %v7150_v45  ;;  %v4295_v45 = vld [vmem:[%s10925_s17 + $0x3e0] sm:$0xff] }
 0xa14   :  { %5037 = vmatprep.subr.bf16.mxu1 %v7155_v10  ;;  %v7228_v10 = vld [vmem:[%s10925_s17 + $0x3d0] ss:$8 sps:$4 sm:$0xff]  }
 0xa17   :  { %5038 = vmatpush1.bf16.msra.mxu1 %v7153_v59  ;;  %v5803_v59 = vcombine.high %v4295_v45, %v4295_v45 }
 0xa18   :  { %5039 = vmatprep.subr.bf16.mxu1 %v7158_v63  ;;  %v5802_v63 = vcombine.low %v4295_v45, %v4295_v45 }
 0xa1b   :  { %5040 = vmatpush1.bf16.msra.mxu1 %v7156_v11  ;;  %v4938_v11 = vsel %vm11292_vm15, %v5802_v63, 0 }
 0xa1c   :  { %5041 = vmatprep.subr.bf16.mxu1 %v7161_v60  ;;  %v5285_v60 = vld [vmem:[%s10930_s22] sm:$0xff] }
 0xa1f   :  { %5042 = vmatpush1.bf16.msra.mxu1 %v7159_v8  ;;  %v5286_v8 = vld [vmem:[%s10930_s22 + $0x8] sm:$0xff] }
 0xa20   :  { %5043 = vmatprep.subr.bf16.mxu1 %v7164_v3  ;;  %v5287_v3 = vld [vmem:[%s10930_s22 + $0x10] sm:$0xff] }
 0xa21   :  { %v6087_v9 = vpack.c.bf16 %v5288_v50, %v5287_v3  ;;  %v5172_v3 = vld [vmem:[%s10927_s19] sm:$0x3] }
 0xa23   :  { %5044 = vmatpush1.bf16.msra.mxu1 %v7162_v56  ;;  %v6084_v56 = vpack.c.bf16 %v5286_v8, %v5285_v60 }
 0xa24   :  { %5045 = vmatprep.subr.bf16.mxu1 %v7167_v15  ;;  %v5290_v15 = vld [vmem:[%s10930_s22 + $0x28] sm:$0xff] }
 0xa25   :  { %6085 = vmatpush1.bf16.msra.mxu0 %v6084_v56 }
 0xa26   :  { %6086 = vmatprep.subr.bf16.mxu0 %v11230_v35 }
 0xa27   :  { %5046 = vmatpush1.bf16.msra.mxu1 %v7165_v2 }
 0xa28   :  { %5047 = vmatprep.subr.bf16.mxu1 %v7170_v20  ;;  %v5291_v20 = vld [vmem:[%s10930_s22 + $0x30] sm:$0xff] }
 0xa29   :  { %6088 = vmatpush1.bf16.msra.mxu0 %v6087_v9 }
 0xa2a   :  { %6089 = vmatprep.subr.bf16.mxu0 %v11230_v35 }
 0xa2b   :  { %5048 = vmatpush1.bf16.msra.mxu1 %v7168_v16  ;;  %v5292_v16 = vld [vmem:[%s10930_s22 + $0x38] sm:$0xff] }
 0xa2c   :  { %5049 = vmatprep.subr.bf16.mxu1 %v7173_v18  ;;  %v6093_v18 = vpack.c.bf16 %v5292_v16, %v5291_v20 }
 0xa2f   :  { %5050 = vmatpush1.bf16.msra.mxu1 %v7171_v36  ;;  %v5293_v36 = vld [vmem:[%s10930_s22 + $0x40] sm:$0xff] }
 0xa30   :  { %5051 = vmatprep.subr.bf16.mxu1 %v7176_v23  ;;  %v5294_v23 = vld [vmem:[%s10930_s22 + $0x48] sm:$0xff] }
 0xa33   :  { %5052 = vmatpush1.bf16.msra.mxu1 %v7174_v28  ;;  %v6096_v28 = vpack.c.bf16 %v5294_v23, %v5293_v36 }
 0xa34   :  { %5053 = vmatprep.subr.bf16.mxu1 %v7179_v39  ;;  %v5295_v39 = vld [vmem:[%s10930_s22 + $0x50] sm:$0xff] }
 0xa37   :  { %5054 = vmatpush1.bf16.msra.mxu1 %v7177_v40  ;;  %v5296_v40 = vld [vmem:[%s10930_s22 + $0x58] sm:$0xff] }
 0xa38   :  { %5055 = vmatprep.subr.bf16.mxu1 %v7182_v24  ;;  %v6099_v24 = vpack.c.bf16 %v5296_v40, %v5295_v39  ;;  %v5188_v40 = vld [vmem:[%s10928_s20] sm:$0x3] }
 0xa3b   :  { %5056 = vmatpush1.bf16.msra.mxu1 %v7180_v5  ;;  %v5297_v5 = vld [vmem:[%s10930_s22 + $0x60] sm:$0xff] }
 0xa3c   :  { %5057 = vmatprep.subr.bf16.mxu1 %v7185_v48  ;;  %v5298_v48 = vld [vmem:[%s10930_s22 + $0x68] sm:$0xff] }
 0xa3d   :  { %v6102_v19 = vpack.c.bf16 %v5298_v48, %v5297_v5 }
 0xa3f   :  { %5058 = vmatpush1.bf16.msra.mxu1 %v7183_v49  ;;  %v5299_v49 = vld [vmem:[%s10930_s22 + $0x70] sm:$0xff] }
 0xa40   :  { %5059 = vmatprep.subr.bf16.mxu1 %v7188_v44  ;;  %v5300_v44 = vld [vmem:[%s10930_s22 + $0x78] sm:$0xff] }
 0xa41   :  { %v6105_v13 = vpack.c.bf16 %v5300_v44, %v5299_v49 }
 0xa43   :  { %5060 = vmatpush1.bf16.msra.mxu1 %v7186_v51  ;;  %v5302_v51 = vld [vmem:[%s10930_s22 + $0x88] sm:$0xff] }
 0xa44   :  { %5072 = vmatprep.subr.bf16.mxu1 %v7191_v25  ;;  %v6108_v25 = vpack.c.bf16 %v5302_v51, %v5301_v47 }
 0xa46   :  { %5062 = vmatmul.mubr.bf16.vlgmr.msra.gmra.mrb[32].mxu1 %v4167_v21  ;;  %v7203_v21 = vld [vmem:[%s10925_s17 + $0x344] ss:$8 sps:$4 sm:$0xff]  }
 0xa47   :  { %5073 = vmatpush1.bf16.msra.mxu1 %v7189_v38  ;;  %5805 = vmatprep.mubr.msk.bf16.mxu1 %vm4933_vm14, %v4170_v58  ;;  %v6111_v38 = vpack.c.bf16 %v5304_v41, %v5303_v32  ;;  %v5306_v58 = vld [vmem:[%s10930_s22 + $0xa8] sm:$0xff] }
 0xa48   :  { %5074 = vmatprep.subr.bf16.mxu1 %v7194_v7  ;;  %v5305_v7 = vld [vmem:[%s10930_s22 + $0xa0] sm:$0xff] }
 0xa4b   :  { %5075 = vmatpush1.bf16.msra.mxu1 %v7192_v46  ;;  %v6114_v46 = vpack.c.bf16 %v5306_v58, %v5305_v7 }
 0xa4c   :  { %5076 = vmatprep.subr.bf16.mxu1 %v7197_v53  ;;  %v5307_v53 = vld [vmem:[%s10930_s22 + $0xb0] sm:$0xff] }
 0xa4f   :  { %5077 = vmatpush1.bf16.msra.mxu1 %v7195_v34  ;;  %v5308_v34 = vld [vmem:[%s10930_s22 + $0xb8] sm:$0xff] }
 0xa50   :  { %5078 = vmatprep.subr.bf16.mxu1 %v7200_v33  ;;  %v6117_v33 = vpack.c.bf16 %v5308_v34, %v5307_v53 }
 0xa53   :  { %5079 = vmatpush1.bf16.msra.mxu1 %v7198_v27  ;;  %v4298_v27 = vlaneseq }
 0xa54   :  { %5080 = vmatprep.subr.bf16.mxu1 %v7203_v21 }
 0xa55   :  { %v4299_v21 = vshrl.u32 %v4298_v27, 7 }
 0xa57   :  { %5081 = vmatpush1.bf16.msra.mxu1 %v7201_v43  ;;  %v4300_v43 = vsub.s32 0, %v4299_v21 }
 0xa58   :  { %5082 = vmatprep.subr.bf16.mxu1 %v7206_v26  ;;  %v4296_v26 = vld [vmem:[%s10926_s18] sm:$0x3] }
 0xa59   :  { %v5177_v16 = vrot.slane %v5172_v3, %v4300_v43 }
 0xa5b   :  { %5083 = vmatpush1.bf16.msra.mxu1 %v7204_v17  ;;  %v10853_v17 = vsub.s32 1, %v4299_v21 }
 0xa5c   :  { %5084 = vmatprep.subr.bf16.mxu1 %v7209_v14  ;;  %v4301_v14 = vrot.slane %v4296_v26, %v4300_v43 }
 0xa5d   :  { %v5181_v49 = vrot.slane %v5172_v3, %v10853_v17  ;;  %v5197_v34 = vrot.slane %v5188_v40, %v10853_v17 }
 0xa5f   :  { %5085 = vmatpush1.bf16.msra.mxu1 %v7207_v31  ;;  %v4305_v31 = vrot.slane %v4296_v26, %v10853_v17  ;;  %v5309_v17 = vld [vmem:[%s10930_s22 + $0xc0] sm:$0xff] }
 0xa60   :  { %5086 = vmatprep.subr.bf16.mxu1 %v7212_v29 }
 0xa63   :  { %5087 = vmatpush1.bf16.msra.mxu1 %v7210_v57 }
 0xa64   :  { %5088 = vmatprep.subr.bf16.mxu1 %v7215_v12 }
 0xa67   :  { %5089 = vmatpush1.bf16.msra.mxu1 %v7213_v37 }
 0xa68   :  { %5090 = vmatprep.subr.bf16.mxu1 %v7218_v42 }
 0xa6b   :  { %5091 = vmatpush1.bf16.msra.mxu1 %v7216_v52 }
 0xa6c   :  { %5092 = vmatprep.subr.bf16.mxu1 %v7221_v62 }
 0xa6f   :  { %5093 = vmatpush1.bf16.msra.mxu1 %v7219_v61 }
 0xa70   :  { %5094 = vmatprep.subr.bf16.mxu1 %v7224_v22 }
 0xa73   :  { %5095 = vmatpush1.bf16.msra.mxu1 %v7222_v30 }
 0xa74   :  { %5096 = vmatprep.subr.bf16.mxu1 %v7227_v6 }
 0xa77   :  { %5097 = vmatpush1.bf16.msra.mxu1 %v7225_v55 }
 0xa78   :  { %5098 = vmatprep.subr.bf16.mxu1 %v7230_v1 }
 0xa7b   :  { %5099 = vmatpush1.bf16.msra.mxu1 %v7228_v10 }
 0xa7c   :  { %5804 = vmatprep.subr.msk.bf16.mxu1 %vm11281_vm7, %v5803_v59 }
 0xa7f   :  { %5101 = vmatpush1.bf16.msra.mxu1 %v4938_v11 }
 0xa82   :  { %5105 = vmatmul.mubr.bf16.vlgmr.msra.gmra.mrb[32].mxu1 %v4169_v4  ;;  %v5289_v4 = vld [vmem:[%s10930_s22 + $0x20] sm:$0xff] }
 0xa83   :  { %5278 = vmatprep.mubr.f32.mxu1 %v11242_v0  ;;  %v6090_v2 = vpack.c.bf16 %v5290_v15, %v5289_v4 }
 0xa85   :  { %6091 = vmatpush1.bf16.msra.mxu0 %v6090_v2 }
 0xa86   :  { %6092 = vmatprep.subr.bf16.mxu0 %v11230_v35 }
 0xa89   :  { %6094 = vmatpush1.bf16.msra.mxu0 %v6093_v18 }
 0xa8a   :  { %6095 = vmatprep.subr.bf16.mxu0 %v11230_v35 }
 0xa8d   :  { %6097 = vmatpush1.bf16.msra.mxu0 %v6096_v28 }
 0xa8e   :  { %6098 = vmatprep.subr.bf16.mxu0 %v11230_v35 }
 0xa91   :  { %6100 = vmatpush1.bf16.msra.mxu0 %v6099_v24 }
 0xa92   :  { %6101 = vmatprep.subr.bf16.mxu0 %v11230_v35 }
 0xa95   :  { %6103 = vmatpush1.bf16.msra.mxu0 %v6102_v19 }
 0xa96   :  { %6104 = vmatprep.subr.bf16.mxu0 %v11230_v35 }
 0xa99   :  { %6106 = vmatpush1.bf16.msra.mxu0 %v6105_v13 }
 0xa9a   :  { %6107 = vmatprep.subr.bf16.mxu0 %v11230_v35 }
 0xa9d   :  { %6109 = vmatpush1.bf16.msra.mxu0 %v6108_v25 }
 0xa9e   :  { %6110 = vmatprep.subr.bf16.mxu0 %v11230_v35 }
 0xaa1   :  { %6112 = vmatpush1.bf16.msra.mxu0 %v6111_v38  ;;  %v5193_v38 = vrot.slane %v5188_v40, %v4300_v43  ;;  %v5171_v43 = vld [vmem:[%s10929_s21] sm:$0x3]  ;;  %s7369_s21 = smov 108  }
 0xaa2   :  { %6113 = vmatprep.subr.bf16.mxu0 %v11230_v35 }
 0xaa5   :  { %6115 = vmatpush1.bf16.msra.mxu0 %v6114_v46 }
 0xaa6   :  { %6116 = vmatprep.subr.bf16.mxu0 %v11230_v35 }
 0xaa9   :  { %6118 = vmatpush1.bf16.msra.mxu0 %v6117_v33 }
 0xaaa   :  { %5368 = vmatprep.subr.mxu0 %v11242_v0 }
 0xaad   :  { %5369 = vmatpush1.msra.mxu0 %v5309_v17 }
 0xaae   :  { %6119 = vmatprep.subr.bf16.mxu0 %v11230_v35 }
 0xb55   :  { %v5106_v29 = vpop.f32.mrb[32].mxu1 }
 0xb56   :  { %v6123_v57 = vadd.f32 %v5106_v29, %v4301_v14  ;;  %v5108_v12 = vpop.f32.mrb[33].mxu1 }
 0xb57   :  { %v6124_v37 = vadd.f32 %v5108_v12, %v4305_v31  ;;  %v5110_v42 = vpop.f32.mrb[34].mxu1 }
 0xb58   :  { %v5119_v52 = vmin.f32 %v6123_v57, 0.0  ;;  %v6125_v62 = vadd.f32 %v5110_v42, %v4301_v14  ;;  %v5112_v61 = vpop.f32.mrb[35].mxu1  ;;  %vm5115_vm12 = vcmp.gt.f32.partialorder %v6123_v57, 0.0 }
 0xb59   :  { %v5120_v22 = vmin.f32 %v6124_v37, 0.0  ;;  %v6126_v30 = vadd.f32 %v5112_v61, %v4305_v31  ;;  %vm5116_vm3 = vcmp.gt.f32.partialorder %v6124_v37, 0.0 }
 0xb5a   :  { %v5123_v6 = vmul.f32 1.442695, %v5119_v52  ;;  %v5121_v55 = vmin.f32 %v6125_v62, 0.0  ;;  %vm5117_vm5 = vcmp.gt.f32.partialorder %v6125_v62, 0.0 }
 0xb5b   :  { %v5125_v1 = vmul.f32 1.442695, %v5120_v22  ;;  %v5122_v45 = vmin.f32 %v6126_v30, 0.0  ;;  %vm5118_vm13 = vcmp.gt.f32.partialorder %v6126_v30, 0.0 }
 0xb5c   :  { %7301 = vpow2.f32 %v5123_v6  ;;  %v5127_v10 = vmul.f32 1.442695, %v5121_v55 }
 0xb5d   :  { %7303 = vpow2.f32 %v5125_v1  ;;  %v5129_v59 = vmul.f32 1.442695, %v5122_v45 }
 0xb5e   :  { %7305 = vpow2.f32 %v5127_v10 }
 0xb5f   :  { %7307 = vpow2.f32 %v5129_v59 }
 0xb66   :  { %v7302_v63 = vpop.eup %7301 }
 0xb67   :  { %v7304_v11 = vpop.eup %7303  ;;  %v5806_v60 = vadd.f32 -1.0, %v7302_v63  ;;  %v5409_v63 = vld [vmem:[%s10932_s24 + $0x8] sm:$0x3] }
 0xb68   :  { %v7306_v8 = vpop.eup %7305  ;;  %v5807_v56 = vadd.f32 -1.0, %v7304_v11 }
 0xb69   :  { %v7308_v50 = vpop.eup %7307  ;;  %v5135_v9 = vsel %vm5115_vm12, %v6123_v57, %v5806_v60  ;;  %v5808_v4 = vadd.f32 -1.0, %v7306_v8 }
 0xb6a   :  { %v5136_v15 = vsel %vm5116_vm3, %v6124_v37, %v5807_v56  ;;  %v5809_v2 = vadd.f32 -1.0, %v7308_v50  ;;  %v5143_v20 = vrot.slane %v5135_v9, 1  ;;  %v5157_v36 = vrot.slane %v5135_v9, 2  ;;  %v5816_v50 = vld [vmem:[%s10933_s25] ss:$0 sm:$0xff] }
 0xb6b   :  { %v5137_v18 = vsel %vm5117_vm5, %v6125_v62, %v5808_v4  ;;  %v5146_v24 = vrot.slane %v5136_v15, 1  ;;  %v5160_v5 = vrot.slane %v5136_v15, 2 }
 0xb6c   :  { %v5144_v23 = vrot.slane %v5137_v18, 1  ;;  %v5158_v28 = vrot.slane %v5137_v18, 2  ;;  %v5138_v39 = vsel %vm5118_vm13, %v6126_v30, %v5809_v2 }
 0xb6d   :  { %v5147_v48 = vrot.slane %v5138_v39, 1  ;;  %v5161_v19 = vrot.slane %v5138_v39, 2 }
 0xb6e   :  { %v5145_v44 = vsel %vm428_vm2, %v5143_v20, %v5144_v23  ;;  %v5155_v13 = vmax.f32 %v5137_v18, %v5144_v23  ;;  %v5159_v47 = vsel %vm11293_vm4, %v5157_v36, %v5158_v28 }
 0xb6f   :  { %v5153_v51 = vmax.f32 %v5135_v9, %v5145_v44  ;;  %v5148_v25 = vsel %vm428_vm2, %v5146_v24, %v5147_v48  ;;  %v5156_v32 = vmax.f32 %v5138_v39, %v5147_v48  ;;  %v5162_v41 = vsel %vm11294_vm9, %v5160_v5, %v5161_v19 }
 0xb70   :  { %v5169_v7 = vmax.f32 %v5155_v13, %v5158_v28  ;;  %v5154_v58 = vmax.f32 %v5136_v15, %v5148_v25  ;;  %vm5204_vm2 = vcmask 105472  }
 0xb71   :  { %v5167_v46 = vmax.f32 %v5153_v51, %v5159_v47  ;;  %v5170_v53 = vmax.f32 %v5156_v32, %v5161_v19 }
 0xb72   :  { %v5186_v33 = vmul.f32 %v5177_v16, %v5169_v7  ;;  %v5168_v27 = vmax.f32 %v5154_v58, %v5162_v41 }
 0xb73   :  { %v5184_v21 = vmul.f32 %v5177_v16, %v5167_v46  ;;  %v5187_v26 = vmul.f32 %v5181_v49, %v5170_v53 }
 0xb74   :  { %v5202_v14 = vadd.f32 %v5193_v38, %v5186_v33  ;;  %v5185_v31 = vmul.f32 %v5181_v49, %v5168_v27 }
 0xb75   :  { %v5203_v29 = vadd.f32 %v5197_v34, %v5187_v26  ;;  %v5200_v57 = vadd.f32 %v5193_v38, %v5184_v21 }
 0xb76   :  { %v5201_v12 = vadd.f32 %v5197_v34, %v5185_v31 }
 0xb77   :  { %v6080_v37 = vpack.c.bf16 %v5202_v14, %v5200_v57 }
 0xb78   :  { %v6077_v42 = vpack.c.bf16 %v5203_v29, %v5201_v12 }
 0xb7a   :  { %6079 = vmatprep.subr.msk.bf16.mxu1 %vm9956_vm0, %v6077_v42 }
 0xb7b   :  { %6082 = vmatpush1.bf16.msk.msra.mxu1 %vm9956_vm0, %v6080_v37 }
 0xb7e   :  { %5812 = vmatmul.mubr.msk.f32.vlgmr.msra.gmra.mrb[30].mxu1 %vm5204_vm2, %v5171_v43 }
 0xc51   :  { %v5280_v52 = vpop.f32.mrb[30].mxu1 }
 0xc52   :  { %v5282_v62 = vpop.f32.mrb[31].mxu1 }
 0xc53   :  { %5814 = vmatprep.mubr.msk.f32.mxu0 %vm2792_vm11, %v5282_v62  ;;  %vm11295_vm11 = vmmov 1  }
 0xc54   :  { %5385 = vmatmul.mubr.f32.vlgmr.msra.gmra.mrb[118].mxu0 %v5280_v52 }
 0xc55   :  { %5990 = vmatprep.mubr.msk.f32.mxu0 %vm7362_vm10, %v11242_v0  ;;  %v5408_v0 = vld [vmem:[%s10932_s24] sm:$0xff]  ;;  %vm11296_vm10 = vcmask 1041408   ;;  %s7372_s24 = smov [#allocation2]  }
 0xc56   :  { %vm6121_vm0 = vmpackc.low %vm11296_vm10, %vm11295_vm11  ;;  %v6120_v11 = vpack.c.bf16 %v5409_v63, %v5408_v0  ;;  %s5504_s8 = sshll.u32 %s7372_s24, 4  ;;  %s5505_s8 = int_to_ptr.vmem [resolvable:$true] %s5504_s8 }
 0xc57   :  { %s7317_s15 = scalar_lea.vmem %s5505_s8, 32  ;;  %p7322_p1 = scmp.lt.s32.totalorder %s5505_s8, %s5505_s8 }
 0xc58   :  { %6122 = vmatpush3.bf16.msk.msra.mxu0 %vm6121_vm0, %v6120_v11  ;;  %p7318_p0 = scmp.ne.s32.totalorder %s5505_s8, %s7317_s15  ;;  %p7323_p2 = scmp.lt.s32.totalorder %s7317_s15, %s7317_s15 }
 0xc5a   :  { %p7324_p3 = por %p7323_p2, %p7322_p1 }
 0xc5c   :  { %p7325_p4 = pnand %p7324_p3, %p7318_p0 }
 0xd27   :  { %v5386_v61 = vpop.f32.mrb[118].mxu0 }
 0xd28   :  { %v5387_v22 = vadd.f32 %v5813_v54, %v5386_v61  ;;  %v5388_v30 = vpop.f32.mrb[119].mxu0 }
 0xd2a   :  { %7309 = vtanh.f32 %v5387_v22  ;;  %v5815_v35 = vmul.f32 -1.442695, %v5387_v22 }
 0xd2c   :  { %7311 = vpow2.f32 %v5815_v35 }
 0xd34   :  { %v7310_v6 = vpop.eup %7309 }
 0xd35   :  { %5398 = vrot.lane.b32.xlu0 %v7310_v6, %s7369_s21 }
 0xd36   :  { %v7312_v55 = vpop.eup %7311 }
 0xd37   :  { %v5393_v1 = vadd.f32 1.0, %v7312_v55 }
 0xd39   :  { %7313 = vrcp.f32 %v5393_v1 }
 0xd43   :  { %v7314_v45 = vpop.eup %7313 }
 0xda7   :  { %v5399_v10 = vpop.permute.xlu0 %5398 }
 0xda8   :  { %v5401_v59 = vmul.f32 %v7314_v45, %v5399_v10 }
 0xdaa   :  { %7315 = vtanh.f32 %v5401_v59 }
 0xdb4   :  { %v7316_v60 = vpop.eup %7315 }
 0xdb5   :  { %5404 = vrot.lane.b32.xlu1 %v7316_v60, %s7370_s16 }
 0xe27   :  { %v5405_v8 = vpop.permute.xlu1 %5404 }
 0xe28   :  { %v5407_v3 = vmul.f32 %v7314_v45, %v5405_v8 }
 0xe2a   :  { %5418 = vrot.lane.b32.xlu0 %v5407_v3, %s7371_s11 }
 0xe9c   :  { %v5419_v56 = vpop.permute.xlu0 %5418 }
 0xe9d   :  { %5991 = vmatmul.mubr.msk.f32.vlgmr.msra.gmra.mrb[128].mxu0 %vm5420_vm1, %v5419_v56 }
 0xf70   :  { %v5492_v9 = vpop.f32.mrb[128].mxu0 }
 0xf71   :  { %v5493_v4 = vadd.f32 %v5816_v50, %v5492_v9  ;;  %v5992_v15 = vpop.f32.mrb[129].mxu0 }
 0xf73   :  { %5497 = vst.msk [vmem:[#allocation2] sm:$0x3] %vm5496_vm6, %v5493_v4 }
 0xf74   :  { %7328 = shalt.err (!%p7325_p4)
}
 0xf75   :  { %s7329_s3 = scalar_lea.hbm %s10934_s26, 32 }
 0xf76   :  { %p7330_p5 = scmp.ne.s32.totalorder %s10934_s26, %s7329_s3  ;;  %p7333_p6 = scmp.lt.u32.totalorder %s7329_s3, %s10934_s26 }
 0xf78   :  { %p7335_p7 = pnand %p7333_p6, %p7330_p5 }
 0xf7a   :  { %7338 = shalt.err (!%p7335_p7)
}
 0xf7b   :  { %5507 = dma.vmem_to_hbm [thread:$0]  %s5505_s8, 32, %s10934_s26, [#allocation3]  }
 0xf7c   :  { %7339 = dma.done.wait [#allocation3], 32  }
 0xf7d   :  { %7340 = vsyncadd [#allocation3], 4294967264 }
 0xf7e   :  { %5511 = vsyncpa [#allocation3], 1 }

</bundles_post_ra>
